<compile_context>
chip_gen: v7x
topology: tpu7x:2x2x1
jax: 0.10.0
libtpu: 0.0.40
codegen_flags: <defaults>
</compile_context>

<pallas_src>
import jax
import jax.numpy as jnp
from jax.experimental import pallas as pl
from jax.experimental.pallas import tpu as pltpu


# ----------------------------------------------------------------------------
# Fused per-grid-step kernel: QKV projections + dual attention + output projs
# ----------------------------------------------------------------------------
def _cross_attn_kernel(x1_ref, x2_ref, wqkv1_ref, wqkv2_ref,
                       wo1_ref, bo1_ref, wo2_ref, bo2_ref,
                       out1_ref, out2_ref):
    f32 = jnp.float32
    bf16 = jnp.bfloat16
    Bb, S1, D1 = x1_ref.shape
    _, S2, D2 = x2_ref.shape
    K = wo1_ref.shape[0]                     # k_dim (= v_dim, num_heads == 1)

    # Cast activations to bf16 in-kernel and flatten (Bb, S, D) -> (Bb*S, D) so the
    # QKV projection is one tall MXU matmul (M = Bb*S fills the 256-wide MXU rows).
    x1 = x1_ref[...].astype(bf16).reshape(Bb * S1, D1)
    x2 = x2_ref[...].astype(bf16).reshape(Bb * S2, D2)

    # Fused QKV projections (1/sqrt(dk) pre-folded into the Q weight columns);
    # fp32 accumulation, single cast of the whole qkv tile back to bf16.
    qkv1 = jnp.dot(x1, wqkv1_ref[...], preferred_element_type=f32).astype(bf16)
    qkv2 = jnp.dot(x2, wqkv2_ref[...], preferred_element_type=f32).astype(bf16)
    qkv1 = qkv1.reshape(Bb, S1, 3 * K)
    qkv2 = qkv2.reshape(Bb, S2, 3 * K)

    # Lane-aligned 128-wide static slices.
    q1, k1, v1 = qkv1[:, :, 0:K], qkv1[:, :, K:2 * K], qkv1[:, :, 2 * K:3 * K]
    q2, k2, v2 = qkv2[:, :, 0:K], qkv2[:, :, K:2 * K], qkv2[:, :, 2 * K:3 * K]

    def _attend(q, k, v):
        # (Bb, Sq, Sk) logits, fp32 accumulation, no explicit transpose (contract last dims).
        s = jnp.einsum("bqd,bkd->bqk", q, k, preferred_element_type=f32)
        m = jnp.max(s, axis=-1, keepdims=True)
        p = jnp.exp(s - m)
        denom = jnp.sum(p, axis=-1, keepdims=True)
        o = jnp.einsum("bqk,bkd->bqd", p.astype(bf16), v, preferred_element_type=f32)
        # Normalize AFTER the PV matmul: (Sq, K) elements instead of (Sq, Sk); EUP divide.
        return o * pl.reciprocal(denom, approx=True)

    o1 = _attend(q1, k2, v2).reshape(Bb * S1, K)     # stream-1 queries attend to stream 2
    o2 = _attend(q2, k1, v1).reshape(Bb * S2, K)     # stream-2 queries attend to stream 1

    out1 = jnp.dot(o1.astype(bf16), wo1_ref[...], preferred_element_type=f32) + bo1_ref[...]
    out2 = jnp.dot(o2.astype(bf16), wo2_ref[...], preferred_element_type=f32) + bo2_ref[...]
    out1_ref[...] = out1.reshape(Bb, S1, D1).astype(out1_ref.dtype)
    out2_ref[...] = out2.reshape(Bb, S2, D2).astype(out2_ref.dtype)


# ----------------------------------------------------------------------------
# Parameters
# ----------------------------------------------------------------------------
def init_params(key, in_dim1, in_dim2, num_heads=1):
    """Deterministic init mirroring nn.Linear default: U(-1/sqrt(fan_in), 1/sqrt(fan_in)).
    Weights are stored as (in, out), i.e. PyTorch weight transposed."""
    assert num_heads == 1, "kernel specialized to the module default num_heads=1"
    k_dim = in_dim1
    v_dim = in_dim1
    keys = jax.random.split(key, 10)

    def w(k, fan_in, fan_out):
        lim = 1.0 / (fan_in ** 0.5)
        return jax.random.uniform(k, (fan_in, fan_out), jnp.float32, -lim, lim)

    def bias(k, fan_in, fan_out):
        lim = 1.0 / (fan_in ** 0.5)
        return jax.random.uniform(k, (fan_out,), jnp.float32, -lim, lim)

    return {
        "wq1": w(keys[0], in_dim1, k_dim), "wk2": w(keys[1], in_dim2, k_dim),
        "wv2": w(keys[2], in_dim2, v_dim), "wq2": w(keys[3], in_dim2, k_dim),
        "wk1": w(keys[4], in_dim1, k_dim), "wv1": w(keys[5], in_dim1, v_dim),
        "wo1": w(keys[6], v_dim, in_dim1), "bo1": bias(keys[7], v_dim, in_dim1),
        "wo2": w(keys[8], v_dim, in_dim2), "bo2": bias(keys[9], v_dim, in_dim2),
    }


def fuse_params(params, compute_dtype=jnp.bfloat16):
    """ONE-TIME weight fusion (hoisted out of the per-call path):
      * concat wq|wk|wv -> (D, 3K), fold 1/sqrt(dk) into the Q columns,
      * cast matmul weights to bf16, reshape biases to (1, D) fp32."""
    k_dim = params["wq1"].shape[1]
    scale = 1.0 / (k_dim ** 0.5)
    wqkv1 = jnp.concatenate([params["wq1"] * scale, params["wk1"], params["wv1"]],
                            axis=1).astype(compute_dtype)
    wqkv2 = jnp.concatenate([params["wq2"] * scale, params["wk2"], params["wv2"]],
                            axis=1).astype(compute_dtype)
    return {
        "wqkv1": wqkv1,
        "wqkv2": wqkv2,
        "wo1": params["wo1"].astype(compute_dtype),
        "wo2": params["wo2"].astype(compute_dtype),
        "bo1": params["bo1"].reshape(1, -1).astype(jnp.float32),
        "bo2": params["bo2"].reshape(1, -1).astype(jnp.float32),
    }


# ----------------------------------------------------------------------------
# Forward
# ----------------------------------------------------------------------------
def cross_attention_forward(fused, x1, x2, *, block_batch=None, out_dtype=None):
    B, S1, D1 = x1.shape
    B2, S2, D2 = x2.shape
    assert B == B2, "batch mismatch"
    K = fused["wo1"].shape[0]
    K3 = fused["wqkv1"].shape[1]
    assert K3 == 3 * K and fused["wqkv1"].shape[0] == D1 and fused["wqkv2"].shape[0] == D2

    out_dtype = x1.dtype if out_dtype is None else out_dtype

    if block_batch is None:
        # Grow Bb (keeping it a divisor of B) until the projection M-dim reaches 256
        # (v6e/v7x MXU rows), but keep >= 4 grid steps so pipelining engages and both
        # v7x TensorCores get >= 2 steps each. v5e is already saturated at M = 128.
        block_batch = 1
        while (B % (2 * block_batch) == 0 and B // (2 * block_batch) >= 4
               and block_batch * min(S1, S2) < 256):
            block_batch *= 2
    assert B % block_batch == 0, "block_batch must divide batch"
    grid = (B // block_batch,)

    itemsize_out = jnp.dtype(out_dtype).itemsize
    cost = pl.CostEstimate(
        flops=2 * B * (S1 * D1 * K3 + S2 * D2 * K3 + 2 * S1 * S2 * K
                       + S1 * K * D1 + S2 * K * D2),
        transcendentals=2 * B * S1 * S2,
        bytes_accessed=(x1.size * x1.dtype.itemsize + x2.size * x2.dtype.itemsize
                        + sum(int(v.size) * v.dtype.itemsize for v in fused.values())
                        + B * S1 * D1 * itemsize_out + B * S2 * D2 * itemsize_out),
    )

    return pl.pallas_call(
        _cross_attn_kernel,
        out_shape=(jax.ShapeDtypeStruct((B, S1, D1), out_dtype),
                   jax.ShapeDtypeStruct((B, S2, D2), out_dtype)),
        grid=grid,
        in_specs=[
            pl.BlockSpec((block_batch, S1, D1), lambda b: (b, 0, 0)),   # x1 block
            pl.BlockSpec((block_batch, S2, D2), lambda b: (b, 0, 0)),   # x2 block
            pl.BlockSpec((D1, K3), lambda b: (0, 0)),                   # wqkv1 (resident)
            pl.BlockSpec((D2, K3), lambda b: (0, 0)),                   # wqkv2 (resident)
            pl.BlockSpec((K, D1), lambda b: (0, 0)),                    # wo1
            pl.BlockSpec((1, D1), lambda b: (0, 0)),                    # bo1
            pl.BlockSpec((K, D2), lambda b: (0, 0)),                    # wo2
            pl.BlockSpec((1, D2), lambda b: (0, 0)),                    # bo2
        ],
        out_specs=(
            pl.BlockSpec((block_batch, S1, D1), lambda b: (b, 0, 0)),
            pl.BlockSpec((block_batch, S2, D2), lambda b: (b, 0, 0)),
        ),
        compiler_params=pltpu.CompilerParams(
            dimension_semantics=("parallel",)),     # batch axis sharded across TCs
        cost_estimate=cost,
    )(x1, x2, fused["wqkv1"], fused["wqkv2"],
      fused["wo1"], fused["bo1"], fused["wo2"], fused["bo2"])


# ----------------------------------------------------------------------------
# Pure-JAX fp32 reference (true module semantics) for verification
# ----------------------------------------------------------------------------
def reference_forward(params, x1, x2):
    k_dim = params["wq1"].shape[1]
    q1 = x1 @ params["wq1"]
    k2 = x2 @ params["wk2"]
    v2 = x2 @ params["wv2"]
    q2 = x2 @ params["wq2"]
    k1 = x1 @ params["wk1"]
    v1 = x1 @ params["wv1"]
    a1 = jax.nn.softmax(jnp.einsum("bqd,bkd->bqk", q1, k2) / k_dim ** 0.5, axis=-1)
    a2 = jax.nn.softmax(jnp.einsum("bqd,bkd->bqk", q2, k1) / k_dim ** 0.5, axis=-1)
    o1 = jnp.einsum("bqk,bkd->bqd", a1, v2) @ params["wo1"] + params["bo1"]
    o2 = jnp.einsum("bqk,bkd->bqd", a2, v1) @ params["wo2"] + params["bo2"]
    return o1, o2


if __name__ == "__main__":
    # Small, tile-aligned shapes consistent with the module (in_dim1 < in_dim2).
    # B=8 with block_batch=2 -> grid of 4 "parallel" steps (>=2 per v7x TensorCore).
    B, S1, S2 = 8, 128, 128
    IN_DIM1, IN_DIM2 = 128, 256

    key = jax.random.PRNGKey(0)
    kp, kx1, kx2 = jax.random.split(key, 3)
    params = init_params(kp, IN_DIM1, IN_DIM2, num_heads=1)
    x1 = jax.random.normal(kx1, (B, S1, IN_DIM1), jnp.float32)
    x2 = jax.random.normal(kx2, (B, S2, IN_DIM2), jnp.float32)

    # Weight fusion + bf16 cast done ONCE (not on every forward call).
    fused = fuse_params(params)
    fused = {k: jax.block_until_ready(v) for k, v in fused.items()}

    fwd = jax.jit(cross_attention_forward)
    out1, out2 = jax.block_until_ready(fwd(fused, x1, x2))

    ref1, ref2 = reference_forward(params, x1, x2)

    assert out1.shape == (B, S1, IN_DIM1) and out2.shape == (B, S2, IN_DIM2)
    o1f = out1.astype(jnp.float32)
    o2f = out2.astype(jnp.float32)
    # bf16 matmul operands + approx reciprocal vs fp32 reference -> loosened tolerance.
    assert jnp.allclose(o1f, ref1, atol=3e-2, rtol=3e-2), float(jnp.max(jnp.abs(o1f - ref1)))
    assert jnp.allclose(o2f, ref2, atol=3e-2, rtol=3e-2), float(jnp.max(jnp.abs(o2f - ref2)))
    print("KERNEL_OK")
</pallas_src>

<mosaic_0001>
module attributes {stable_mosaic.version = 11 : i64} {
  func.func @_cross_attn_kernel(%arg0: i32, %arg1: memref<2x128x128xf32, #tpu.memory_space<vmem>>, %arg2: memref<2x128x256xf32, #tpu.memory_space<vmem>>, %arg3: memref<128x384xbf16, #tpu.memory_space<vmem>>, %arg4: memref<256x384xbf16, #tpu.memory_space<vmem>>, %arg5: memref<128x128xbf16, #tpu.memory_space<vmem>>, %arg6: memref<1x128xf32, #tpu.memory_space<vmem>>, %arg7: memref<128x256xbf16, #tpu.memory_space<vmem>>, %arg8: memref<1x256xf32, #tpu.memory_space<vmem>>, %arg9: memref<2x128x128xf32, #tpu.memory_space<vmem>>, %arg10: memref<2x128x256xf32, #tpu.memory_space<vmem>>) attributes {dimension_semantics = [#tpu.dimension_semantics<parallel>], iteration_bounds = array<i64: 4>, scalar_prefetch = 0 : i64, scratch_operands = 0 : i64, tpu.core_type = #tpu.core_type<tc>, window_params = [{transform_indices = @transform_0, window_bounds = array<i64: 2, 128, 128>}, {transform_indices = @transform_1, window_bounds = array<i64: 2, 128, 256>}, {pipeline_mode = #tpu.pipeline_mode<synchronous>, transform_indices = @transform_2, window_bounds = array<i64: 128, 384>}, {pipeline_mode = #tpu.pipeline_mode<synchronous>, transform_indices = @transform_3, window_bounds = array<i64: 256, 384>}, {pipeline_mode = #tpu.pipeline_mode<synchronous>, transform_indices = @transform_4, window_bounds = array<i64: 128, 128>}, {pipeline_mode = #tpu.pipeline_mode<synchronous>, transform_indices = @transform_5, window_bounds = array<i64: 1, 128>}, {pipeline_mode = #tpu.pipeline_mode<synchronous>, transform_indices = @transform_6, window_bounds = array<i64: 128, 256>}, {pipeline_mode = #tpu.pipeline_mode<synchronous>, transform_indices = @transform_7, window_bounds = array<i64: 1, 256>}, {transform_indices = @transform_8, window_bounds = array<i64: 2, 128, 128>}, {transform_indices = @transform_9, window_bounds = array<i64: 2, 128, 256>}]} {
    %c0 = arith.constant 0 : index
    %c0_0 = arith.constant 0 : index
    %c0_1 = arith.constant 0 : index
    %0 = vector.load %arg1[%c0, %c0_0, %c0_1] : memref<2x128x128xf32, #tpu.memory_space<vmem>>, vector<2x128x128xf32>
    %1 = arith.truncf %0 : vector<2x128x128xf32> to vector<2x128x128xbf16>
    %2 = vector.shape_cast %1 : vector<2x128x128xbf16> to vector<256x128xbf16>
    %c0_2 = arith.constant 0 : index
    %c0_3 = arith.constant 0 : index
    %c0_4 = arith.constant 0 : index
    %3 = vector.load %arg2[%c0_2, %c0_3, %c0_4] : memref<2x128x256xf32, #tpu.memory_space<vmem>>, vector<2x128x256xf32>
    %4 = arith.truncf %3 : vector<2x128x256xf32> to vector<2x128x256xbf16>
    %5 = vector.shape_cast %4 : vector<2x128x256xbf16> to vector<256x256xbf16>
    %c0_5 = arith.constant 0 : index
    %c0_6 = arith.constant 0 : index
    %6 = vector.load %arg3[%c0_5, %c0_6] : memref<128x384xbf16, #tpu.memory_space<vmem>>, vector<128x384xbf16>
    %cst = arith.constant dense<0.000000e+00> : vector<256x384xf32>
    %7 = tpu.matmul %2, %6, %cst {dimension_numbers = #tpu.dot_dimension_numbers<[1], [0], [0], [1], [0, 0, 1, 1], [], []>} : vector<256x128xbf16>, vector<128x384xbf16>, vector<256x384xf32> -> vector<256x384xf32>
    %8 = arith.truncf %7 : vector<256x384xf32> to vector<256x384xbf16>
    %c0_7 = arith.constant 0 : index
    %c0_8 = arith.constant 0 : index
    %9 = vector.load %arg4[%c0_7, %c0_8] : memref<256x384xbf16, #tpu.memory_space<vmem>>, vector<256x384xbf16>
    %cst_9 = arith.constant dense<0.000000e+00> : vector<256x384xf32>
    %10 = tpu.matmul %5, %9, %cst_9 {dimension_numbers = #tpu.dot_dimension_numbers<[1], [0], [0], [1], [0, 0, 1, 1], [], []>} : vector<256x256xbf16>, vector<256x384xbf16>, vector<256x384xf32> -> vector<256x384xf32>
    %11 = arith.truncf %10 : vector<256x384xf32> to vector<256x384xbf16>
    %12 = vector.shape_cast %8 : vector<256x384xbf16> to vector<2x128x384xbf16>
    %13 = vector.shape_cast %11 : vector<256x384xbf16> to vector<2x128x384xbf16>
    %14 = vector.extract_strided_slice %12 {offsets = [0, 0, 0], sizes = [2, 128, 128], strides = [1, 1, 1]} : vector<2x128x384xbf16> to vector<2x128x128xbf16>
    %15 = vector.extract_strided_slice %12 {offsets = [0, 0, 128], sizes = [2, 128, 128], strides = [1, 1, 1]} : vector<2x128x384xbf16> to vector<2x128x128xbf16>
    %16 = vector.extract_strided_slice %12 {offsets = [0, 0, 256], sizes = [2, 128, 128], strides = [1, 1, 1]} : vector<2x128x384xbf16> to vector<2x128x128xbf16>
    %17 = vector.extract_strided_slice %13 {offsets = [0, 0, 0], sizes = [2, 128, 128], strides = [1, 1, 1]} : vector<2x128x384xbf16> to vector<2x128x128xbf16>
    %18 = vector.extract_strided_slice %13 {offsets = [0, 0, 128], sizes = [2, 128, 128], strides = [1, 1, 1]} : vector<2x128x384xbf16> to vector<2x128x128xbf16>
    %19 = vector.extract_strided_slice %13 {offsets = [0, 0, 256], sizes = [2, 128, 128], strides = [1, 1, 1]} : vector<2x128x384xbf16> to vector<2x128x128xbf16>
    "tpu.trace_start"() <{level = 10 : i32, message = "bqd,bkd->bqk"}> : () -> ()
    %cst_10 = arith.constant dense<0.000000e+00> : vector<2x128x128xf32>
    %20 = tpu.matmul %14, %18, %cst_10 {dimension_numbers = #tpu.dot_dimension_numbers<[2], [2], [1], [1], [0, 0, 0, 1, 1, 1], [0], [0]>} : vector<2x128x128xbf16>, vector<2x128x128xbf16>, vector<2x128x128xf32> -> vector<2x128x128xf32>
    "tpu.trace_stop"() : () -> ()
    %cst_11 = arith.constant dense<0xFF800000> : vector<2x128xf32>
    %21 = vector.multi_reduction <maximumf>, %20, %cst_11 [2] : vector<2x128x128xf32> to vector<2x128xf32>
    %22 = vector.shape_cast %21 : vector<2x128xf32> to vector<2x128x1xf32>
    %23 = vector.broadcast %22 : vector<2x128x1xf32> to vector<2x128x128xf32>
    %24 = arith.subf %20, %23 : vector<2x128x128xf32>
    %25 = math.exp %24 : vector<2x128x128xf32>
    %cst_12 = arith.constant dense<0.000000e+00> : vector<2x128xf32>
    %26 = vector.multi_reduction <add>, %25, %cst_12 [2] : vector<2x128x128xf32> to vector<2x128xf32>
    %27 = vector.shape_cast %26 : vector<2x128xf32> to vector<2x128x1xf32>
    %28 = arith.truncf %25 : vector<2x128x128xf32> to vector<2x128x128xbf16>
    "tpu.trace_start"() <{level = 10 : i32, message = "bqk,bkd->bqd"}> : () -> ()
    %cst_13 = arith.constant dense<0.000000e+00> : vector<2x128x128xf32>
    %29 = tpu.matmul %28, %19, %cst_13 {dimension_numbers = #tpu.dot_dimension_numbers<[2], [1], [1], [2], [0, 0, 0, 1, 1, 2], [0], [0]>} : vector<2x128x128xbf16>, vector<2x128x128xbf16>, vector<2x128x128xf32> -> vector<2x128x128xf32>
    "tpu.trace_stop"() : () -> ()
    %30 = tpu.reciprocal %27 {approx = true} : vector<2x128x1xf32> -> vector<2x128x1xf32>
    %31 = vector.broadcast %30 : vector<2x128x1xf32> to vector<2x128x128xf32>
    %32 = arith.mulf %29, %31 : vector<2x128x128xf32>
    %33 = vector.shape_cast %32 : vector<2x128x128xf32> to vector<256x128xf32>
    "tpu.trace_start"() <{level = 10 : i32, message = "bqd,bkd->bqk"}> : () -> ()
    %cst_14 = arith.constant dense<0.000000e+00> : vector<2x128x128xf32>
    %34 = tpu.matmul %17, %15, %cst_14 {dimension_numbers = #tpu.dot_dimension_numbers<[2], [2], [1], [1], [0, 0, 0, 1, 1, 1], [0], [0]>} : vector<2x128x128xbf16>, vector<2x128x128xbf16>, vector<2x128x128xf32> -> vector<2x128x128xf32>
    "tpu.trace_stop"() : () -> ()
    %cst_15 = arith.constant dense<0xFF800000> : vector<2x128xf32>
    %35 = vector.multi_reduction <maximumf>, %34, %cst_15 [2] : vector<2x128x128xf32> to vector<2x128xf32>
    %36 = vector.shape_cast %35 : vector<2x128xf32> to vector<2x128x1xf32>
    %37 = vector.broadcast %36 : vector<2x128x1xf32> to vector<2x128x128xf32>
    %38 = arith.subf %34, %37 : vector<2x128x128xf32>
    %39 = math.exp %38 : vector<2x128x128xf32>
    %cst_16 = arith.constant dense<0.000000e+00> : vector<2x128xf32>
    %40 = vector.multi_reduction <add>, %39, %cst_16 [2] : vector<2x128x128xf32> to vector<2x128xf32>
    %41 = vector.shape_cast %40 : vector<2x128xf32> to vector<2x128x1xf32>
    %42 = arith.truncf %39 : vector<2x128x128xf32> to vector<2x128x128xbf16>
    "tpu.trace_start"() <{level = 10 : i32, message = "bqk,bkd->bqd"}> : () -> ()
    %cst_17 = arith.constant dense<0.000000e+00> : vector<2x128x128xf32>
    %43 = tpu.matmul %42, %16, %cst_17 {dimension_numbers = #tpu.dot_dimension_numbers<[2], [1], [1], [2], [0, 0, 0, 1, 1, 2], [0], [0]>} : vector<2x128x128xbf16>, vector<2x128x128xbf16>, vector<2x128x128xf32> -> vector<2x128x128xf32>
    "tpu.trace_stop"() : () -> ()
    %44 = tpu.reciprocal %41 {approx = true} : vector<2x128x1xf32> -> vector<2x128x1xf32>
    %45 = vector.broadcast %44 : vector<2x128x1xf32> to vector<2x128x128xf32>
    %46 = arith.mulf %43, %45 : vector<2x128x128xf32>
    %47 = vector.shape_cast %46 : vector<2x128x128xf32> to vector<256x128xf32>
    %48 = arith.truncf %33 : vector<256x128xf32> to vector<256x128xbf16>
    %c0_18 = arith.constant 0 : index
    %c0_19 = arith.constant 0 : index
    %49 = vector.load %arg5[%c0_18, %c0_19] : memref<128x128xbf16, #tpu.memory_space<vmem>>, vector<128x128xbf16>
    %cst_20 = arith.constant dense<0.000000e+00> : vector<256x128xf32>
    %50 = tpu.matmul %48, %49, %cst_20 {dimension_numbers = #tpu.dot_dimension_numbers<[1], [0], [0], [1], [0, 0, 1, 1], [], []>} : vector<256x128xbf16>, vector<128x128xbf16>, vector<256x128xf32> -> vector<256x128xf32>
    %c0_21 = arith.constant 0 : index
    %c0_22 = arith.constant 0 : index
    %51 = vector.load %arg6[%c0_21, %c0_22] : memref<1x128xf32, #tpu.memory_space<vmem>>, vector<1x128xf32>
    %52 = vector.broadcast %51 : vector<1x128xf32> to vector<256x128xf32>
    %53 = arith.addf %50, %52 : vector<256x128xf32>
    %54 = arith.truncf %47 : vector<256x128xf32> to vector<256x128xbf16>
    %c0_23 = arith.constant 0 : index
    %c0_24 = arith.constant 0 : index
    %55 = vector.load %arg7[%c0_23, %c0_24] : memref<128x256xbf16, #tpu.memory_space<vmem>>, vector<128x256xbf16>
    %cst_25 = arith.constant dense<0.000000e+00> : vector<256x256xf32>
    %56 = tpu.matmul %54, %55, %cst_25 {dimension_numbers = #tpu.dot_dimension_numbers<[1], [0], [0], [1], [0, 0, 1, 1], [], []>} : vector<256x128xbf16>, vector<128x256xbf16>, vector<256x256xf32> -> vector<256x256xf32>
    %c0_26 = arith.constant 0 : index
    %c0_27 = arith.constant 0 : index
    %57 = vector.load %arg8[%c0_26, %c0_27] : memref<1x256xf32, #tpu.memory_space<vmem>>, vector<1x256xf32>
    %58 = vector.broadcast %57 : vector<1x256xf32> to vector<256x256xf32>
    %59 = arith.addf %56, %58 : vector<256x256xf32>
    %60 = vector.shape_cast %53 : vector<256x128xf32> to vector<2x128x128xf32>
    %c0_28 = arith.constant 0 : index
    %c0_29 = arith.constant 0 : index
    %c0_30 = arith.constant 0 : index
    %61 = vector.load %arg9[%c0_28, %c0_29, %c0_30] : memref<2x128x128xf32, #tpu.memory_space<vmem>>, vector<2x128x128xf32>
    tpu.vector_store %arg9[%c0_28, %c0_29, %c0_30], %60 {strides = array<i32>} : memref<2x128x128xf32, #tpu.memory_space<vmem>>, vector<2x128x128xf32>,
    %62 = vector.shape_cast %59 : vector<256x256xf32> to vector<2x128x256xf32>
    %c0_31 = arith.constant 0 : index
    %c0_32 = arith.constant 0 : index
    %c0_33 = arith.constant 0 : index
    %63 = vector.load %arg10[%c0_31, %c0_32, %c0_33] : memref<2x128x256xf32, #tpu.memory_space<vmem>>, vector<2x128x256xf32>
    tpu.vector_store %arg10[%c0_31, %c0_32, %c0_33], %62 {strides = array<i32>} : memref<2x128x256xf32, #tpu.memory_space<vmem>>, vector<2x128x256xf32>,
    return
  }
  func.func @transform_0(%arg0: i32) -> (i32, i32, i32) {
    %c0_i32 = arith.constant 0 : i32
    %c0_i32_0 = arith.constant 0 : i32
    %c0_i32_1 = arith.constant 0 : i32
    return %arg0, %c0_i32, %c0_i32_0 : i32, i32, i32
  }
  func.func @transform_1(%arg0: i32) -> (i32, i32, i32) {
    %c0_i32 = arith.constant 0 : i32
    %c0_i32_0 = arith.constant 0 : i32
    %c0_i32_1 = arith.constant 0 : i32
    return %arg0, %c0_i32, %c0_i32_0 : i32, i32, i32
  }
  func.func @transform_2(%arg0: i32) -> (i32, i32) {
    %c0_i32 = arith.constant 0 : i32
    %c0_i32_0 = arith.constant 0 : i32
    %c0_i32_1 = arith.constant 0 : i32
    return %c0_i32, %c0_i32_0 : i32, i32
  }
  func.func @transform_3(%arg0: i32) -> (i32, i32) {
    %c0_i32 = arith.constant 0 : i32
    %c0_i32_0 = arith.constant 0 : i32
    %c0_i32_1 = arith.constant 0 : i32
    return %c0_i32, %c0_i32_0 : i32, i32
  }
  func.func @transform_4(%arg0: i32) -> (i32, i32) {
    %c0_i32 = arith.constant 0 : i32
    %c0_i32_0 = arith.constant 0 : i32
    %c0_i32_1 = arith.constant 0 : i32
    return %c0_i32, %c0_i32_0 : i32, i32
  }
  func.func @transform_5(%arg0: i32) -> (i32, i32) {
    %c0_i32 = arith.constant 0 : i32
    %c0_i32_0 = arith.constant 0 : i32
    %c0_i32_1 = arith.constant 0 : i32
    return %c0_i32, %c0_i32_0 : i32, i32
  }
  func.func @transform_6(%arg0: i32) -> (i32, i32) {
    %c0_i32 = arith.constant 0 : i32
    %c0_i32_0 = arith.constant 0 : i32
    %c0_i32_1 = arith.constant 0 : i32
    return %c0_i32, %c0_i32_0 : i32, i32
  }
  func.func @transform_7(%arg0: i32) -> (i32, i32) {
    %c0_i32 = arith.constant 0 : i32
    %c0_i32_0 = arith.constant 0 : i32
    %c0_i32_1 = arith.constant 0 : i32
    return %c0_i32, %c0_i32_0 : i32, i32
  }
  func.func @transform_8(%arg0: i32) -> (i32, i32, i32) {
    %c0_i32 = arith.constant 0 : i32
    %c0_i32_0 = arith.constant 0 : i32
    %c0_i32_1 = arith.constant 0 : i32
    return %arg0, %c0_i32, %c0_i32_0 : i32, i32, i32
  }
  func.func @transform_9(%arg0: i32) -> (i32, i32, i32) {
    %c0_i32 = arith.constant 0 : i32
    %c0_i32_0 = arith.constant 0 : i32
    %c0_i32_1 = arith.constant 0 : i32
    return %arg0, %c0_i32, %c0_i32_0 : i32, i32, i32
  }
}

</mosaic_0001>

<bundles_post_ra>
// kernel: cross_attention_forward.1
= control target key start
LH: loop header
LB: loop body
LE: loop exit
PB: predicated region body
PF: predicated region fallthrough
CT: control target
= control target key end

     0   :  { %s7931_s0 = inlined_call_operand.hbm [shape: f32[8,128,128], index: 0, kind: input, shape index: {}]   ;;  %s7932_s1 = inlined_call_operand.hbm [shape: f32[8,128,256], index: 1, kind: input, shape index: {}]   ;;  %s7933_s2 = inlined_call_operand.hbm [shape: bf16[128,384], index: 2, kind: input, shape index: {}]   ;;  %s7934_s3 = inlined_call_operand.hbm [shape: bf16[256,384], index: 3, kind: input, shape index: {}]   ;;  %s7935_s4 = inlined_call_operand.hbm [shape: bf16[128,128], index: 4, kind: input, shape index: {}]   ;;  %s7936_s5 = inlined_call_operand.hbm [shape: f32[1,128], index: 5, kind: input, shape index: {}]   ;;  %s7937_s6 = inlined_call_operand.hbm [shape: bf16[128,256], index: 6, kind: input, shape index: {}]   ;;  %s7938_s7 = inlined_call_operand.vmem [shape: f32[1,256], index: 7, kind: input, shape index: {}]   ;;  %s7939_s8 = inlined_call_operand.hbm [shape: f32[8,128,128], index: 8, kind: output, shape index: {0}]   ;;  %s7940_s9 = inlined_call_operand.hbm [shape: f32[8,128,256], index: 9, kind: output, shape index: {1}]  }
   0x1   :  { %8010 = sst [smem:[#allocation73_spill]] %s7931_s0 }
   0x2   :  { %8011 = sst [smem:[#allocation74_spill]] %s7933_s2 }
   0x3   :  { %8012 = sst [smem:[#allocation75_spill]] %s7934_s3 }
   0x4   :  { %8013 = sst [smem:[#allocation76_spill]] %s7935_s4 }
   0x5   :  { %8014 = sst [smem:[#allocation77_spill]] %s7936_s5 }
   0x6   :  { %8015 = sst [smem:[#allocation78_spill]] %s7937_s6 }
   0x7   :  { %8016 = sst [smem:[#allocation79_spill]] %s7940_s9 }
   0x8   :  { %15 = vsyncpa [#allocation3], 0 }
   0x9   :  { %17 = vsyncpa [#allocation3 + $0x1], 0 }
   0xa   :  { %18 = vsyncpa [#allocation6], 0 }
   0xb   :  { %20 = vsyncpa [#allocation6 + $0x1], 0 }
   0xc   :  { %21 = vsyncpa [#allocation9], 0 }
   0xd   :  { %22 = vsyncpa [#allocation12], 0 }
   0xe   :  { %23 = vsyncpa [#allocation4], 0 }
   0xf   :  { %25 = vsyncpa [#allocation4 + $0x1], 0 }
  0x10   :  { %26 = vsyncpa [#allocation16], 0 }
  0x11   :  { %28 = vsyncpa [#allocation16 + $0x1], 0  ;;  %s5869_s30 = smov 0   ;;  %s5871_s10 = smov 0  }
  0x12   :  { %s5873_s11 = smov 0   ;;  %s5875_s12 = smov 0  }
  0x13 LB: > { %s5797_s13 = smov [#allocation7]   ;;  %s5890_s15 = sadd.s32 4294967295, %s5795_s12   ;;  %s5795_s12 = sphi %s5875_s12, %s8282_s12   ;;  %s5791_s11 = sphi %s5873_s11, %s8281_s11   ;;  %s5787_s10 = sphi %s5871_s10, %s8280_s10   ;;  %s5783_s30 = sphi %s5869_s30, %s8279_s30  }
  0x14   : > { %s281_s14 = sshll.u32 %s5797_s13, 4  ;;  %p4165_p0 = scmp.ge.s32.totalorder %s5795_s12, 1  ;;  %s5895_s14 = int_to_ptr.vmem [resolvable:$true] %s281_s14 }
  0x15   : > { %p7942_p1 = scmp.eq.s32.totalorder %s5890_s15, 0  ;;  %p269_p2 = scmp.lt.s32.totalorder %s5795_s12, 5 }
  0x16   : > { %s5798_s17 = smov [#allocation8]   ;;  %s5799_s20 = smov [#allocation11]  }
  0x17   : > { %p5897_p3 = pnand %p4165_p0, %p269_p2  ;;  %s294_s18 = sshll.u32 %s5798_s17, 4  ;;  %s5909_s18 = int_to_ptr.vmem [resolvable:$true] %s294_s18 }
  0x18   : > { %s321_s21 = sshll.u32 %s5799_s20, 4  ;;  %s8019_s2 = sld [smem:[#allocation74_spill]]  ;;  %s5911_s21 = int_to_ptr.vmem [resolvable:$true] %s321_s21 }
  0x19   : > { %s8017_s16 = scalar_select %p5897_p3, 1, 0 }
  0x1a   : > { %p5005_p4 = pneg %p5897_p3 }
  0x1c   : > { %p5905_p5 = pnand %p5005_p4, %p7942_p1 }
  0x1e   : > { %s5481_s24 = scalar_lea.hbm %s8019_s2, 3072  ;;  %p5921_p7 = pneg %p5905_p5 }
  0x1f   : > { %p5482_p6 = scmp.ne.s32.totalorder %s8019_s2, %s5481_s24  ;;  %p5488_p10 = scmp.lt.u32.totalorder %s5481_s24, %s8019_s2 }
  0x21   : > { %p5484_p8 = pnand %p5921_p7, %p5482_p6 }
  0x23   : > { %p5485_p9 = pneg %p5484_p8 }
  0x25   : > { %p5490_p11 = pnand %p5488_p10, %p5485_p9 }
  0x27   : > { %5493 = shalt.err (!%p5490_p11)
}
  0x28   : > { %s5494_s13 = scalar_lea.vmem %s5895_s14, 3072  ;;  %p5502_p2 = scmp.lt.s32.totalorder %s5895_s14, %s5895_s14 }
  0x29   : > { %p5495_p12 = scmp.ne.s32.totalorder %s5895_s14, %s5494_s13  ;;  %p5503_p4 = scmp.lt.s32.totalorder %s5494_s13, %s5494_s13 }
  0x2b   : > { %p5497_p13 = pnand %p5495_p12, %p5921_p7  ;;  %p5504_p6 = por %p5503_p4, %p5502_p2 }
  0x2d   : > { %p5498_p0 = pneg %p5497_p13 }
  0x2f   : > { %p5505_p8 = pnand %p5504_p6, %p5498_p0 }
  0x31   : > { %5508 = shalt.err (!%p5505_p8)
}
  0x32   : > { %s5800_s17 = smov 192   ;;  %s5801_s20 = smov 12  }
  0x33   : > { %5008 = dma.hbm_to_vmem [thread:$0]  (!%p5905_p5), %s8019_s2, 3072, %s5895_s14, [#allocation6], %s5800_s17, %s5800_s17, %s5801_s20  }
  0x34   : > { %s8021_s3 = sld [smem:[#allocation75_spill]] }
  0x3a   : > { %s5509_s26 = scalar_lea.hbm %s8021_s3, 6144 }
  0x3b   : > { %p5510_p9 = scmp.ne.s32.totalorder %s8021_s3, %s5509_s26  ;;  %p5516_p12 = scmp.lt.u32.totalorder %s5509_s26, %s8021_s3 }
  0x3d   : > { %p5512_p10 = pnand %p5510_p9, %p5921_p7 }
  0x3f   : > { %p5513_p11 = pneg %p5512_p10 }
  0x41   : > { %p5518_p13 = pnand %p5516_p12, %p5513_p11 }
  0x43   : > { %5521 = shalt.err (!%p5518_p13)
}
  0x44   : > { %s5522_s14 = scalar_lea.vmem %s5909_s18, 6144  ;;  %p5530_p6 = scmp.lt.s32.totalorder %s5909_s18, %s5909_s18 }
  0x45   : > { %p5523_p0 = scmp.ne.s32.totalorder %s5909_s18, %s5522_s14  ;;  %p5531_p8 = scmp.lt.s32.totalorder %s5522_s14, %s5522_s14 }
  0x47   : > { %p5525_p2 = pnand %p5523_p0, %p5921_p7  ;;  %p5532_p9 = por %p5531_p8, %p5530_p6 }
  0x49   : > { %p5526_p4 = pneg %p5525_p2 }
  0x4b   : > { %p5533_p10 = pnand %p5532_p9, %p5526_p4 }
  0x4d   : > { %5536 = shalt.err (!%p5533_p10)
}
  0x4e   : > { %5011 = dma.hbm_to_vmem [thread:$0]  (!%p5905_p5), %s8021_s3, 6144, %s5909_s18, [#allocation9], %s5800_s17, %s5800_s17, %s5801_s20  }
  0x4f   : > { %s8022_s5 = sld [smem:[#allocation77_spill]] }
  0x55   : > { %s5537_s25 = scalar_lea.hbm %s8022_s5, 16 }
  0x56   : > { %p5538_p11 = scmp.ne.s32.totalorder %s8022_s5, %s5537_s25  ;;  %p5544_p0 = scmp.lt.u32.totalorder %s5537_s25, %s8022_s5 }
  0x58   : > { %p5540_p12 = pnand %p5538_p11, %p5921_p7 }
  0x5a   : > { %p5541_p13 = pneg %p5540_p12 }
  0x5c   : > { %p5546_p2 = pnand %p5544_p0, %p5541_p13 }
  0x5e   : > { %5549 = shalt.err (!%p5546_p2)
}
  0x5f   : > { %s5550_s18 = scalar_lea.vmem %s5911_s21, 16  ;;  %s5557_s17 = scalar_lea.vmem %s5911_s21, 32 }
  0x60   : > { %p5551_p4 = scmp.ne.s32.totalorder %s5911_s21, %s5550_s18  ;;  %p5558_p9 = scmp.lt.s32.totalorder %s5911_s21, %s5911_s21 }
  0x61   : > { %p5559_p10 = scmp.lt.s32.totalorder %s5557_s17, %s5550_s18 }
  0x62   : > { %p5553_p6 = pnand %p5551_p4, %p5921_p7 }
  0x63   : > { %p5560_p11 = por %p5559_p10, %p5558_p9 }
  0x64   : > { %p5554_p8 = pneg %p5553_p6 }
  0x66   : > { %p5561_p12 = pnand %p5560_p11, %p5554_p8 }
  0x68   : > { %5564 = shalt.err (!%p5561_p12)
}
  0x69   : > { %5017 = dma.hbm_to_vmem [thread:$0]  (!%p5905_p5), %s8022_s5, 16, %s5911_s21, [#allocation12]  }
  0x6a   : > { %s5802_s9 = smov [#allocation10]   ;;  %s8023_s4 = sld [smem:[#allocation76_spill]] }
  0x6b   : > { %s307_s22 = sshll.u32 %s5802_s9, 4  ;;  %s308_s22 = int_to_ptr.vmem [resolvable:$true] %s307_s22 }
  0x70   : > { %s5565_s25 = scalar_lea.hbm %s8023_s4, 1024 }
  0x71   : > { %p5566_p13 = scmp.ne.s32.totalorder %s8023_s4, %s5565_s25  ;;  %p5572_p4 = scmp.lt.u32.totalorder %s5565_s25, %s8023_s4 }
  0x73   : > { %p5568_p0 = pnand %p5566_p13, %p5921_p7 }
  0x75   : > { %p5569_p2 = pneg %p5568_p0 }
  0x77   : > { %p5574_p6 = pnand %p5572_p4, %p5569_p2 }
  0x79   : > { %5577 = shalt.err (!%p5574_p6)
}
  0x7a   : > { %s5578_s21 = scalar_lea.vmem %s308_s22, 1024  ;;  %p5586_p11 = scmp.lt.s32.totalorder %s308_s22, %s308_s22 }
  0x7b   : > { %p5579_p8 = scmp.ne.s32.totalorder %s308_s22, %s5578_s21  ;;  %p5587_p12 = scmp.lt.s32.totalorder %s5578_s21, %s5578_s21 }
  0x7d   : > { %p5581_p9 = pnand %p5579_p8, %p5921_p7  ;;  %p5588_p1 = por %p5587_p12, %p5586_p11 }
  0x7f   : > { %p5582_p10 = pneg %p5581_p9 }
  0x81   : > { %p5589_p3 = pnand %p5588_p1, %p5582_p10 }
  0x83   : > { %5592 = shalt.err (!%p5589_p3)
}
  0x84   : > { %s5803_s18 = smov 64   ;;  %s5804_s17 = smov 4  }
  0x85   : > { %5014 = dma.hbm_to_vmem [thread:$0]  (!%p5905_p5), %s8023_s4, 1024, %s308_s22, [#allocation9], %s5803_s18, %s5803_s18, %s5804_s17  }
  0x86   : > { %s5805_s9 = smov [#allocation13]   ;;  %s8024_s6 = sld [smem:[#allocation78_spill]] }
  0x87   : > { %s331_s23 = sshll.u32 %s5805_s9, 4  ;;  %s332_s23 = int_to_ptr.vmem [resolvable:$true] %s331_s23 }
  0x8c   : > { %s5593_s26 = scalar_lea.hbm %s8024_s6, 2048 }
  0x8d   : > { %p5594_p1 = scmp.ne.s32.totalorder %s8024_s6, %s5593_s26  ;;  %p5600_p0 = scmp.lt.u32.totalorder %s5593_s26, %s8024_s6 }
  0x8f   : > { %p5596_p3 = pnand %p5594_p1, %p5921_p7 }
  0x91   : > { %p5597_p13 = pneg %p5596_p3 }
  0x93   : > { %p5602_p2 = pnand %p5600_p0, %p5597_p13 }
  0x95   : > { %5605 = shalt.err (!%p5602_p2)
}
  0x96   : > { %s5606_s22 = scalar_lea.vmem %s332_s23, 2048  ;;  %p5614_p9 = scmp.lt.s32.totalorder %s332_s23, %s332_s23 }
  0x97   : > { %p5607_p4 = scmp.ne.s32.totalorder %s332_s23, %s5606_s22  ;;  %p5615_p10 = scmp.lt.s32.totalorder %s5606_s22, %s5606_s22 }
  0x99   : > { %p5609_p6 = pnand %p5607_p4, %p5921_p7  ;;  %p5616_p11 = por %p5615_p10, %p5614_p9 }
  0x9b   : > { %p5610_p8 = pneg %p5609_p6 }
  0x9d   : > { %p5617_p12 = pnand %p5616_p11, %p5610_p8 }
  0x9f   : > { %5620 = shalt.err (!%p5617_p12)
}
  0xa0   : > { %s7944_s18 = smov 128   ;;  %s7945_s27 = smov 8  }
  0xa1   : > { %5020 = dma.hbm_to_vmem [thread:$0]  (!%p5905_p5), %s8024_s6, 2048, %s332_s23, [#allocation12], %s7944_s18, %s7944_s18, %s7945_s27  }
  0xa2   : > { %s4164_s14 = sadd.s32 4294967294, %s5795_s12   ;;  %s6030_s9 = sadd.s32 1, %s5795_s12  }
  0xa3   : > { %s41_s24 = sadd.s32 1, %s5791_s11  ;;  %s38_s25 = ssub.s32 %s5795_s12, %s6030_s9 }
  0xa4   : > { %p48_p7 = scmp.ne.s32.totalorder %s5791_s11, %s5787_s10  ;;  %p39_p1 = scmp.eq.s32.totalorder %s38_s25, 0 }
  0xa5   : > { %p49_p3 = scmp.eq.s32.totalorder %s5795_s12, 0  ;;  %p54_p13 = scmp.ne.s32.totalorder %s5787_s10, %s5783_s30 }
  0xa6   : > { %p230_p0 = scmp.eq.s32.totalorder %s5890_s15, 3  ;;  %p8025_p4 = scmp.eq.s32.totalorder %s5890_s15, 0 }
  0xa7   : > { %s6042_s19 = scalar_select %p39_p1, %s5791_s11, %s41_s24  }
  0xa8   : > { %p50_p2 = por %p49_p3, %p48_p7  ;;  %p6046_p6 = por %p8025_p4, %p54_p13 }
  0xa9   : > { %p6050_p5 = por %p230_p0, %p48_p7  ;;  %p236_p8 = scmp.eq.s32.totalorder %s4164_s14, 3 }
  0xaa   : > { %p5040_p9 = scmp.lt.s32.totalorder %s5795_s12, 4  ;;  %s6056_s28 = sand.u32 1, %s5791_s11  }
  0xab   : > { %s8027_s26 = scalar_select %p6050_p5, 1, 0 }
  0xac   : > { %p6058_p10 = por %p236_p8, %p54_p13  ;;  %s4172_s13 = sshll.u32 %s6056_s28, 8 }
  0xad   : > { %s4298_s21 = sshll.u32 %s5795_s12, 12  ;;  %s8029_s0 = sld [smem:[#allocation73_spill]] }
  0xae   : > { %s8028_s29 = scalar_select %p6058_p10, 1, 0 }
  0xaf   : > { %s352_s14 = scalar_lea.vmem [#allocation2], %s4172_s13  ;;  %p6069_p11 = pnand %p5040_p9, %p50_p2 }
  0xb0   : > { %s360_s24 = sshll.u32 %s352_s14, 4  ;;  %s349_s27 = scalar_lea.sflag [#allocation3], %s6056_s28  ;;  %s6073_s24 = int_to_ptr.vmem [resolvable:$true] %s360_s24 }
  0xb1   : > { %p5623_p7 = pneg %p6069_p11 }
  0xb3   : > { %s6067_s20 = scalar_lea.hbm %s8029_s0, %s4298_s21  ;;  %s5626_s22 = scalar_lea.hbm %s8029_s0, 16384 }
  0xb4   : > { %s5621_s2 = scalar_lea.hbm %s6067_s20, 4096  ;;  %p5627_p13 = scmp.lt.u32.totalorder %s6067_s20, %s8029_s0 }
  0xb5   : > { %p5622_p12 = scmp.ne.s32.totalorder %s6067_s20, %s5621_s2  ;;  %p5628_p0 = scmp.lt.u32.totalorder %s5626_s22, %s5621_s2 }
  0xb6   : > { %p5630_p4 = scmp.lt.u32.totalorder %s5621_s2, %s6067_s20 }
  0xb7   : > { %p5624_p1 = pnand %p5623_p7, %p5622_p12  ;;  %p5629_p2 = por %p5628_p0, %p5627_p13 }
  0xb9   : > { %p5625_p3 = pneg %p5624_p1  ;;  %p5631_p8 = por %p5630_p4, %p5629_p2 }
  0xbb   : > { %p5632_p9 = pnand %p5631_p8, %p5625_p3 }
  0xbd   : > { %5635 = shalt.err (!%p5632_p9)
}
  0xbe   : > { %s5636_s18 = scalar_lea.vmem %s6073_s24, 4096  ;;  %s5808_s13 = smov [#allocation2]  }
  0xbf   : > { %p5637_p12 = scmp.ne.s32.totalorder %s6073_s24, %s5636_s18  ;;  %s5641_s21 = sshll.u32 %s5808_s13, 4  ;;  %s5642_s21 = int_to_ptr.vmem [resolvable:$false] %s5641_s21 }
  0xc0   : > { %s5643_s17 = scalar_lea.vmem %s5642_s21, 8192  ;;  %p5644_p5 = scmp.lt.s32.totalorder %s6073_s24, %s5642_s21 }
  0xc1   : > { %p5639_p1 = pnand %p5637_p12, %p5623_p7  ;;  %p5645_p13 = scmp.lt.s32.totalorder %s5643_s17, %s5636_s18 }
  0xc3   : > { %p5640_p10 = pneg %p5639_p1  ;;  %p5646_p0 = por %p5645_p13, %p5644_p5 }
  0xc5   : > { %p5647_p2 = pnand %p5646_p0, %p5640_p10 }
  0xc7   : > { %5650 = shalt.err (!%p5647_p2)
}
  0xc8   : > { %s8031_s2 = smov 8   ;;  %s8032_s22 = smov 128  }
  0xc9   : > { %5024 = dma.hbm_to_vmem [thread:$0]  (!%p6069_p11), %s6067_s20, 4096, %s6073_s24, %s349_s27, %s8032_s22, %s8032_s22, %s8031_s2  }
  0xca   : > { %s4176_s14 = sshll.u32 %s6056_s28, 9  ;;  %s4300_s13 = sshll.u32 %s5795_s12, 13 }
  0xcb   : > { %s6112_s17 = scalar_lea.hbm %s7932_s1, %s4300_s13  ;;  %s374_s0 = scalar_lea.vmem [#allocation5], %s4176_s14 }
  0xcc   : > { %s382_s3 = sshll.u32 %s374_s0, 4  ;;  %s8033_s4 = sand.u32 1, %s5795_s12   ;;  %s6114_s3 = int_to_ptr.vmem [resolvable:$true] %s382_s3 }
  0xcd   : > { %s6118_s5 = scalar_lea.sflag [#allocation6], %s8033_s4  ;;  %s5651_s6 = scalar_lea.hbm %s6112_s17, 8192 }
  0xce   : > { %p5652_p5 = scmp.ne.s32.totalorder %s6112_s17, %s5651_s6  ;;  %s5656_s20 = scalar_lea.hbm %s7932_s1, 32768 }
  0xcf   : > { %p5657_p4 = scmp.lt.u32.totalorder %s6112_s17, %s7932_s1  ;;  %p5658_p8 = scmp.lt.u32.totalorder %s5656_s20, %s5651_s6 }
  0xd0   : > { %p5654_p10 = pnand %p5652_p5, %p5623_p7  ;;  %p5660_p12 = scmp.lt.u32.totalorder %s5651_s6, %s6112_s17 }
  0xd1   : > { %p5659_p9 = por %p5658_p8, %p5657_p4 }
  0xd2   : > { %p5655_p3 = pneg %p5654_p10 }
  0xd3   : > { %p5661_p1 = por %p5660_p12, %p5659_p9 }
  0xd5   : > { %p5662_p13 = pnand %p5661_p1, %p5655_p3 }
  0xd7   : > { %5665 = shalt.err (!%p5662_p13)
}
  0xd8   : > { %s5666_s0 = scalar_lea.vmem %s6114_s3, 8192  ;;  %s5809_s4 = smov [#allocation5]  }
  0xd9   : > { %p5667_p0 = scmp.ne.s32.totalorder %s6114_s3, %s5666_s0  ;;  %s5671_s22 = sshll.u32 %s5809_s4, 4  ;;  %s5672_s22 = int_to_ptr.vmem [resolvable:$false] %s5671_s22 }
  0xda   : > { %s5673_s14 = scalar_lea.vmem %s5672_s22, 16384  ;;  %p5674_p10 = scmp.lt.s32.totalorder %s6114_s3, %s5672_s22 }
  0xdb   : > { %p5669_p2 = pnand %p5667_p0, %p5623_p7  ;;  %p5675_p4 = scmp.lt.s32.totalorder %s5673_s14, %s5666_s0 }
  0xdd   : > { %p5670_p5 = pneg %p5669_p2  ;;  %p5676_p8 = por %p5675_p4, %p5674_p10 }
  0xdf   : > { %p5677_p9 = pnand %p5676_p8, %p5670_p5 }
  0xe1   : > { %5680 = shalt.err (!%p5677_p9)
}
  0xe2   : > { %s5810_s6 = smov 256   ;;  %s5811_s13 = smov 16  }
  0xe3   : > { %5027 = dma.hbm_to_vmem [thread:$0]  (!%p6069_p11), %s6112_s17, 8192, %s6114_s3, %s6118_s5, %s5810_s6, %s5810_s6, %s5811_s13  }
  0xe4   : > { %p8034_p7 = scmp.ne.s32.totalorder %s8017_s16, 0 }
  0xe6   : > { %394 = sbr.rel (%p8034_p7) target bundleno = 2059 (0x80b), region = 52 }
  0xed   : > { %s6147_s18 = sand.u32 1, %s5787_s10  }
  0xee   : > { %s4181_s21 = sshll.u32 %s6147_s18, 8  ;;  %s397_s27 = scalar_lea.sflag [#allocation3], %s6147_s18 }
  0xef   : > { %s6153_s28 = scalar_lea.vmem [#allocation2], %s4181_s21 }
  0xf0   : > { %5754 = dma.done.wait (%p6046_p6), %s397_s27, 4096  }
  0xf1   : > { %5756 = vsyncadd (%p6046_p6), %s397_s27, 4294963200  ;;  %s405_s3 = sand.u32 1, %s5890_s15   ;;  %s4182_s5 = sshll.u32 %s6147_s18, 9 }
  0xf2   : > { %s406_s16 = scalar_lea.sflag [#allocation6], %s405_s3  ;;  %s6163_s25 = scalar_lea.vmem [#allocation5], %s4182_s5 }
  0xf3   : > { %5758 = dma.done.wait (%p6046_p6), %s406_s16, 8192  }
  0xf4   : > { %5760 = vsyncadd (%p6046_p6), %s406_s16, 4294959104  ;;  %p8035_p11 = scmp.eq.s32.totalorder %s5890_s15, 0 }
  0xf6   : > { %5762 = dma.done.wait (%p8035_p11), [#allocation6], 3072   ;;  %p8036_p3 = pmov %p8035_p11 }
  0xf8   : > { %5764 = vsyncadd (%p8036_p3), [#allocation6], 4294964224  ;;  %p8037_p12 = pmov %p8036_p3 }
  0xf9   : > { %p8038_p1 = pmov %p8036_p3 }
  0xfa   : > { %5766 = dma.done.wait (%p8037_p12), [#allocation9], 7168  }
  0xfb   : > { %5768 = vsyncadd (%p8038_p1), [#allocation9], 4294960128  ;;  %p8039_p13 = pmov %p8038_p1 }
  0xfc   : > { %p8040_p0 = pmov %p8038_p1 }
  0xfd   : > { %5770 = dma.done.wait (%p8039_p13), [#allocation12], 2064  }
  0xfe   : > { %5772 = vsyncadd (%p8040_p0), [#allocation12], 4294965232  ;;  %v7947_v0 = vmov 0   ;;  %v5097_v1 = vld [vmem:[#allocation7 + $0x4] ss:$12 sps:$4 sm:$0xff]   ;;  %v480_v20 = vld [vmem:[%s6153_s28 + $0x8] sm:$0xff] }
  0xff   : > { %815 = vmatprep.mubr.bf16.mxu0 %v7947_v0  ;;  %v5099_v2 = vld [vmem:[#allocation7 + $0x8] ss:$12 sps:$4 sm:$0xff]   ;;  %783 = vmatprep.subr.bf16.mxu0 %v5097_v1  ;;  %v5100_v3 = vld [vmem:[#allocation7] ss:$12 sps:$4 sm:$0xff]   ;;  %v5104_v6 = vld [vmem:[#allocation7 + $0x18] ss:$12 sps:$4 sm:$0xff]  }
 0x100   : > { %4593 = vmatprep.subr.bf16.mxu1 %v5099_v2  ;;  %v5101_v4 = vld [vmem:[#allocation7 + $0x1c] ss:$12 sps:$4 sm:$0xff]   ;;  %784 = vmatpush1.bf16.msra.mxu0 %v5100_v3  ;;  %v5103_v5 = vld [vmem:[#allocation7 + $0x20] ss:$12 sps:$4 sm:$0xff]   ;;  %v5107_v8 = vld [vmem:[#allocation7 + $0x38] ss:$12 sps:$4 sm:$0xff]  }
 0x101   : > { %4594 = vmatpush3.bf16.msra.mxu1 %v5099_v2  ;;  %785 = vmatprep.subr.bf16.mxu0 %v5101_v4  ;;  %v5105_v7 = vld [vmem:[#allocation7 + $0x34] ss:$12 sps:$4 sm:$0xff]   ;;  %v5108_v9 = vld [vmem:[#allocation7 + $0x30] ss:$12 sps:$4 sm:$0xff]   ;;  %v5109_v10 = vld [vmem:[#allocation7 + $0x4c] ss:$12 sps:$4 sm:$0xff]  }
 0x102   : > { %4595 = vmatprep.subr.bf16.mxu1 %v5103_v5  ;;  %v5111_v11 = vld [vmem:[#allocation7 + $0x50] ss:$12 sps:$4 sm:$0xff]   ;;  %v5112_v12 = vld [vmem:[#allocation7 + $0x48] ss:$12 sps:$4 sm:$0xff]   ;;  %v5116_v15 = vld [vmem:[#allocation7 + $0x60] ss:$12 sps:$4 sm:$0xff]  }
 0x103   : > { %v5113_v13 = vld [vmem:[#allocation7 + $0x64] ss:$12 sps:$4 sm:$0xff]   ;;  %v5115_v14 = vld [vmem:[#allocation7 + $0x68] ss:$12 sps:$4 sm:$0xff]   ;;  %v5119_v17 = vld [vmem:[#allocation7 + $0x80] ss:$12 sps:$4 sm:$0xff]  }
 0x104   : > { %786 = vmatpush1.bf16.msra.mxu0 %v5104_v6  ;;  %v5117_v16 = vld [vmem:[#allocation7 + $0x7c] ss:$12 sps:$4 sm:$0xff]   ;;  %v479_v18 = vld [vmem:[%s6153_s28] sm:$0xff]  ;;  %v5125_v25 = vld [vmem:[#allocation7 + $0xac] ss:$12 sps:$4 sm:$0xff]   ;;  %s7644_s20 = scalar_lea.vmem [#allocation15], %s4182_s5 }
 0x105   : > { %4596 = vmatpush3.bf16.msra.mxu1 %v5103_v5  ;;  %787 = vmatprep.subr.bf16.mxu0 %v5105_v7  ;;  %v5120_v19 = vld [vmem:[#allocation7 + $0x78] ss:$12 sps:$4 sm:$0xff]   ;;  %v5121_v21 = vld [vmem:[#allocation7 + $0x94] ss:$12 sps:$4 sm:$0xff]   ;;  %v511_v22 = vpack.c.bf16 %v480_v20, %v479_v18  ;;  %v5124_v24 = vld [vmem:[#allocation7 + $0x90] ss:$12 sps:$4 sm:$0xff]  }
 0x106   : > { %4597 = vmatprep.subr.bf16.mxu1 %v5107_v8  ;;  %v5123_v23 = vld [vmem:[#allocation7 + $0x98] ss:$12 sps:$4 sm:$0xff]   ;;  %v5127_v26 = vld [vmem:[#allocation7 + $0xb0] ss:$12 sps:$4 sm:$0xff]   ;;  %v5128_v27 = vld [vmem:[#allocation7 + $0xa8] ss:$12 sps:$4 sm:$0xff]  }
 0x107   : > { %4609 = vmatprep.mubr.bf16.mxu1 %v511_v22  ;;  %v481_v28 = vld [vmem:[%s6153_s28 + $0x10] sm:$0xff]  ;;  %v482_v29 = vld [vmem:[%s6153_s28 + $0x18] sm:$0xff]  ;;  %v483_v31 = vld [vmem:[%s6153_s28 + $0x20] sm:$0xff]  ;;  %s7688_s24 = scalar_lea.vmem [#allocation14], %s4181_s21  ;;  %s4302_s2 = sshll.u32 %s5890_s15, 12 }
 0x108   : > { %788 = vmatpush1.bf16.msra.mxu0 %v5108_v9  ;;  %v5131_v30 = vld [vmem:[#allocation8 + $0x4] ss:$12 sps:$4 sm:$0xff]   ;;  %v484_v32 = vld [vmem:[%s6153_s28 + $0x28] sm:$0xff]  ;;  %v512_v33 = vpack.c.bf16 %v482_v29, %v481_v28  ;;  %v486_v39 = vld [vmem:[%s6153_s28 + $0x38] sm:$0xff]  ;;  %s3972_s0 = sshll.u32 %s7688_s24, 4  ;;  %s7785_s14 = scalar_lea.hbm %s7939_s8, %s4302_s2  ;;  %s7787_s0 = int_to_ptr.vmem [resolvable:$true] %s3972_s0 }
 0x109   : > { %4598 = vmatpush3.bf16.msra.mxu1 %v5107_v8  ;;  %789 = vmatprep.subr.bf16.mxu0 %v5109_v10  ;;  %v5129_v34 = vld [vmem:[#allocation8] ss:$12 sps:$4 sm:$0xff]   ;;  %v5134_v35 = vld [vmem:[#allocation8 + $0x1c] ss:$12 sps:$4 sm:$0xff]   ;;  %v513_v36 = vpack.c.bf16 %v484_v32, %v483_v31  ;;  %v5132_v37 = vld [vmem:[#allocation8 + $0x18] ss:$12 sps:$4 sm:$0xff]  }
 0x10a   : > { %4599 = vmatprep.subr.bf16.mxu1 %v5111_v11  ;;  %v485_v38 = vld [vmem:[%s6153_s28 + $0x30] sm:$0xff]  ;;  %v487_v41 = vld [vmem:[%s6153_s28 + $0x40] sm:$0xff]  ;;  %v488_v42 = vld [vmem:[%s6153_s28 + $0x48] sm:$0xff]  ;;  %s3953_s6 = scalar_lea.sflag [#allocation4], %s6147_s18  ;;  %s5681_s13 = scalar_lea.vmem %s7787_s0, 4096 }
 0x10b   : > { %v5137_v40 = vld [vmem:[#allocation8 + $0x34] ss:$12 sps:$4 sm:$0xff]   ;;  %v514_v43 = vpack.c.bf16 %v486_v39, %v485_v38  ;;  %v5135_v44 = vld [vmem:[#allocation8 + $0x30] ss:$12 sps:$4 sm:$0xff]   ;;  %v5140_v45 = vld [vmem:[#allocation8 + $0x4c] ss:$12 sps:$4 sm:$0xff]   ;;  %v6193_v46 = vpack.c.bf16 %v488_v42, %v487_v41  ;;  %p5682_p6 = scmp.ne.s32.totalorder %s7787_s0, %s5681_s13 }
 0x10c   : > { %790 = vmatpush1.bf16.msra.mxu0 %v5112_v12  ;;  %v5138_v47 = vld [vmem:[#allocation8 + $0x48] ss:$12 sps:$4 sm:$0xff]   ;;  %v490_v49 = vld [vmem:[%s6153_s28 + $0x58] sm:$0xff]  ;;  %v5143_v50 = vld [vmem:[#allocation8 + $0x64] ss:$12 sps:$4 sm:$0xff]   ;;  %p8276_p2 = scmp.ne.s32.totalorder %s8027_s26, 0 }
 0x10d   : > { %4600 = vmatpush3.bf16.msra.mxu1 %v5111_v11  ;;  %791 = vmatprep.subr.bf16.mxu0 %v5113_v13  ;;  %v489_v48 = vld [vmem:[%s6153_s28 + $0x50] sm:$0xff]  ;;  %v491_v51 = vld [vmem:[%s6153_s28 + $0x60] sm:$0xff]  ;;  %v492_v52 = vld [vmem:[%s6153_s28 + $0x68] sm:$0xff]  ;;  %s5813_s21 = smov [#allocation14]  }
 0x10e   : > { %4601 = vmatprep.subr.bf16.mxu1 %v5115_v14  ;;  %v6201_v53 = vpack.c.bf16 %v490_v49, %v489_v48  ;;  %v5141_v54 = vld [vmem:[#allocation8 + $0x60] ss:$12 sps:$4 sm:$0xff]   ;;  %v5146_v55 = vld [vmem:[#allocation8 + $0x7c] ss:$12 sps:$4 sm:$0xff]   ;;  %v6203_v56 = vpack.c.bf16 %v492_v52, %v491_v51  ;;  %v5144_v57 = vld [vmem:[#allocation8 + $0x78] ss:$12 sps:$4 sm:$0xff]   ;;  %p5683_p5 = pnand %p5682_p6, %p8276_p2 }
 0x10f   : > { %v493_v58 = vld [vmem:[%s6153_s28 + $0x70] sm:$0xff]  ;;  %v494_v59 = vld [vmem:[%s6153_s28 + $0x78] sm:$0xff]  ;;  %v495_v61 = vld [vmem:[%s6153_s28 + $0x80] sm:$0xff]  ;;  %s5685_s27 = sshll.u32 %s5813_s21, 4  ;;  %s5686_s27 = int_to_ptr.vmem [resolvable:$false] %s5685_s27 }
 0x110   : > { %792 = vmatpush1.bf16.msra.mxu0 %v5116_v15  ;;  %v5149_v60 = vld [vmem:[#allocation8 + $0x94] ss:$12 sps:$4 sm:$0xff]   ;;  %v496_v62 = vld [vmem:[%s6153_s28 + $0x88] sm:$0xff]  ;;  %v6212_v63 = vpack.c.bf16 %v494_v59, %v493_v58  ;;  %v5147_v1 = vld [vmem:[#allocation8 + $0x90] ss:$12 sps:$4 sm:$0xff]   ;;  %p5684_p10 = pneg %p5683_p5  ;;  %p5688_p4 = scmp.lt.s32.totalorder %s7787_s0, %s5686_s27 }
 0x111   : > { %4602 = vmatpush3.bf16.msra.mxu1 %v5115_v14  ;;  %793 = vmatprep.subr.bf16.mxu0 %v5117_v16  ;;  %v5152_v2 = vld [vmem:[#allocation8 + $0xac] ss:$12 sps:$4 sm:$0xff]   ;;  %v6214_v3 = vpack.c.bf16 %v496_v62, %v495_v61  ;;  %v5150_v4 = vld [vmem:[#allocation8 + $0xa8] ss:$12 sps:$4 sm:$0xff]   ;;  %v5155_v7 = vld [vmem:[#allocation8 + $0xc4] ss:$12 sps:$4 sm:$0xff]  }
 0x112   : > { %4603 = vmatprep.subr.bf16.mxu1 %v5119_v17  ;;  %v497_v5 = vld [vmem:[%s6153_s28 + $0x90] sm:$0xff]  ;;  %v498_v6 = vld [vmem:[%s6153_s28 + $0x98] sm:$0xff]  ;;  %v499_v8 = vld [vmem:[%s6153_s28 + $0xa0] sm:$0xff] }
 0x113   : > { %v500_v9 = vld [vmem:[%s6153_s28 + $0xa8] sm:$0xff]  ;;  %v6223_v10 = vpack.c.bf16 %v498_v6, %v497_v5  ;;  %v5156_v14 = vld [vmem:[#allocation8 + $0xd8] ss:$12 sps:$4 sm:$0xff]   ;;  %v501_v15 = vld [vmem:[%s6153_s28 + $0xb0] sm:$0xff] }
 0x114   : > { %794 = vmatpush1.bf16.msra.mxu0 %v5120_v19  ;;  %v5153_v11 = vld [vmem:[#allocation8 + $0xc0] ss:$12 sps:$4 sm:$0xff]   ;;  %v5158_v12 = vld [vmem:[#allocation8 + $0xdc] ss:$12 sps:$4 sm:$0xff]   ;;  %v6225_v13 = vpack.c.bf16 %v500_v9, %v499_v8  ;;  %v549_v52 = vld [vmem:[%s6163_s25 + $0xb0] sm:$0xff] }
 0x115   : > { %4604 = vmatpush3.bf16.msra.mxu1 %v5119_v17  ;;  %795 = vmatprep.subr.bf16.mxu0 %v5121_v21  ;;  %v502_v16 = vld [vmem:[%s6153_s28 + $0xb8] sm:$0xff]  ;;  %v5161_v17 = vld [vmem:[#allocation8 + $0xf4] ss:$12 sps:$4 sm:$0xff]   ;;  %v504_v19 = vld [vmem:[%s6153_s28 + $0xc8] sm:$0xff] }
 0x116   : > { %4605 = vmatprep.subr.bf16.mxu1 %v5123_v23  ;;  %v503_v18 = vld [vmem:[%s6153_s28 + $0xc0] sm:$0xff]  ;;  %v6235_v20 = vpack.c.bf16 %v502_v16, %v501_v15  ;;  %v5159_v21 = vld [vmem:[#allocation8 + $0xf0] ss:$12 sps:$4 sm:$0xff]   ;;  %v508_v29 = vld [vmem:[%s6153_s28 + $0xe8] sm:$0xff] }
 0x117   : > { %v507_v28 = vld [vmem:[%s6153_s28 + $0xe0] sm:$0xff]  ;;  %v5170_v32 = vld [vmem:[#allocation8 + $0x13c] ss:$12 sps:$4 sm:$0xff]   ;;  %v5176_v42 = vld [vmem:[#allocation8 + $0x16c] ss:$12 sps:$4 sm:$0xff]  }
 0x118   : > { %796 = vmatpush1.bf16.msra.mxu0 %v5124_v24  ;;  %v5162_v24 = vld [vmem:[#allocation8 + $0x108] ss:$12 sps:$4 sm:$0xff]   ;;  %v5165_v31 = vld [vmem:[#allocation8 + $0x120] ss:$12 sps:$4 sm:$0xff]   ;;  %v5171_v39 = vld [vmem:[#allocation8 + $0x150] ss:$12 sps:$4 sm:$0xff]  }
 0x119   : > { %4606 = vmatpush3.bf16.msra.mxu1 %v5123_v23  ;;  %797 = vmatprep.subr.bf16.mxu0 %v5125_v25  ;;  %v6237_v23 = vpack.c.bf16 %v504_v19, %v503_v18  ;;  %v505_v25 = vld [vmem:[%s6153_s28 + $0xd0] sm:$0xff]  ;;  %v544_v38 = vld [vmem:[%s6163_s25 + $0x88] sm:$0xff]  ;;  %v550_v48 = vld [vmem:[%s6163_s25 + $0xb8] sm:$0xff] }
 0x11a   : > { %4607 = vmatprep.subr.bf16.mxu1 %v5127_v26  ;;  %v547_v51 = vld [vmem:[%s6163_s25 + $0xa0] sm:$0xff]  ;;  %v553_v58 = vld [vmem:[%s6163_s25 + $0xd0] sm:$0xff]  ;;  %v556_v59 = vld [vmem:[%s6163_s25 + $0xe8] sm:$0xff] }
 0x11b   : > { %v5177_v61 = vld [vmem:[#allocation8 + $0xc8] ss:$12 sps:$4 sm:$0xff]   ;;  %v570_v16 = vld [vmem:[%s6163_s25 + $0x158] sm:$0xff]  ;;  %v567_v19 = vld [vmem:[%s6163_s25 + $0x140] sm:$0xff] }
 0x11c   : > { %798 = vmatpush1.bf16.msra.mxu0 %v5128_v27  ;;  %v5167_v27 = vld [vmem:[#allocation8 + $0x124] ss:$12 sps:$4 sm:$0xff]   ;;  %v564_v9 = vld [vmem:[%s6163_s25 + $0x128] sm:$0xff] }
 0x11d   : > { %4608 = vmatpush3.bf16.msra.mxu1 %v5127_v26  ;;  %1505 = vmatprep.subr.bf16.mxu0 %v5131_v30  ;;  %v506_v26 = vld [vmem:[%s6153_s28 + $0xd8] sm:$0xff]  ;;  %v561_v8 = vld [vmem:[%s6163_s25 + $0x110] sm:$0xff]  ;;  %v568_v15 = vld [vmem:[%s6163_s25 + $0x148] sm:$0xff] }
 0x11e   : > { %4945 = vmatprep.subr.bf16.mxu1 %v5131_v30  ;;  %v6247_v30 = vpack.c.bf16 %v506_v26, %v505_v25  ;;  %v6333_v18 = vpack.c.bf16 %v570_v16, %v568_v15  ;;  %v571_v25 = vld [vmem:[%s6163_s25 + $0x160] sm:$0xff]  ;;  %v573_v26 = vld [vmem:[%s6163_s25 + $0x170] sm:$0xff] }
 0x11f   : > { %816 = vmatmul.mubr.bf16.vlgmr.msra.gmra.mrb[0].mxu0 %v511_v22  ;;  %v5164_v22 = vld [vmem:[#allocation8 + $0x10c] ss:$12 sps:$4 sm:$0xff]   ;;  %v583_v15 = vld [vmem:[%s6163_s25 + $0x1c0] sm:$0xff]  ;;  %v585_v16 = vld [vmem:[%s6163_s25 + $0x1d0] sm:$0xff] }
 0x120   : > { %4610 = vmatmul.mubr.bf16.vlgmr.msra.gmra.mrb[0].mxu1 %v512_v33  ;;  %825 = vmatprep.mubr.bf16.mxu0 %v7947_v0 }
 0x121   : > { %4961 = vmatpush1.bf16.msra.mxu1 %v5129_v34  ;;  %4613 = vmatprep.mubr.bf16.mxu1 %v513_v36 }
 0x122   : > { %4946 = vmatprep.subr.bf16.mxu1 %v5134_v35  ;;  %1506 = vmatpush1.bf16.msra.mxu0 %v5129_v34  ;;  %v5168_v34 = vld [vmem:[#allocation8 + $0x138] ss:$12 sps:$4 sm:$0xff]  }
 0x123   : > { %1507 = vmatprep.subr.bf16.mxu0 %v5134_v35  ;;  %v509_v35 = vld [vmem:[%s6153_s28 + $0xf0] sm:$0xff] }
 0x125   : > { %4962 = vmatpush1.bf16.msra.mxu1 %v5132_v37 }
 0x126   : > { %4947 = vmatprep.subr.bf16.mxu1 %v5137_v40  ;;  %1508 = vmatpush1.bf16.msra.mxu0 %v5132_v37  ;;  %v5173_v37 = vld [vmem:[#allocation8 + $0x154] ss:$12 sps:$4 sm:$0xff]  }
 0x127   : > { %826 = vmatmul.mubr.bf16.gmra.mrb[4].mxu0 %v512_v33  ;;  %1509 = vmatprep.subr.bf16.mxu0 %v5137_v40  ;;  %v6249_v33 = vpack.c.bf16 %v508_v29, %v507_v28  ;;  %v546_v40 = vld [vmem:[%s6163_s25 + $0x98] sm:$0xff]  ;;  %v576_v29 = vld [vmem:[%s6163_s25 + $0x188] sm:$0xff] }
 0x128   : > { %4614 = vmatmul.mubr.bf16.gmra.mrb[4].mxu1 %v514_v43  ;;  %835 = vmatprep.mubr.bf16.mxu0 %v7947_v0  ;;  %v530_v28 = vld [vmem:[%s6163_s25 + $0x18] sm:$0xff] }
 0x129   : > { %4963 = vmatpush1.bf16.msra.mxu1 %v5135_v44  ;;  %4617 = vmatprep.mubr.bf16.mxu1 %v6193_v46 }
 0x12a   : > { %4948 = vmatprep.subr.bf16.mxu1 %v5140_v45  ;;  %1510 = vmatpush1.bf16.msra.mxu0 %v5135_v44  ;;  %v5174_v44 = vld [vmem:[#allocation8 + $0x168] ss:$12 sps:$4 sm:$0xff]  }
 0x12b   : > { %1511 = vmatprep.subr.bf16.mxu0 %v5140_v45  ;;  %v543_v45 = vld [vmem:[%s6163_s25 + $0x80] sm:$0xff] }
 0x12d   : > { %4964 = vmatpush1.bf16.msra.mxu1 %v5138_v47 }
 0x12e   : > { %4949 = vmatprep.subr.bf16.mxu1 %v5143_v50  ;;  %1512 = vmatpush1.bf16.msra.mxu0 %v5138_v47  ;;  %v548_v47 = vld [vmem:[%s6163_s25 + $0xa8] sm:$0xff] }
 0x12f   : > { %836 = vmatmul.mubr.bf16.gmra.mrb[8].mxu0 %v513_v36  ;;  %1513 = vmatprep.subr.bf16.mxu0 %v5143_v50  ;;  %v510_v36 = vld [vmem:[%s6153_s28 + $0xf8] sm:$0xff]  ;;  %v6273_v50 = vpack.c.bf16 %v550_v48, %v548_v47  ;;  %v5179_v47 = vld [vmem:[#allocation8 + $0xe0] ss:$12 sps:$4 sm:$0xff]   ;;  %s5687_s28 = scalar_lea.vmem %s5686_s27, 8192 }
 0x130   : > { %4618 = vmatmul.mubr.bf16.gmra.mrb[8].mxu1 %v6201_v53  ;;  %845 = vmatprep.mubr.bf16.mxu0 %v7947_v0  ;;  %v6259_v41 = vpack.c.bf16 %v510_v36, %v509_v35  ;;  %v529_v35 = vld [vmem:[%s6163_s25 + $0x10] sm:$0xff]  ;;  %v575_v36 = vld [vmem:[%s6163_s25 + $0x180] sm:$0xff]  ;;  %p5689_p8 = scmp.lt.s32.totalorder %s5687_s28, %s5681_s13 }
 0x131   : > { %4965 = vmatpush1.bf16.msra.mxu1 %v5141_v54  ;;  %4621 = vmatprep.mubr.bf16.mxu1 %v6203_v56 }
 0x132   : > { %4950 = vmatprep.subr.bf16.mxu1 %v5146_v55  ;;  %1514 = vmatpush1.bf16.msra.mxu0 %v5141_v54  ;;  %v554_v54 = vld [vmem:[%s6163_s25 + $0xd8] sm:$0xff]  ;;  %p5690_p9 = por %p5689_p8, %p5688_p4 }
 0x133   : > { %1515 = vmatprep.subr.bf16.mxu0 %v5146_v55  ;;  %v6283_v55 = vpack.c.bf16 %v549_v52, %v547_v51  ;;  %v5180_v51 = vld [vmem:[#allocation8 + $0x20] ss:$12 sps:$4 sm:$0xff]  }
 0x134   : > { %v531_v52 = vld [vmem:[%s6163_s25 + $0x20] sm:$0xff]  ;;  %p5691_p7 = pnand %p5690_p9, %p5684_p10 }
 0x135   : > { %4966 = vmatpush1.bf16.msra.mxu1 %v5144_v57 }
 0x136   : > { %4951 = vmatprep.subr.bf16.mxu1 %v5149_v60  ;;  %1516 = vmatpush1.bf16.msra.mxu0 %v5144_v57  ;;  %v551_v57 = vld [vmem:[%s6163_s25 + $0xc0] sm:$0xff] }
 0x137   : > { %846 = vmatmul.mubr.bf16.gmra.mrb[12].mxu0 %v514_v43  ;;  %1517 = vmatprep.subr.bf16.mxu0 %v5149_v60  ;;  %v6261_v43 = vpack.c.bf16 %v546_v40, %v544_v38  ;;  %v558_v60 = vld [vmem:[%s6163_s25 + $0xf8] sm:$0xff]  ;;  %v6295_v62 = vpack.c.bf16 %v553_v58, %v551_v57  ;;  %v532_v38 = vld [vmem:[%s6163_s25 + $0x28] sm:$0xff]  ;;  %v581_v57 = vld [vmem:[%s6163_s25 + $0x1b0] sm:$0xff] }
 0x138   : > { %4622 = vmatmul.mubr.bf16.gmra.mrb[12].mxu1 %v6212_v63  ;;  %855 = vmatprep.mubr.bf16.mxu0 %v7947_v0  ;;  %v580_v40 = vld [vmem:[%s6163_s25 + $0x1a8] sm:$0xff]  ;;  %v5181_v58 = vld [vmem:[#allocation8 + $0xf8] ss:$12 sps:$4 sm:$0xff]  }
 0x139   : > { %4967 = vmatpush1.bf16.msra.mxu1 %v5147_v1  ;;  %4625 = vmatprep.mubr.bf16.mxu1 %v6214_v3 }
 0x13a   : > { %4952 = vmatprep.subr.bf16.mxu1 %v5152_v2  ;;  %1518 = vmatpush1.bf16.msra.mxu0 %v5147_v1  ;;  %v555_v1 = vld [vmem:[%s6163_s25 + $0xe0] sm:$0xff] }
 0x13b   : > { %1519 = vmatprep.subr.bf16.mxu0 %v5152_v2  ;;  %v557_v2 = vld [vmem:[%s6163_s25 + $0xf0] sm:$0xff] }
 0x13c   : > { %v6307_v5 = vpack.c.bf16 %v557_v2, %v555_v1  ;;  %v586_v1 = vld [vmem:[%s6163_s25 + $0x1d8] sm:$0xff] }
 0x13d   : > { %4968 = vmatpush1.bf16.msra.mxu1 %v5150_v4 }
 0x13e   : > { %4953 = vmatprep.subr.bf16.mxu1 %v5155_v7  ;;  %1520 = vmatpush1.bf16.msra.mxu0 %v5150_v4  ;;  %v562_v4 = vld [vmem:[%s6163_s25 + $0x118] sm:$0xff] }
 0x13f   : > { %856 = vmatmul.mubr.bf16.gmra.mrb[16].mxu0 %v6193_v46  ;;  %1521 = vmatprep.subr.bf16.mxu0 %v5155_v7  ;;  %v545_v46 = vld [vmem:[%s6163_s25 + $0x90] sm:$0xff]  ;;  %v559_v7 = vld [vmem:[%s6163_s25 + $0x100] sm:$0xff] }
 0x140   : > { %4626 = vmatmul.mubr.bf16.gmra.mrb[16].mxu1 %v6223_v10  ;;  %865 = vmatprep.mubr.bf16.mxu0 %v7947_v0  ;;  %v6271_v49 = vpack.c.bf16 %v545_v46, %v543_v45  ;;  %v5178_v45 = vld [vmem:[#allocation8 + $0x8] ss:$12 sps:$4 sm:$0xff]  }
 0x141   : > { %4969 = vmatpush1.bf16.msra.mxu1 %v5153_v11  ;;  %4629 = vmatprep.mubr.bf16.mxu1 %v6225_v13 }
 0x142   : > { %4954 = vmatprep.subr.bf16.mxu1 %v5158_v12  ;;  %1522 = vmatpush1.bf16.msra.mxu0 %v5153_v11  ;;  %v6319_v11 = vpack.c.bf16 %v561_v8, %v559_v7  ;;  %v5183_v8 = vld [vmem:[#allocation8 + $0x110] ss:$12 sps:$4 sm:$0xff]  }
 0x143   : > { %1523 = vmatprep.subr.bf16.mxu0 %v5158_v12 }
 0x145   : > { %4970 = vmatpush1.bf16.msra.mxu1 %v5156_v14 }
 0x146   : > { %4955 = vmatprep.subr.bf16.mxu1 %v5161_v17  ;;  %1524 = vmatpush1.bf16.msra.mxu0 %v5156_v14  ;;  %v565_v14 = vld [vmem:[%s6163_s25 + $0x130] sm:$0xff] }
 0x147   : > { %866 = vmatmul.mubr.bf16.gmra.mrb[20].mxu0 %v6201_v53  ;;  %1525 = vmatprep.subr.bf16.mxu0 %v5161_v17  ;;  %v552_v53 = vld [vmem:[%s6163_s25 + $0xc8] sm:$0xff] }
 0x148   : > { %4630 = vmatmul.mubr.bf16.gmra.mrb[20].mxu1 %v6235_v20  ;;  %875 = vmatprep.mubr.bf16.mxu0 %v7947_v0 }
 0x149   : > { %4971 = vmatpush1.bf16.msra.mxu1 %v5159_v21  ;;  %4633 = vmatprep.mubr.bf16.mxu1 %v6237_v23 }
 0x14a   : > { %4956 = vmatprep.subr.bf16.mxu1 %v5164_v22  ;;  %1526 = vmatpush1.bf16.msra.mxu0 %v5159_v21  ;;  %v572_v21 = vld [vmem:[%s6163_s25 + $0x168] sm:$0xff] }
 0x14b   : > { %1527 = vmatprep.subr.bf16.mxu0 %v5164_v22  ;;  %v574_v22 = vld [vmem:[%s6163_s25 + $0x178] sm:$0xff] }
 0x14d   : > { %4972 = vmatpush1.bf16.msra.mxu1 %v5162_v24 }
 0x14e   : > { %4957 = vmatprep.subr.bf16.mxu1 %v5167_v27  ;;  %1528 = vmatpush1.bf16.msra.mxu0 %v5162_v24  ;;  %v6345_v24 = vpack.c.bf16 %v574_v22, %v572_v21  ;;  %v542_v21 = vld [vmem:[%s6163_s25 + $0x78] sm:$0xff]  ;;  %v588_v22 = vld [vmem:[%s6163_s25 + $0x1e8] sm:$0xff] }
 0x14f   : > { %876 = vmatmul.mubr.bf16.gmra.mrb[24].mxu0 %v6203_v56  ;;  %1529 = vmatprep.subr.bf16.mxu0 %v5167_v27  ;;  %v6285_v56 = vpack.c.bf16 %v554_v54, %v552_v53  ;;  %v528_v27 = vld [vmem:[%s6163_s25 + $0x8] sm:$0xff]  ;;  %v533_v53 = vld [vmem:[%s6163_s25 + $0x30] sm:$0xff]  ;;  %v579_v54 = vld [vmem:[%s6163_s25 + $0x1a0] sm:$0xff] }
 0x150   : > { %4634 = vmatmul.mubr.bf16.gmra.mrb[24].mxu1 %v6247_v30  ;;  %885 = vmatprep.mubr.bf16.mxu0 %v7947_v0  ;;  %v593_v2 = vpack.c.bf16 %v533_v53, %v531_v52  ;;  %v5192_v52 = vld [vmem:[#allocation8 + $0xb0] ss:$12 sps:$4 sm:$0xff]  }
 0x151   : > { %4973 = vmatpush1.bf16.msra.mxu1 %v5165_v31  ;;  %4637 = vmatprep.mubr.bf16.mxu1 %v6249_v33 }
 0x152   : > { %4958 = vmatprep.subr.bf16.mxu1 %v5170_v32  ;;  %1530 = vmatpush1.bf16.msra.mxu0 %v5165_v31  ;;  %v6357_v31 = vpack.c.bf16 %v573_v26, %v571_v25  ;;  %v590_v25 = vld [vmem:[%s6163_s25 + $0x1f8] sm:$0xff] }
 0x153   : > { %1531 = vmatprep.subr.bf16.mxu0 %v5170_v32  ;;  %v6359_v32 = vpack.c.bf16 %v530_v28, %v528_v27  ;;  %v6409_v27 = vpack.c.bf16 %v585_v16, %v583_v15  ;;  %v5186_v28 = vld [vmem:[#allocation8 + $0x68] ss:$12 sps:$4 sm:$0xff]  }
 0x155   : > { %4974 = vmatpush1.bf16.msra.mxu1 %v5168_v34 }
 0x156   : > { %4959 = vmatprep.subr.bf16.mxu1 %v5173_v37  ;;  %1532 = vmatpush1.bf16.msra.mxu0 %v5168_v34  ;;  %v527_v34 = vld [vmem:[%s6163_s25] sm:$0xff] }
 0x157   : > { %886 = vmatmul.mubr.bf16.gmra.mrb[28].mxu0 %v6212_v63  ;;  %1533 = vmatprep.subr.bf16.mxu0 %v5173_v37  ;;  %v6297_v63 = vpack.c.bf16 %v558_v60, %v556_v59  ;;  %v577_v37 = vld [vmem:[%s6163_s25 + $0x190] sm:$0xff]  ;;  %v536_v59 = vld [vmem:[%s6163_s25 + $0x48] sm:$0xff]  ;;  %v538_v60 = vld [vmem:[%s6163_s25 + $0x58] sm:$0xff] }
 0x158   : > { %4638 = vmatmul.mubr.bf16.gmra.mrb[28].mxu1 %v6259_v41  ;;  %895 = vmatprep.mubr.bf16.mxu0 %v7947_v0  ;;  %v596_v7 = vpack.c.bf16 %v538_v60, %v536_v59 }
 0x159   : > { %4975 = vmatpush1.bf16.msra.mxu1 %v5171_v39  ;;  %1577 = vmatprep.mubr.bf16.mxu1 %v6261_v43 }
 0x15a   : > { %4960 = vmatprep.subr.bf16.mxu1 %v5176_v42  ;;  %1534 = vmatpush1.bf16.msra.mxu0 %v5171_v39  ;;  %v534_v39 = vld [vmem:[%s6163_s25 + $0x38] sm:$0xff] }
 0x15b   : > { %1535 = vmatprep.subr.bf16.mxu0 %v5176_v42  ;;  %v582_v42 = vld [vmem:[%s6163_s25 + $0x1b8] sm:$0xff]  ;;  %v6379_v46 = vpack.c.bf16 %v534_v39, %v532_v38  ;;  %v587_v38 = vld [vmem:[%s6163_s25 + $0x1e0] sm:$0xff]  ;;  %v589_v39 = vld [vmem:[%s6163_s25 + $0x1f0] sm:$0xff] }
 0x15c   : > { %v6381_v48 = vpack.c.bf16 %v582_v42, %v580_v40  ;;  %v5189_v40 = vld [vmem:[#allocation8 + $0x158] ss:$12 sps:$4 sm:$0xff]  }
 0x15d   : > { %4976 = vmatpush1.bf16.msra.mxu1 %v5174_v44 }
 0x15e   : > { %1536 = vmatpush1.bf16.msra.mxu0 %v5174_v44  ;;  %v6375_v44 = vpack.c.bf16 %v529_v35, %v527_v34  ;;  %v6411_v34 = vpack.c.bf16 %v590_v25, %v588_v22  ;;  %v5188_v35 = vld [vmem:[#allocation8 + $0x80] ss:$12 sps:$4 sm:$0xff]  }
 0x15f   : > { %896 = vmatmul.mubr.bf16.gmra.mrb[32].mxu0 %v6214_v3  ;;  %4329 = vmatprep.subr.bf16.mxu0 %v5177_v61  ;;  %v560_v3 = vld [vmem:[%s6163_s25 + $0x108] sm:$0xff] }
 0x160   : > { %1578 = vmatmul.mubr.bf16.vlgmr.msra.gmra.mrb[32].mxu1 %v6271_v49  ;;  %905 = vmatprep.mubr.bf16.mxu0 %v7947_v0  ;;  %v6309_v6 = vpack.c.bf16 %v562_v4, %v560_v3  ;;  %v584_v61 = vld [vmem:[%s6163_s25 + $0x1c8] sm:$0xff]  ;;  %v6395_v3 = vpack.c.bf16 %v581_v57, %v579_v54  ;;  %v5182_v4 = vld [vmem:[#allocation8 + $0x38] ss:$12 sps:$4 sm:$0xff]  }
 0x161   : > { %1587 = vmatprep.mubr.bf16.mxu1 %v6273_v50 }
 0x167   : > { %906 = vmatmul.mubr.bf16.gmra.mrb[36].mxu0 %v6223_v10  ;;  %v566_v10 = vld [vmem:[%s6163_s25 + $0x138] sm:$0xff] }
 0x168   : > { %1588 = vmatmul.mubr.bf16.gmra.mrb[36].mxu1 %v6283_v55  ;;  %915 = vmatprep.mubr.bf16.mxu0 %v7947_v0  ;;  %v6321_v12 = vpack.c.bf16 %v566_v10, %v564_v9  ;;  %v6397_v9 = vpack.c.bf16 %v586_v1, %v584_v61  ;;  %v5184_v10 = vld [vmem:[#allocation8 + $0x50] ss:$12 sps:$4 sm:$0xff]  }
 0x169   : > { %1597 = vmatprep.mubr.bf16.mxu1 %v6285_v56 }
 0x16f   : > { %916 = vmatmul.mubr.bf16.gmra.mrb[40].mxu0 %v6225_v13  ;;  %v563_v13 = vld [vmem:[%s6163_s25 + $0x120] sm:$0xff] }
 0x170   : > { %1598 = vmatmul.mubr.bf16.gmra.mrb[40].mxu1 %v6295_v62  ;;  %925 = vmatprep.mubr.bf16.mxu0 %v7947_v0  ;;  %v6331_v17 = vpack.c.bf16 %v565_v14, %v563_v13  ;;  %v535_v13 = vld [vmem:[%s6163_s25 + $0x40] sm:$0xff]  ;;  %v537_v14 = vld [vmem:[%s6163_s25 + $0x50] sm:$0xff] }
 0x171   : > { %1607 = vmatprep.mubr.bf16.mxu1 %v6297_v63  ;;  %v595_v26 = vpack.c.bf16 %v537_v14, %v535_v13 }
 0x177   : > { %926 = vmatmul.mubr.bf16.gmra.mrb[44].mxu0 %v6235_v20  ;;  %v569_v20 = vld [vmem:[%s6163_s25 + $0x150] sm:$0xff] }
 0x178   : > { %1608 = vmatmul.mubr.bf16.gmra.mrb[44].mxu1 %v6307_v5  ;;  %935 = vmatprep.mubr.bf16.mxu0 %v7947_v0 }
 0x179   : > { %1617 = vmatprep.mubr.bf16.mxu1 %v6309_v6 }
 0x17f   : > { %936 = vmatmul.mubr.bf16.gmra.mrb[48].mxu0 %v6237_v23  ;;  %v6343_v23 = vpack.c.bf16 %v569_v20, %v567_v19  ;;  %v5185_v19 = vld [vmem:[#allocation8 + $0x128] ss:$12 sps:$4 sm:$0xff]  }
 0x180   : > { %1618 = vmatmul.mubr.bf16.gmra.mrb[48].mxu1 %v6319_v11  ;;  %945 = vmatprep.mubr.bf16.mxu0 %v7947_v0  ;;  %v540_v20 = vld [vmem:[%s6163_s25 + $0x68] sm:$0xff] }
 0x181   : > { %1627 = vmatprep.mubr.bf16.mxu1 %v6321_v12 }
 0x187   : > { %946 = vmatmul.mubr.bf16.gmra.mrb[52].mxu0 %v6247_v30  ;;  %v578_v30 = vld [vmem:[%s6163_s25 + $0x198] sm:$0xff] }
 0x188   : > { %1628 = vmatmul.mubr.bf16.gmra.mrb[52].mxu1 %v6331_v17  ;;  %955 = vmatprep.mubr.bf16.mxu0 %v7947_v0 }
 0x189   : > { %1637 = vmatprep.mubr.bf16.mxu1 %v6333_v18 }
 0x18f   : > { %956 = vmatmul.mubr.bf16.gmra.mrb[56].mxu0 %v6249_v33  ;;  %v6361_v33 = vpack.c.bf16 %v578_v30, %v576_v29  ;;  %v598_v29 = vpack.c.bf16 %v542_v21, %v540_v20  ;;  %v5187_v30 = vld [vmem:[#allocation8 + $0x140] ss:$12 sps:$4 sm:$0xff]  }
 0x190   : > { %1638 = vmatmul.mubr.bf16.gmra.mrb[56].mxu1 %v6343_v23  ;;  %965 = vmatprep.mubr.bf16.mxu0 %v7947_v0 }
 0x191   : > { %1647 = vmatprep.mubr.bf16.mxu1 %v6345_v24 }
 0x197   : > { %966 = vmatmul.mubr.bf16.gmra.mrb[60].mxu0 %v6259_v41  ;;  %v6377_v41 = vpack.c.bf16 %v577_v37, %v575_v36  ;;  %v539_v36 = vld [vmem:[%s6163_s25 + $0x60] sm:$0xff]  ;;  %v541_v37 = vld [vmem:[%s6163_s25 + $0x70] sm:$0xff] }
 0x198   : > { %1648 = vmatmul.mubr.bf16.gmra.mrb[60].mxu1 %v6357_v31  ;;  %1537 = vmatprep.mubr.bf16.mxu0 %v6359_v32  ;;  %v597_v42 = vpack.c.bf16 %v541_v37, %v539_v36 }
 0x199   : > { %1657 = vmatprep.mubr.bf16.mxu1 %v6361_v33 }
 0x19f   : > { %1538 = vmatmul.mubr.bf16.vlgmr.msra.gmra.mrb[64].mxu0 %v6375_v44 }
 0x1a0   : > { %1658 = vmatmul.mubr.bf16.gmra.mrb[64].mxu1 %v6377_v41  ;;  %4330 = vmatpush3.bf16.msra.mxu0 %v5178_v45  ;;  %v6419_v45 = vpack.c.bf16 %v589_v39, %v587_v38 }
 0x1a1   : > { %1547 = vmatprep.mubr.bf16.mxu0 %v6379_v46  ;;  %4331 = vmatprep.subr.bf16.mxu0 %v5179_v47  ;;  %v5190_v47 = vld [vmem:[#allocation8 + $0x98] ss:$12 sps:$4 sm:$0xff]  }
 0x1a2   : > { %1667 = vmatprep.mubr.bf16.mxu1 %v6381_v48 }
 0x1a4   : > { %4332 = vmatpush3.bf16.msra.mxu0 %v5180_v51  ;;  %v5191_v51 = vld [vmem:[#allocation8 + $0x170] ss:$12 sps:$4 sm:$0xff]  }
 0x1a5   : > { %4333 = vmatprep.subr.bf16.mxu0 %v5181_v58 }
 0x1a7   : > { %1548 = vmatmul.mubr.bf16.gmra.mrb[68].mxu0 %v593_v2 }
 0x1a8   : > { %1668 = vmatmul.mubr.bf16.gmra.mrb[68].mxu1 %v6395_v3  ;;  %4334 = vmatpush3.bf16.msra.mxu0 %v5182_v4 }
 0x1a9   : > { %1557 = vmatprep.mubr.bf16.mxu0 %v596_v7  ;;  %4335 = vmatprep.subr.bf16.mxu0 %v5183_v8 }
 0x1aa   : > { %1677 = vmatprep.mubr.bf16.mxu1 %v6397_v9 }
 0x1ac   : > { %4336 = vmatpush3.bf16.msra.mxu0 %v5184_v10 }
 0x1ad   : > { %4337 = vmatprep.subr.bf16.mxu0 %v5185_v19 }
 0x1af   : > { %1558 = vmatmul.mubr.bf16.gmra.mrb[72].mxu0 %v595_v26 }
 0x1b0   : > { %1678 = vmatmul.mubr.bf16.gmra.mrb[72].mxu1 %v6409_v27  ;;  %4338 = vmatpush3.bf16.msra.mxu0 %v5186_v28 }
 0x1b1   : > { %1567 = vmatprep.mubr.bf16.mxu0 %v598_v29  ;;  %4339 = vmatprep.subr.bf16.mxu0 %v5187_v30 }
 0x1b2   : > { %1687 = vmatprep.mubr.bf16.mxu1 %v6411_v34 }
 0x1b4   : > { %4340 = vmatpush3.bf16.msra.mxu0 %v5188_v35 }
 0x1b5   : > { %4341 = vmatprep.subr.bf16.mxu0 %v5189_v40 }
 0x1b7   : > { %1568 = vmatmul.mubr.bf16.gmra.mrb[76].mxu0 %v597_v42 }
 0x1b8   : > { %1688 = vmatmul.mubr.bf16.gmra.mrb[76].mxu1 %v6419_v45  ;;  %4342 = vmatpush3.bf16.msra.mxu0 %v5190_v47 }
 0x1b9   : > { %1730 = vmatprep.mubr.bf16.mxu0 %v6359_v32  ;;  %4343 = vmatprep.subr.bf16.mxu0 %v5191_v51 }
 0x1bc   : > { %4344 = vmatpush3.bf16.msra.mxu0 %v5192_v52 }
 0x1bf   : > { %1731 = vmatmul.mubr.bf16.vlgmr.msra.gmra.mrb[80].mxu0 %v6375_v44 }
 0x1c0   : > { %1738 = vmatprep.mubr.bf16.mxu0 %v6379_v46 }
 0x1c7   : > { %1739 = vmatmul.mubr.bf16.gmra.mrb[84].mxu0 %v593_v2 }
 0x1c8   : > { %1746 = vmatprep.mubr.bf16.mxu0 %v596_v7 }
 0x1cf   : > { %1747 = vmatmul.mubr.bf16.gmra.mrb[88].mxu0 %v595_v26 }
 0x1d0   : > { %1754 = vmatprep.mubr.bf16.mxu0 %v598_v29 }
 0x1d7   : > { %1755 = vmatmul.mubr.bf16.gmra.mrb[92].mxu0 %v597_v42 }
 0x1d8   : > { %1762 = vmatprep.mubr.bf16.mxu0 %v6261_v43 }
 0x1df   : > { %1763 = vmatmul.mubr.bf16.gmra.mrb[96].mxu0 %v6271_v49 }
 0x1e0   : > { %1770 = vmatprep.mubr.bf16.mxu0 %v6273_v50 }
 0x1e7   : > { %1771 = vmatmul.mubr.bf16.gmra.mrb[100].mxu0 %v6283_v55 }
 0x1e8   : > { %1778 = vmatprep.mubr.bf16.mxu0 %v6285_v56 }
 0x1ef   : > { %1779 = vmatmul.mubr.bf16.gmra.mrb[104].mxu0 %v6295_v62 }
 0x1f0   : > { %1786 = vmatprep.mubr.bf16.mxu0 %v6297_v63 }
 0x1f2   : > { %v817_v32 = vpop.f32.mrb[0].mxu0 }
 0x1f3   : > { %v4611_v44 = vpop.f32.mrb[0].mxu1  ;;  %v819_v46 = vpop.f32.mrb[1].mxu0 }
 0x1f4   : > { %v1010_v53 = vpop.f32.mrb[1].mxu1  ;;  %v821_v54 = vpop.f32.mrb[2].mxu0 }
 0x1f5   : > { %v4612_v57 = vpop.f32.mrb[2].mxu1  ;;  %v1137_v58 = vpack.c.bf16 %v821_v54, %v817_v32  ;;  %v823_v43 = vpop.f32.mrb[3].mxu0 }
 0x1f6   : > { %v6432_v59 = vpack.c.bf16 %v4612_v57, %v4611_v44  ;;  %v1013_v49 = vpop.f32.mrb[3].mxu1  ;;  %v6434_v50 = vpack.c.bf16 %v823_v43, %v819_v46 }
 0x1f7   : > { %v6436_v55 = vpack.c.bf16 %v1013_v49, %v1010_v53  ;;  %1787 = vmatmul.mubr.bf16.gmra.mrb[108].mxu0 %v6307_v5  ;;  %4657 = vmatprep.mubr.bf16.mxu1 %v1137_v58 }
 0x1f8   : > { %1794 = vmatprep.mubr.bf16.mxu0 %v6309_v6 }
 0x1fa   : > { %v6440_v56 = vpop.f32.mrb[4].mxu0 }
 0x1fb   : > { %v4615_v62 = vpop.f32.mrb[4].mxu1  ;;  %v829_v63 = vpop.f32.mrb[5].mxu0 }
 0x1fc   : > { %v1026_v60 = vpop.f32.mrb[5].mxu1  ;;  %v6442_v61 = vpop.f32.mrb[6].mxu0 }
 0x1fd   : > { %v4616_v1 = vpop.f32.mrb[6].mxu1  ;;  %v833_v4 = vpop.f32.mrb[7].mxu0 }
 0x1fe   : > { %v6446_v7 = vpack.c.bf16 %v4616_v1, %v4615_v62  ;;  %v1029_v8 = vpop.f32.mrb[7].mxu1  ;;  %v6448_v10 = vpack.c.bf16 %v833_v4, %v829_v63 }
 0x1ff   : > { %v6450_v5 = vpack.c.bf16 %v1029_v8, %v1026_v60  ;;  %1795 = vmatmul.mubr.bf16.gmra.mrb[112].mxu0 %v6319_v11 }
 0x200   : > { %8041 = vst [vmem:[#allocation24_spill] sm:$0xff] %v6446_v7  ;;  %1802 = vmatprep.mubr.bf16.mxu0 %v6321_v12 }
 0x201   : > { %8042 = vst [vmem:[#allocation25_spill] sm:$0xff] %v6450_v5 }
 0x202   : > { %v6454_v6 = vpop.f32.mrb[8].mxu0 }
 0x203   : > { %v4619_v13 = vpop.f32.mrb[8].mxu1  ;;  %v839_v14 = vpop.f32.mrb[9].mxu0 }
 0x204   : > { %v1042_v15 = vpop.f32.mrb[9].mxu1  ;;  %v6456_v16 = vpop.f32.mrb[10].mxu0 }
 0x205   : > { %v4620_v19 = vpop.f32.mrb[10].mxu1  ;;  %v843_v21 = vpop.f32.mrb[11].mxu0 }
 0x206   : > { %v6460_v22 = vpack.c.bf16 %v4620_v19, %v4619_v13  ;;  %v1045_v25 = vpop.f32.mrb[11].mxu1  ;;  %v6462_v26 = vpack.c.bf16 %v843_v21, %v839_v14 }
 0x207   : > { %v6464_v11 = vpack.c.bf16 %v1045_v25, %v1042_v15  ;;  %1803 = vmatmul.mubr.bf16.gmra.mrb[116].mxu0 %v6331_v17 }
 0x208   : > { %8043 = vst [vmem:[#allocation26_spill] sm:$0xff] %v6460_v22  ;;  %1810 = vmatprep.mubr.bf16.mxu0 %v6333_v18 }
 0x209   : > { %8044 = vst [vmem:[#allocation27_spill] sm:$0xff] %v6464_v11 }
 0x20a   : > { %v6468_v12 = vpop.f32.mrb[12].mxu0 }
 0x20b   : > { %v4623_v28 = vpop.f32.mrb[12].mxu1  ;;  %v849_v29 = vpop.f32.mrb[13].mxu0 }
 0x20c   : > { %v1058_v30 = vpop.f32.mrb[13].mxu1  ;;  %v6470_v35 = vpop.f32.mrb[14].mxu0 }
 0x20d   : > { %v4624_v36 = vpop.f32.mrb[14].mxu1  ;;  %v853_v38 = vpop.f32.mrb[15].mxu0 }
 0x20e   : > { %v6474_v39 = vpack.c.bf16 %v4624_v36, %v4623_v28  ;;  %v1061_v40 = vpop.f32.mrb[15].mxu1  ;;  %v6476_v42 = vpack.c.bf16 %v853_v38, %v849_v29 }
 0x20f   : > { %v6478_v17 = vpack.c.bf16 %v1061_v40, %v1058_v30  ;;  %1811 = vmatmul.mubr.bf16.gmra.mrb[120].mxu0 %v6343_v23 }
 0x210   : > { %8045 = vst [vmem:[#allocation28_spill] sm:$0xff] %v6474_v39  ;;  %1818 = vmatprep.mubr.bf16.mxu0 %v6345_v24 }
 0x211   : > { %8046 = vst [vmem:[#allocation29_spill] sm:$0xff] %v6478_v17 }
 0x212   : > { %v6482_v18 = vpop.f32.mrb[16].mxu0 }
 0x213   : > { %v4627_v47 = vpop.f32.mrb[16].mxu1  ;;  %v859_v51 = vpop.f32.mrb[17].mxu0 }
 0x214   : > { %v1074_v52 = vpop.f32.mrb[17].mxu1  ;;  %v6484_v32 = vpop.f32.mrb[18].mxu0 }
 0x215   : > { %v4628_v44 = vpop.f32.mrb[18].mxu1  ;;  %v863_v53 = vpop.f32.mrb[19].mxu0 }
 0x216   : > { %v6488_v54 = vpack.c.bf16 %v4628_v44, %v4627_v47  ;;  %v1077_v57 = vpop.f32.mrb[19].mxu1  ;;  %v6490_v58 = vpack.c.bf16 %v863_v53, %v859_v51 }
 0x217   : > { %v6492_v23 = vpack.c.bf16 %v1077_v57, %v1074_v52  ;;  %1819 = vmatmul.mubr.bf16.gmra.mrb[124].mxu0 %v6357_v31 }
 0x218   : > { %8047 = vst [vmem:[#allocation30_spill] sm:$0xff] %v6488_v54  ;;  %1826 = vmatprep.mubr.bf16.mxu0 %v6361_v33 }
 0x219   : > { %8048 = vst [vmem:[#allocation31_spill] sm:$0xff] %v6492_v23 }
 0x21a   : > { %v6496_v24 = vpop.f32.mrb[20].mxu0 }
 0x21b   : > { %v4631_v43 = vpop.f32.mrb[20].mxu1  ;;  %v869_v49 = vpop.f32.mrb[21].mxu0 }
 0x21c   : > { %v1090_v62 = vpop.f32.mrb[21].mxu1  ;;  %v6498_v63 = vpop.f32.mrb[22].mxu0 }
 0x21d   : > { %v4632_v60 = vpop.f32.mrb[22].mxu1  ;;  %v873_v4 = vpop.f32.mrb[23].mxu0 }
 0x21e   : > { %v6502_v8 = vpack.c.bf16 %v4632_v60, %v4631_v43  ;;  %v1093_v13 = vpop.f32.mrb[23].mxu1  ;;  %v6504_v14 = vpack.c.bf16 %v873_v4, %v869_v49 }
 0x21f   : > { %v6506_v31 = vpack.c.bf16 %v1093_v13, %v1090_v62  ;;  %1827 = vmatmul.mubr.bf16.gmra.mrb[128].mxu0 %v6377_v41 }
 0x220   : > { %8049 = vst [vmem:[#allocation32_spill] sm:$0xff] %v6502_v8  ;;  %1834 = vmatprep.mubr.bf16.mxu0 %v6381_v48 }
 0x221   : > { %8050 = vst [vmem:[#allocation33_spill] sm:$0xff] %v6506_v31 }
 0x222   : > { %v6510_v33 = vpop.f32.mrb[24].mxu0 }
 0x223   : > { %v4635_v15 = vpop.f32.mrb[24].mxu1  ;;  %v879_v19 = vpop.f32.mrb[25].mxu0 }
 0x224   : > { %v1106_v21 = vpop.f32.mrb[25].mxu1  ;;  %v6512_v25 = vpop.f32.mrb[26].mxu0 }
 0x225   : > { %v4636_v28 = vpop.f32.mrb[26].mxu1  ;;  %v883_v30 = vpop.f32.mrb[27].mxu0 }
 0x226   : > { %v6516_v36 = vpack.c.bf16 %v4636_v28, %v4635_v15  ;;  %v1109_v38 = vpop.f32.mrb[27].mxu1  ;;  %v6518_v40 = vpack.c.bf16 %v883_v30, %v879_v19 }
 0x227   : > { %v6520_v41 = vpack.c.bf16 %v1109_v38, %v1106_v21  ;;  %1835 = vmatmul.mubr.bf16.gmra.mrb[132].mxu0 %v6395_v3 }
 0x228   : > { %8051 = vst [vmem:[#allocation34_spill] sm:$0xff] %v6516_v36  ;;  %1842 = vmatprep.mubr.bf16.mxu0 %v6397_v9 }
 0x229   : > { %8052 = vst [vmem:[#allocation35_spill] sm:$0xff] %v6520_v41 }
 0x22a   : > { %v6524_v48 = vpop.f32.mrb[28].mxu0 }
 0x22b   : > { %v4639_v47 = vpop.f32.mrb[28].mxu1  ;;  %v889_v51 = vpop.f32.mrb[29].mxu0 }
 0x22c   : > { %v1122_v52 = vpop.f32.mrb[29].mxu1  ;;  %v6526_v44 = vpop.f32.mrb[30].mxu0 }
 0x22d   : > { %v4640_v53 = vpop.f32.mrb[30].mxu1  ;;  %v893_v43 = vpop.f32.mrb[31].mxu0 }
 0x22e   : > { %v6530_v49 = vpack.c.bf16 %v4640_v53, %v4639_v47  ;;  %v1125_v62 = vpop.f32.mrb[31].mxu1  ;;  %v6532_v60 = vpack.c.bf16 %v893_v43, %v889_v51 }
 0x22f   : > { %v6534_v3 = vpack.c.bf16 %v1125_v62, %v1122_v52  ;;  %1843 = vmatmul.mubr.bf16.gmra.mrb[136].mxu0 %v6409_v27 }
 0x230   : > { %8053 = vst [vmem:[#allocation36_spill] sm:$0xff] %v6530_v49  ;;  %1850 = vmatprep.mubr.bf16.mxu0 %v6411_v34 }
 0x231   : > { %8054 = vst [vmem:[#allocation37_spill] sm:$0xff] %v6534_v3 }
 0x232   : > { %v897_v9 = vpop.f32.mrb[32].mxu0 }
 0x233   : > { %v6538_v4 = vpop.f32.mrb[32].mxu1  ;;  %v899_v13 = vpop.f32.mrb[33].mxu0 }
 0x234   : > { %8055 = vst [vmem:[#allocation38_spill] sm:$0xff] %v6538_v4  ;;  %v1581_v15 = vpop.f32.mrb[33].mxu1  ;;  %v901_v19 = vpop.f32.mrb[34].mxu0 }
 0x235   : > { %v6540_v21 = vpop.f32.mrb[34].mxu1  ;;  %v1161_v28 = vpack.c.bf16 %v901_v19, %v897_v9  ;;  %v903_v30 = vpop.f32.mrb[35].mxu0 }
 0x236   : > { %8056 = vst [vmem:[#allocation39_spill] sm:$0xff] %v6540_v21  ;;  %v1585_v47 = vpop.f32.mrb[35].mxu1  ;;  %v6544_v51 = vpack.c.bf16 %v903_v30, %v899_v13 }
 0x237   : > { %v6546_v52 = vpack.c.bf16 %v1585_v47, %v1581_v15  ;;  %1851 = vmatmul.mubr.bf16.gmra.mrb[140].mxu0 %v6419_v45 }
 0x238   : > { %8057 = vst [vmem:[#allocation40_spill] sm:$0xff] %v6544_v51  ;;  %4689 = vmatprep.mubr.bf16.mxu0 %v1161_v28 }
 0x23a   : > { %v6549_v27 = vpop.f32.mrb[36].mxu0 }
 0x23b   : > { %v6551_v34 = vpop.f32.mrb[36].mxu1  ;;  %v909_v53 = vpop.f32.mrb[37].mxu0 }
 0x23c   : > { %8058 = vst [vmem:[#allocation41_spill] sm:$0xff] %v6551_v34  ;;  %v1591_v43 = vpop.f32.mrb[37].mxu1  ;;  %v6553_v62 = vpop.f32.mrb[38].mxu0 }
 0x23d   : > { %v6555_v9 = vpop.f32.mrb[38].mxu1  ;;  %v913_v13 = vpop.f32.mrb[39].mxu0 }
 0x23e   : > { %8059 = vst [vmem:[#allocation42_spill] sm:$0xff] %v6555_v9  ;;  %v1595_v30 = vpop.f32.mrb[39].mxu1  ;;  %v6561_v45 = vpack.c.bf16 %v913_v13, %v909_v53 }
 0x23f   : > { %v6563_v28 = vpack.c.bf16 %v1595_v30, %v1591_v43 }
 0x240   : > { %8060 = vst [vmem:[#allocation43_spill] sm:$0xff] %v6561_v45 }
 0x242   : > { %v6565_v47 = vpop.f32.mrb[40].mxu0 }
 0x243   : > { %v6567_v0 = vpop.f32.mrb[40].mxu1  ;;  %v919_v38 = vpop.f32.mrb[41].mxu0 }
 0x244   : > { %8061 = vst [vmem:[#allocation44_spill] sm:$0xff] %v6567_v0  ;;  %v1601_v57 = vpop.f32.mrb[41].mxu1  ;;  %v6569_v29 = vpop.f32.mrb[42].mxu0 }
 0x245   : > { %v6571_v1 = vpop.f32.mrb[42].mxu1  ;;  %v923_v37 = vpop.f32.mrb[43].mxu0 }
 0x246   : > { %8062 = vst [vmem:[#allocation45_spill] sm:$0xff] %v6571_v1  ;;  %v1605_v13 = vpop.f32.mrb[43].mxu1  ;;  %v6577_v43 = vpack.c.bf16 %v923_v37, %v919_v38 }
 0x247   : > { %v6579_v30 = vpack.c.bf16 %v1605_v13, %v1601_v57 }
 0x248   : > { %8063 = vst [vmem:[#allocation46_spill] sm:$0xff] %v6577_v43 }
 0x24a   : > { %v6581_v15 = vpop.f32.mrb[44].mxu0 }
 0x24b   : > { %v6583_v20 = vpop.f32.mrb[44].mxu1  ;;  %v929_v2 = vpop.f32.mrb[45].mxu0 }
 0x24c   : > { %8064 = vst [vmem:[#allocation47_spill] sm:$0xff] %v6583_v20  ;;  %v1611_v19 = vpop.f32.mrb[45].mxu1  ;;  %v6585_v49 = vpop.f32.mrb[46].mxu0 }
 0x24d   : > { %v6587_v3 = vpop.f32.mrb[46].mxu1  ;;  %v933_v36 = vpop.f32.mrb[47].mxu0 }
 0x24e   : > { %8065 = vst [vmem:[#allocation48_spill] sm:$0xff] %v6587_v3  ;;  %v1615_v38 = vpop.f32.mrb[47].mxu1  ;;  %v6593_v57 = vpack.c.bf16 %v933_v36, %v929_v2 }
 0x24f   : > { %v6595_v13 = vpack.c.bf16 %v1615_v38, %v1611_v19 }
 0x250   : > { %8066 = vst [vmem:[#allocation49_spill] sm:$0xff] %v6593_v57 }
 0x252   : > { %v6597_v53 = vpop.f32.mrb[48].mxu0 }
 0x253   : > { %v6599_v41 = vpop.f32.mrb[48].mxu1  ;;  %v939_v8 = vpop.f32.mrb[49].mxu0 }
 0x254   : > { %8067 = vst [vmem:[#allocation50_spill] sm:$0xff] %v6599_v41  ;;  %v1621_v31 = vpop.f32.mrb[49].mxu1  ;;  %v6601_v54 = vpop.f32.mrb[50].mxu0 }
 0x255   : > { %v6603_v23 = vpop.f32.mrb[50].mxu1  ;;  %v943_v2 = vpop.f32.mrb[51].mxu0 }
 0x256   : > { %8068 = vst [vmem:[#allocation51_spill] sm:$0xff] %v6603_v23  ;;  %v1625_v36 = vpop.f32.mrb[51].mxu1  ;;  %v6609_v19 = vpack.c.bf16 %v943_v2, %v939_v8 }
 0x257   : > { %v1884_v38 = vpack.c.bf16 %v1625_v36, %v1621_v31 }
 0x258   : > { %8069 = vst [vmem:[#allocation52_spill] sm:$0xff] %v6609_v19 }
 0x259   : > { %4673 = vmatprep.subr.bf16.mxu0 %v1884_v38 }
 0x25a   : > { %4674 = vmatpush3.bf16.xpose.msra.mxu0 %v1884_v38  ;;  %v6611_v57 = vpop.f32.mrb[52].mxu0 }
 0x25b   : > { %v6613_v43 = vpop.f32.mrb[52].mxu1  ;;  %v949_v45 = vpop.f32.mrb[53].mxu0 }
 0x25c   : > { %8070 = vst [vmem:[#allocation53_spill] sm:$0xff] %v6613_v43  ;;  %v1631_v51 = vpop.f32.mrb[53].mxu1  ;;  %v6615_v39 = vpop.f32.mrb[54].mxu0 }
 0x25d   : > { %v6617_v20 = vpop.f32.mrb[54].mxu1  ;;  %v953_v2 = vpop.f32.mrb[55].mxu0 }
 0x25e   : > { %8071 = vst [vmem:[#allocation54_spill] sm:$0xff] %v6617_v20  ;;  %v1635_v31 = vpop.f32.mrb[55].mxu1  ;;  %v6623_v36 = vpack.c.bf16 %v953_v2, %v949_v45 }
 0x25f   : > { %v1887_v38 = vpack.c.bf16 %v1635_v31, %v1631_v51 }
 0x260   : > { %8072 = vst [vmem:[#allocation55_spill] sm:$0xff] %v6623_v36 }
 0x261   : > { %4675 = vmatprep.subr.bf16.mxu0 %v1887_v38 }
 0x262   : > { %4676 = vmatpush3.bf16.xpose.msra.mxu0 %v1887_v38  ;;  %v6625_v46 = vpop.f32.mrb[56].mxu0 }
 0x263   : > { %v6627_v19 = vpop.f32.mrb[56].mxu1  ;;  %v959_v41 = vpop.f32.mrb[57].mxu0 }
 0x264   : > { %8073 = vst [vmem:[#allocation56_spill] sm:$0xff] %v6627_v19  ;;  %v1641_v23 = vpop.f32.mrb[57].mxu1  ;;  %v6629_v3 = vpop.f32.mrb[58].mxu0 }
 0x265   : > { %v6631_v17 = vpop.f32.mrb[58].mxu1  ;;  %v963_v2 = vpop.f32.mrb[59].mxu0 }
 0x266   : > { %8074 = vst [vmem:[#allocation57_spill] sm:$0xff] %v6631_v17  ;;  %v1645_v51 = vpop.f32.mrb[59].mxu1  ;;  %v6637_v31 = vpack.c.bf16 %v963_v2, %v959_v41 }
 0x267   : > { %v1890_v38 = vpack.c.bf16 %v1645_v51, %v1641_v23 }
 0x268   : > { %8075 = vst [vmem:[#allocation58_spill] sm:$0xff] %v6637_v31 }
 0x269   : > { %4677 = vmatprep.subr.bf16.mxu0 %v1890_v38 }
 0x26a   : > { %4678 = vmatpush3.bf16.xpose.msra.mxu0 %v1890_v38  ;;  %v6639_v37 = vpop.f32.mrb[60].mxu0 }
 0x26b   : > { %v6641_v43 = vpop.f32.mrb[60].mxu1  ;;  %v969_v20 = vpop.f32.mrb[61].mxu0 }
 0x26c   : > { %8076 = vst [vmem:[#allocation59_spill] sm:$0xff] %v6641_v43  ;;  %v1651_v36 = vpop.f32.mrb[61].mxu1  ;;  %v6643_v22 = vpop.f32.mrb[62].mxu0 }
 0x26d   : > { %v6645_v0 = vpop.f32.mrb[62].mxu1  ;;  %v973_v2 = vpop.f32.mrb[63].mxu0 }
 0x26e   : > { %8077 = vst [vmem:[#allocation60_spill] sm:$0xff] %v6645_v0  ;;  %v1655_v23 = vpop.f32.mrb[63].mxu1  ;;  %v6651_v51 = vpack.c.bf16 %v973_v2, %v969_v20 }
 0x26f   : > { %v1893_v38 = vpack.c.bf16 %v1655_v23, %v1651_v36 }
 0x270   : > { %8078 = vst [vmem:[#allocation61_spill] sm:$0xff] %v6651_v51 }
 0x271   : > { %4679 = vmatprep.subr.bf16.mxu0 %v1893_v38 }
 0x272   : > { %4680 = vmatpush3.bf16.xpose.msra.mxu0 %v1893_v38  ;;  %v6653_v8 = vpop.f32.mrb[64].mxu0 }
 0x273   : > { %v6655_v19 = vpop.f32.mrb[64].mxu1  ;;  %v1541_v17 = vpop.f32.mrb[65].mxu0 }
 0x274   : > { %8079 = vst [vmem:[#allocation62_spill] sm:$0xff] %v6655_v19  ;;  %v1661_v31 = vpop.f32.mrb[65].mxu1  ;;  %v6657_v1 = vpop.f32.mrb[66].mxu0 }
 0x275   : > { %v6659_v34 = vpop.f32.mrb[66].mxu1  ;;  %v1545_v2 = vpop.f32.mrb[67].mxu0 }
 0x276   : > { %8080 = vst [vmem:[#allocation63_spill] sm:$0xff] %v6659_v34  ;;  %v1665_v36 = vpop.f32.mrb[67].mxu1  ;;  %v1860_v23 = vpack.c.bf16 %v1545_v2, %v1541_v17 }
 0x277   : > { %v1896_v38 = vpack.c.bf16 %v1665_v36, %v1661_v31 }
 0x278   : > { %4641 = vmatprep.subr.bf16.mxu1 %v1860_v23 }
 0x279   : > { %4681 = vmatprep.subr.bf16.mxu0 %v1896_v38  ;;  %4642 = vmatpush3.bf16.xpose.msra.mxu1 %v1860_v23 }
 0x27a   : > { %4682 = vmatpush3.bf16.xpose.msra.mxu0 %v1896_v38  ;;  %v6665_v45 = vpop.f32.mrb[68].mxu0 }
 0x27b   : > { %v6667_v43 = vpop.f32.mrb[68].mxu1  ;;  %v1551_v0 = vpop.f32.mrb[69].mxu0 }
 0x27c   : > { %8081 = vst [vmem:[#allocation64_spill] sm:$0xff] %v6667_v43  ;;  %v1671_v51 = vpop.f32.mrb[69].mxu1  ;;  %v6669_v9 = vpop.f32.mrb[70].mxu0 }
 0x27d   : > { %v6671_v41 = vpop.f32.mrb[70].mxu1  ;;  %v1555_v31 = vpop.f32.mrb[71].mxu0 }
 0x27e   : > { %8082 = vst [vmem:[#allocation65_spill] sm:$0xff] %v6671_v41  ;;  %v1675_v2 = vpop.f32.mrb[71].mxu1  ;;  %v1863_v36 = vpack.c.bf16 %v1555_v31, %v1551_v0 }
 0x27f   : > { %v1899_v23 = vpack.c.bf16 %v1675_v2, %v1671_v51 }
 0x280   : > { %4643 = vmatprep.subr.bf16.mxu1 %v1863_v36 }
 0x281   : > { %4683 = vmatprep.subr.bf16.mxu0 %v1899_v23  ;;  %4644 = vmatpush3.bf16.xpose.msra.mxu1 %v1863_v36 }
 0x282   : > { %4684 = vmatpush3.bf16.xpose.msra.mxu0 %v1899_v23  ;;  %v6677_v38 = vpop.f32.mrb[72].mxu0 }
 0x283   : > { %v6679_v19 = vpop.f32.mrb[72].mxu1  ;;  %v1561_v34 = vpop.f32.mrb[73].mxu0 }
 0x284   : > { %8083 = vst [vmem:[#allocation66_spill] sm:$0xff] %v6679_v19  ;;  %v1681_v11 = vpop.f32.mrb[73].mxu1  ;;  %v6681_v7 = vpop.f32.mrb[74].mxu0 }
 0x285   : > { %v6683_v20 = vpop.f32.mrb[74].mxu1  ;;  %v1565_v51 = vpop.f32.mrb[75].mxu0 }
 0x286   : > { %8084 = vst [vmem:[#allocation67_spill] sm:$0xff] %v6683_v20  ;;  %v1685_v31 = vpop.f32.mrb[75].mxu1  ;;  %v1866_v2 = vpack.c.bf16 %v1565_v51, %v1561_v34 }
 0x287   : > { %v1902_v36 = vpack.c.bf16 %v1685_v31, %v1681_v11  ;;  %v8088_v11 = vpack.c.bf16 %v6553_v62, %v6549_v27  ;;  %v8090_v62 = vpack.c.bf16 %v6585_v49, %v6581_v15  ;;  %v8092_v15 = vpack.c.bf16 %v6615_v39, %v6611_v57 }
 0x288   : > { %4645 = vmatprep.subr.bf16.mxu1 %v1866_v2  ;;  %v8094_v57 = vpack.c.bf16 %v6643_v22, %v6639_v37  ;;  %v8096_v22 = vpack.c.bf16 %v6442_v61, %v6440_v56  ;;  %v8098_v56 = vpack.c.bf16 %v6470_v35, %v6468_v12  ;;  %v8100_v12 = vpack.c.bf16 %v6498_v63, %v6496_v24 }
 0x289   : > { %4685 = vmatprep.subr.bf16.mxu0 %v1902_v36  ;;  %4646 = vmatpush3.bf16.xpose.msra.mxu1 %v1866_v2  ;;  %v8102_v24 = vpack.c.bf16 %v6526_v44, %v6524_v48  ;;  %v8103_v48 = vpack.c.bf16 %v6669_v9, %v6665_v45  ;;  %v8104_v44 = vpack.c.bf16 %v6681_v7, %v6677_v38  ;;  %v8105_v9 = vld [vmem:[#allocation25_spill] sm:$0xff] }
 0x28a   : > { %4686 = vmatpush3.bf16.xpose.msra.mxu0 %v1902_v36  ;;  %v6689_v23 = vpop.f32.mrb[76].mxu0 }
 0x28b   : > { %8085 = vst [vmem:[#allocation68_spill] sm:$0xff] %v6689_v23  ;;  %v6691_v43 = vpop.f32.mrb[76].mxu1  ;;  %v1571_v41 = vpop.f32.mrb[77].mxu0 }
 0x28c   : > { %8086 = vst [vmem:[#allocation69_spill] sm:$0xff] %v6691_v43  ;;  %v1691_v4 = vpop.f32.mrb[77].mxu1  ;;  %v6693_v21 = vpop.f32.mrb[78].mxu0 }
 0x28d   : > { %v6695_v17 = vpop.f32.mrb[78].mxu1  ;;  %v1575_v34 = vpop.f32.mrb[79].mxu0 }
 0x28e   : > { %8087 = vst [vmem:[#allocation70_spill] sm:$0xff] %v6695_v17  ;;  %v1695_v51 = vpop.f32.mrb[79].mxu1  ;;  %v1869_v31 = vpack.c.bf16 %v1575_v34, %v1571_v41 }
 0x28f   : > { %v1905_v2 = vpack.c.bf16 %v1695_v51, %v1691_v4  ;;  %v8089_v4 = vpack.c.bf16 %v6569_v29, %v6565_v47 }
 0x290   : > { %4647 = vmatprep.subr.bf16.mxu1 %v1869_v31 }
 0x291   : > { %4687 = vmatprep.subr.bf16.mxu0 %v1905_v2  ;;  %4648 = vmatpush3.bf16.xpose.msra.mxu1 %v1869_v31 }
 0x292   : > { %4688 = vmatpush3.bf16.xpose.msra.mxu0 %v1905_v2  ;;  %4649 = vmatprep.subr.bf16.mxu1 %v6546_v52  ;;  %v4345_v36 = vpop.f32.mrb[80].mxu0  ;;  %v8106_v7 = vld [vmem:[#allocation68_spill] sm:$0xff] }
 0x293   : > { %4769 = vmatprep.subr.bf16.mxu0 %v6434_v50  ;;  %v4346_v19 = vpop.f32.mrb[81].mxu0  ;;  %v8107_v38 = vpack.c.bf16 %v6693_v21, %v8106_v7 }
 0x294   : > { %v4347_v20 = vadd.f32 %v4346_v19, %v4345_v36  ;;  %v4348_v5 = vpop.f32.mrb[82].mxu0 }
 0x295   : > { %v4349_v0 = vpop.f32.mrb[83].mxu0 }
 0x296   : > { %v4350_v23 = vadd.f32 %v4349_v0, %v4348_v5 }
 0x298   : > { %v1861_v41 = vpack.c.bf16 %v4350_v23, %v4347_v20 }
 0x299   : > { %4690 = vmatmul.mubr.bf16.vlgmr.msra.gmra.mrb[144].mxu0 %v8088_v11  ;;  %4650 = vmatpush3.bf16.xpose.msra.mxu1 %v6546_v52 }
 0x29a   : > { %4693 = vmatprep.mubr.bf16.mxu0 %v8089_v4  ;;  %4770 = vmatpush3.bf16.xpose.msra.mxu0 %v6434_v50  ;;  %v4351_v34 = vpop.f32.mrb[84].mxu0  ;;  %v8091_v50 = vpack.c.bf16 %v6601_v54, %v6597_v53 }
 0x29b   : > { %4651 = vmatprep.subr.bf16.mxu1 %v6563_v28  ;;  %4771 = vmatprep.subr.bf16.mxu0 %v6448_v10  ;;  %v4352_v19 = vpop.f32.mrb[85].mxu0 }
 0x29c   : > { %v4353_v5 = vadd.f32 %v4352_v19, %v4351_v34  ;;  %v4354_v0 = vpop.f32.mrb[86].mxu0 }
 0x29d   : > { %v4355_v51 = vpop.f32.mrb[87].mxu0 }
 0x29e   : > { %v4356_v27 = vadd.f32 %v4355_v51, %v4354_v0 }
 0x2a0   : > { %v1864_v52 = vpack.c.bf16 %v4356_v27, %v4353_v5 }
 0x2a1   : > { %4694 = vmatmul.mubr.bf16.gmra.mrb[148].mxu0 %v8090_v62  ;;  %4652 = vmatpush3.bf16.xpose.msra.mxu1 %v6563_v28 }
 0x2a2   : > { %4697 = vmatprep.mubr.bf16.mxu0 %v8091_v50  ;;  %4772 = vmatpush3.bf16.xpose.msra.mxu0 %v6448_v10  ;;  %v4357_v29 = vpop.f32.mrb[88].mxu0  ;;  %v8093_v10 = vpack.c.bf16 %v6629_v3, %v6625_v46 }
 0x2a3   : > { %4653 = vmatprep.subr.bf16.mxu1 %v6579_v30  ;;  %4773 = vmatprep.subr.bf16.mxu0 %v6462_v26  ;;  %v4358_v47 = vpop.f32.mrb[89].mxu0 }
 0x2a4   : > { %v4359_v20 = vadd.f32 %v4358_v47, %v4357_v29  ;;  %v4360_v23 = vpop.f32.mrb[90].mxu0 }
 0x2a5   : > { %v4361_v11 = vpop.f32.mrb[91].mxu0 }
 0x2a6   : > { %v4362_v49 = vadd.f32 %v4361_v11, %v4360_v23 }
 0x2a8   : > { %v1867_v28 = vpack.c.bf16 %v4362_v49, %v4359_v20 }
 0x2a9   : > { %4698 = vmatmul.mubr.bf16.gmra.mrb[152].mxu0 %v8092_v15  ;;  %4654 = vmatpush3.bf16.xpose.msra.mxu1 %v6579_v30 }
 0x2aa   : > { %4701 = vmatprep.mubr.bf16.mxu0 %v8093_v10  ;;  %4774 = vmatpush3.bf16.xpose.msra.mxu0 %v6462_v26  ;;  %v4363_v54 = vpop.f32.mrb[92].mxu0  ;;  %v8095_v26 = vpack.c.bf16 %v6657_v1, %v6653_v8  ;;  %v8097_v1 = vpack.c.bf16 %v6456_v16, %v6454_v6  ;;  %v8099_v6 = vpack.c.bf16 %v6484_v32, %v6482_v18 }
 0x2ab   : > { %4655 = vmatprep.subr.bf16.mxu1 %v6595_v13  ;;  %4775 = vmatprep.subr.bf16.mxu0 %v6476_v42  ;;  %v4364_v53 = vpop.f32.mrb[93].mxu0  ;;  %v8101_v18 = vpack.c.bf16 %v6512_v25, %v6510_v33 }
 0x2ac   : > { %v4365_v31 = vadd.f32 %v4364_v53, %v4363_v54  ;;  %v4366_v2 = vpop.f32.mrb[94].mxu0 }
 0x2ad   : > { %v4367_v36 = vpop.f32.mrb[95].mxu0 }
 0x2ae   : > { %v4368_v39 = vadd.f32 %v4367_v36, %v4366_v2  ;;  %v8109_v36 = vld [vmem:[#allocation38_spill] sm:$0xff] }
 0x2b0   : > { %v1870_v30 = vpack.c.bf16 %v4368_v39, %v4365_v31 }
 0x2b1   : > { %4702 = vmatmul.mubr.bf16.gmra.mrb[156].mxu0 %v8094_v57  ;;  %4656 = vmatpush3.bf16.xpose.msra.mxu1 %v6595_v13 }
 0x2b2   : > { %4785 = vmatprep.mubr.bf16.mxu0 %v8095_v26  ;;  %4776 = vmatpush3.bf16.xpose.msra.mxu0 %v6476_v42  ;;  %v4369_v46 = vpop.f32.mrb[96].mxu0 }
 0x2b3   : > { %4705 = vmatprep.subr.bf16.mxu1 %v1861_v41  ;;  %4777 = vmatprep.subr.bf16.mxu0 %v6490_v58  ;;  %v4370_v3 = vpop.f32.mrb[97].mxu0 }
 0x2b4   : > { %v4371_v4 = vadd.f32 %v4370_v3, %v4369_v46  ;;  %v4372_v34 = vpop.f32.mrb[98].mxu0 }
 0x2b5   : > { %v4373_v19 = vpop.f32.mrb[99].mxu0 }
 0x2b6   : > { %v4374_v5 = vadd.f32 %v4373_v19, %v4372_v34  ;;  %v8112_v34 = vld [vmem:[#allocation27_spill] sm:$0xff]  ;;  %v8113_v19 = vld [vmem:[#allocation42_spill] sm:$0xff] }
 0x2b8   : > { %4658 = vmatmul.mubr.bf16.vlgmr.msra.gmra.mrb[80].mxu1 %v8096_v22  ;;  %v1873_v37 = vpack.c.bf16 %v4374_v5, %v4371_v4  ;;  %v8114_v5 = vld [vmem:[#allocation41_spill] sm:$0xff] }
 0x2b9   : > { %4661 = vmatprep.mubr.bf16.mxu1 %v8097_v1  ;;  %4706 = vmatpush3.bf16.msra.mxu1 %v1861_v41  ;;  %v8115_v22 = vpack.c.bf16 %v8113_v19, %v8114_v5  ;;  %v8117_v1 = vld [vmem:[#allocation44_spill] sm:$0xff] }
 0x2ba   : > { %4778 = vmatpush3.bf16.xpose.msra.mxu0 %v6490_v58  ;;  %v4375_v42 = vpop.f32.mrb[100].mxu0  ;;  %4707 = vmatprep.subr.bf16.mxu1 %v1864_v52 }
 0x2bb   : > { %4779 = vmatprep.subr.bf16.mxu0 %v6504_v14  ;;  %v4376_v13 = vpop.f32.mrb[101].mxu0 }
 0x2bc   : > { %v4377_v8 = vadd.f32 %v4376_v13, %v4375_v42  ;;  %v4378_v0 = vpop.f32.mrb[102].mxu0 }
 0x2bd   : > { %v4379_v51 = vpop.f32.mrb[103].mxu0  ;;  %4708 = vmatpush3.bf16.msra.mxu1 %v1864_v52 }
 0x2be   : > { %v4380_v27 = vadd.f32 %v4379_v51, %v4378_v0  ;;  %4709 = vmatprep.subr.bf16.mxu1 %v1867_v28 }
 0x2c0   : > { %4662 = vmatmul.mubr.bf16.gmra.mrb[84].mxu1 %v8098_v56  ;;  %v1876_v61 = vpack.c.bf16 %v4380_v27, %v4377_v8  ;;  %v8119_v8 = vld [vmem:[#allocation26_spill] sm:$0xff] }
 0x2c1   : > { %4665 = vmatprep.mubr.bf16.mxu1 %v8099_v6  ;;  %4710 = vmatpush3.bf16.msra.mxu1 %v1867_v28  ;;  %v8120_v6 = vld [vmem:[#allocation29_spill] sm:$0xff] }
 0x2c2   : > { %4780 = vmatpush3.bf16.xpose.msra.mxu0 %v6504_v14  ;;  %v4381_v16 = vpop.f32.mrb[104].mxu0  ;;  %4711 = vmatprep.subr.bf16.mxu1 %v1870_v30 }
 0x2c3   : > { %4781 = vmatprep.subr.bf16.mxu0 %v6518_v40  ;;  %v4382_v58 = vpop.f32.mrb[105].mxu0 }
 0x2c4   : > { %v4383_v41 = vadd.f32 %v4382_v58, %v4381_v16  ;;  %v4384_v62 = vpop.f32.mrb[106].mxu0  ;;  %v8121_v58 = vld [vmem:[#allocation48_spill] sm:$0xff] }
 0x2c5   : > { %v4385_v52 = vpop.f32.mrb[107].mxu0  ;;  %4712 = vmatpush3.bf16.msra.mxu1 %v1870_v30  ;;  %v8111_v30 = vld [vmem:[#allocation24_spill] sm:$0xff] }
 0x2c6   : > { %v4386_v50 = vadd.f32 %v4385_v52, %v4384_v62  ;;  %4713 = vmatprep.subr.bf16.mxu1 %v1873_v37 }
 0x2c8   : > { %4666 = vmatmul.mubr.bf16.gmra.mrb[88].mxu1 %v8100_v12  ;;  %v1879_v35 = vpack.c.bf16 %v4386_v50, %v4383_v41  ;;  %v8122_v41 = vld [vmem:[#allocation47_spill] sm:$0xff]  ;;  %v8124_v50 = vld [vmem:[#allocation28_spill] sm:$0xff] }
 0x2c9   : > { %4669 = vmatprep.mubr.bf16.mxu1 %v8101_v18  ;;  %4714 = vmatpush3.bf16.msra.mxu1 %v1873_v37  ;;  %v8116_v37 = vld [vmem:[#allocation45_spill] sm:$0xff]  ;;  %v8123_v62 = vpack.c.bf16 %v8121_v58, %v8122_v41 }
 0x2ca   : > { %4782 = vmatpush3.bf16.xpose.msra.mxu0 %v6518_v40  ;;  %v4387_v32 = vpop.f32.mrb[108].mxu0  ;;  %4715 = vmatprep.subr.bf16.mxu1 %v1876_v61  ;;  %v8118_v42 = vpack.c.bf16 %v8116_v37, %v8117_v1 }
 0x2cb   : > { %4783 = vmatprep.subr.bf16.mxu0 %v6532_v60  ;;  %v4388_v14 = vpop.f32.mrb[109].mxu0 }
 0x2cc   : > { %v4389_v29 = vadd.f32 %v4388_v14, %v4387_v32  ;;  %v4390_v47 = vpop.f32.mrb[110].mxu0 }
 0x2cd   : > { %v4391_v20 = vpop.f32.mrb[111].mxu0  ;;  %4716 = vmatpush3.bf16.msra.mxu1 %v1876_v61 }
 0x2ce   : > { %v4392_v23 = vadd.f32 %v4391_v20, %v4390_v47  ;;  %4717 = vmatprep.subr.bf16.mxu1 %v1879_v35 }
 0x2d0   : > { %4670 = vmatmul.mubr.bf16.gmra.mrb[92].mxu1 %v8102_v24  ;;  %v1882_v63 = vpack.c.bf16 %v4392_v23, %v4389_v29 }
 0x2d1   : > { %4718 = vmatpush3.bf16.msra.mxu1 %v1879_v35 }
 0x2d2   : > { %4784 = vmatpush3.bf16.xpose.msra.mxu0 %v6532_v60  ;;  %v4393_v33 = vpop.f32.mrb[112].mxu0  ;;  %4719 = vmatprep.subr.bf16.mxu1 %v1882_v63 }
 0x2d3   : > { %4833 = vmatprep.subr.bf16.mxu0 %v6436_v55  ;;  %v4394_v25 = vpop.f32.mrb[113].mxu0 }
 0x2d4   : > { %v4395_v40 = vadd.f32 %v4394_v25, %v4393_v33  ;;  %v4396_v11 = vpop.f32.mrb[114].mxu0 }
 0x2d5   : > { %v4397_v49 = vpop.f32.mrb[115].mxu0  ;;  %4720 = vmatpush3.bf16.msra.mxu1 %v1882_v63 }
 0x2d6   : > { %v4398_v15 = vadd.f32 %v4397_v49, %v4396_v11 }
 0x2d8   : > { %v6771_v28 = vpack.c.bf16 %v4398_v15, %v4395_v40 }
 0x2d9   : > { %4786 = vmatmul.mubr.bf16.vlgmr.msra.gmra.mrb[160].mxu0 %v8103_v48 }
 0x2da   : > { %4789 = vmatprep.mubr.bf16.mxu0 %v8104_v44  ;;  %4834 = vmatpush3.bf16.msra.mxu0 %v6436_v55  ;;  %v4399_v60 = vpop.f32.mrb[116].mxu0  ;;  %v8108_v55 = vld [vmem:[#allocation39_spill] sm:$0xff] }
 0x2db   : > { %4835 = vmatprep.subr.bf16.mxu0 %v6432_v59  ;;  %v4400_v10 = vpop.f32.mrb[117].mxu0  ;;  %4737 = vmatprep.subr.bf16.mxu1 %v6771_v28  ;;  %v8110_v39 = vpack.c.bf16 %v8108_v55, %v8109_v36 }
 0x2dc   : > { %v4401_v54 = vadd.f32 %v4400_v10, %v4399_v60  ;;  %v4402_v53 = vpop.f32.mrb[118].mxu0 }
 0x2dd   : > { %v4403_v31 = vpop.f32.mrb[119].mxu0 }
 0x2de   : > { %4836 = vmatpush3.bf16.msra.mxu0 %v6432_v59  ;;  %v4404_v2 = vadd.f32 %v4403_v31, %v4402_v53 }
 0x2df   : > { %4837 = vmatprep.subr.bf16.mxu0 %v8105_v9 }
 0x2e0   : > { %v6784_v45 = vpack.c.bf16 %v4404_v2, %v4401_v54 }
 0x2e1   : > { %4790 = vmatmul.mubr.bf16.gmra.mrb[164].mxu0 %v8107_v38 }
 0x2e2   : > { %4793 = vmatprep.mubr.bf16.mxu0 %v8110_v39  ;;  %4838 = vmatpush3.bf16.msra.mxu0 %v8105_v9  ;;  %v4405_v57 = vpop.f32.mrb[120].mxu0 }
 0x2e3   : > { %4839 = vmatprep.subr.bf16.mxu0 %v8111_v30  ;;  %v4406_v26 = vpop.f32.mrb[121].mxu0 }
 0x2e4   : > { %v4407_v59 = vadd.f32 %v4406_v26, %v4405_v57  ;;  %v4408_v46 = vpop.f32.mrb[122].mxu0 }
 0x2e5   : > { %v4409_v3 = vpop.f32.mrb[123].mxu0 }
 0x2e6   : > { %4840 = vmatpush3.bf16.msra.mxu0 %v8111_v30  ;;  %v4410_v4 = vadd.f32 %v4409_v3, %v4408_v46 }
 0x2e7   : > { %4841 = vmatprep.subr.bf16.mxu0 %v8112_v34 }
 0x2e8   : > { %v6796_v21 = vpack.c.bf16 %v4410_v4, %v4407_v59 }
 0x2e9   : > { %4794 = vmatmul.mubr.bf16.gmra.mrb[168].mxu0 %v8115_v22 }
 0x2ea   : > { %4797 = vmatprep.mubr.bf16.mxu0 %v8118_v42  ;;  %4842 = vmatpush3.bf16.msra.mxu0 %v8112_v34  ;;  %v4411_v13 = vpop.f32.mrb[124].mxu0 }
 0x2eb   : > { %4843 = vmatprep.subr.bf16.mxu0 %v8119_v8  ;;  %v4412_v0 = vpop.f32.mrb[125].mxu0 }
 0x2ec   : > { %v4413_v51 = vadd.f32 %v4412_v0, %v4411_v13  ;;  %v4414_v27 = vpop.f32.mrb[126].mxu0 }
 0x2ed   : > { %v4415_v56 = vpop.f32.mrb[127].mxu0 }
 0x2ee   : > { %4844 = vmatpush3.bf16.msra.mxu0 %v8119_v8  ;;  %v4416_v61 = vadd.f32 %v4415_v56, %v4414_v27 }
 0x2ef   : > { %4845 = vmatprep.subr.bf16.mxu0 %v8120_v6 }
 0x2f0   : > { %v6808_v16 = vpack.c.bf16 %v4416_v61, %v4413_v51 }
 0x2f1   : > { %4798 = vmatmul.mubr.bf16.gmra.mrb[172].mxu0 %v8123_v62 }
 0x2f2   : > { %4846 = vmatpush3.bf16.msra.mxu0 %v8120_v6  ;;  %v4417_v52 = vpop.f32.mrb[128].mxu0 }
 0x2f3   : > { %4847 = vmatprep.subr.bf16.mxu0 %v8124_v50  ;;  %v4418_v12 = vpop.f32.mrb[129].mxu0 }
 0x2f4   : > { %v4419_v35 = vadd.f32 %v4418_v12, %v4417_v52  ;;  %v4420_v18 = vpop.f32.mrb[130].mxu0 }
 0x2f5   : > { %v4421_v32 = vpop.f32.mrb[131].mxu0 }
 0x2f6   : > { %4848 = vmatpush3.bf16.msra.mxu0 %v8124_v50  ;;  %v4422_v14 = vadd.f32 %v4421_v32, %v4420_v18 }
 0x2f8   : > { %v6816_v29 = vpack.c.bf16 %v4422_v14, %v4419_v35 }
 0x2fa   : > { %v4423_v47 = vpop.f32.mrb[132].mxu0 }
 0x2fb   : > { %v4424_v20 = vpop.f32.mrb[133].mxu0 }
 0x2fc   : > { %v4425_v23 = vadd.f32 %v4424_v20, %v4423_v47  ;;  %v4426_v24 = vpop.f32.mrb[134].mxu0 }
 0x2fd   : > { %v4427_v63 = vpop.f32.mrb[135].mxu0 }
 0x2fe   : > { %v4428_v33 = vadd.f32 %v4427_v63, %v4426_v24 }
 0x300   : > { %v6818_v25 = vpack.c.bf16 %v4428_v33, %v4425_v23 }
 0x302   : > { %v4429_v40 = vpop.f32.mrb[136].mxu0 }
 0x303   : > { %v4430_v11 = vpop.f32.mrb[137].mxu0 }
 0x304   : > { %v4431_v49 = vadd.f32 %v4430_v11, %v4429_v40  ;;  %v4432_v15 = vpop.f32.mrb[138].mxu0 }
 0x305   : > { %v4433_v48 = vpop.f32.mrb[139].mxu0 }
 0x306   : > { %v4434_v44 = vadd.f32 %v4433_v48, %v4432_v15 }
 0x308   : > { %v6820_v60 = vpack.c.bf16 %v4434_v44, %v4431_v49 }
 0x30a   : > { %v4435_v10 = vpop.f32.mrb[140].mxu0 }
 0x30b   : > { %v4436_v54 = vpop.f32.mrb[141].mxu0 }
 0x30c   : > { %v4437_v53 = vadd.f32 %v4436_v54, %v4435_v10  ;;  %v4438_v31 = vpop.f32.mrb[142].mxu0 }
 0x30d   : > { %v4439_v2 = vpop.f32.mrb[143].mxu0 }
 0x30e   : > { %v4440_v9 = vadd.f32 %v4439_v2, %v4438_v31 }
 0x310   : > { %v6822_v7 = vpack.c.bf16 %v4440_v9, %v4437_v53 }
 0x36c   : > { %v6824_v38 = vpop.f32.mrb[144].mxu0 }
 0x36d   : > { %v6826_v55 = vpop.f32.mrb[145].mxu0 }
 0x36e   : > { %v6828_v36 = vpop.f32.mrb[146].mxu0 }
 0x36f   : > { %v6830_v39 = vpop.f32.mrb[147].mxu0 }
 0x374   : > { %v6832_v57 = vpop.f32.mrb[148].mxu0 }
 0x375   : > { %v6834_v30 = vpop.f32.mrb[149].mxu0 }
 0x376   : > { %v6836_v26 = vpop.f32.mrb[150].mxu0 }
 0x377   : > { %v6838_v59 = vpop.f32.mrb[151].mxu0 }
 0x37c   : > { %v6840_v46 = vpop.f32.mrb[152].mxu0 }
 0x37d   : > { %v6842_v3 = vpop.f32.mrb[153].mxu0 }
 0x37e   : > { %v6844_v4 = vpop.f32.mrb[154].mxu0 }
 0x37f   : > { %v6846_v34 = vpop.f32.mrb[155].mxu0 }
 0x384   : > { %v6848_v19 = vpop.f32.mrb[156].mxu0 }
 0x385   : > { %v6850_v5 = vpop.f32.mrb[157].mxu0 }
 0x386   : > { %v6852_v22 = vpop.f32.mrb[158].mxu0 }
 0x387   : > { %v6854_v37 = vpop.f32.mrb[159].mxu0 }
 0x38b   : > { %v6856_v1 = vpop.f32.mrb[80].mxu1 }
 0x38c   : > { %2105 = vmax.xlane.f32.xlu1 %v6856_v1  ;;  %v6859_v42 = vpop.f32.mrb[81].mxu1 }
 0x38d   : > { %2101 = vmax.xlane.f32.xlu0 %v6859_v42  ;;  %v6862_v13 = vpop.f32.mrb[82].mxu1 }
 0x38e   : > { %v6864_v8 = vpop.f32.mrb[83].mxu1 }
 0x390   : > { %2107 = vmax.xlane.f32.xlu1 %v6862_v13 }
 0x391   : > { %2103 = vmax.xlane.f32.xlu0 %v6864_v8 }
 0x393   : > { %v6868_v0 = vpop.f32.mrb[84].mxu1 }
 0x394   : > { %v6870_v51 = vpop.f32.mrb[85].mxu1 }
 0x395   : > { %2109 = vmax.xlane.f32.xlu0 %v6870_v51  ;;  %v6873_v27 = vpop.f32.mrb[86].mxu1 }
 0x396   : > { %v6875_v56 = vpop.f32.mrb[87].mxu1 }
 0x397   : > { %2111 = vmax.xlane.f32.xlu1 %v6875_v56 }
 0x399   : > { %2113 = vmax.xlane.f32.xlu0 %v6868_v0 }
 0x39b   : > { %2115 = vmax.xlane.f32.xlu1 %v6873_v27  ;;  %v6880_v61 = vpop.f32.mrb[88].mxu1 }
 0x39c   : > { %v6882_v6 = vpop.f32.mrb[89].mxu1 }
 0x39d   : > { %2117 = vmax.xlane.f32.xlu0 %v6882_v6  ;;  %v6885_v58 = vpop.f32.mrb[90].mxu1 }
 0x39e   : > { %v6887_v41 = vpop.f32.mrb[91].mxu1 }
 0x39f   : > { %2119 = vmax.xlane.f32.xlu1 %v6887_v41 }
 0x3a1   : > { %2121 = vmax.xlane.f32.xlu0 %v6880_v61 }
 0x3a3   : > { %2123 = vmax.xlane.f32.xlu1 %v6885_v58  ;;  %v6892_v62 = vpop.f32.mrb[92].mxu1 }
 0x3a4   : > { %v6894_v52 = vpop.f32.mrb[93].mxu1 }
 0x3a5   : > { %2125 = vmax.xlane.f32.xlu0 %v6894_v52  ;;  %v6897_v50 = vpop.f32.mrb[94].mxu1 }
 0x3a6   : > { %v6899_v12 = vpop.f32.mrb[95].mxu1 }
 0x3a7   : > { %2127 = vmax.xlane.f32.xlu1 %v6899_v12 }
 0x3a9   : > { %2129 = vmax.xlane.f32.xlu0 %v6892_v62 }
 0x3ab   : > { %2131 = vmax.xlane.f32.xlu1 %v6897_v50 }
 0x3ac   : > { %v6904_v35 = vpop.f32.mrb[160].mxu0 }
 0x3ad   : > { %v6906_v18 = vpop.f32.mrb[161].mxu0  ;;  %2133 = vmax.xlane.f32.xlu0 %v6826_v55 }
 0x3ae   : > { %v6909_v32 = vpop.f32.mrb[162].mxu0 }
 0x3af   : > { %v6911_v14 = vpop.f32.mrb[163].mxu0  ;;  %2135 = vmax.xlane.f32.xlu1 %v6830_v39 }
 0x3b1   : > { %2137 = vmax.xlane.f32.xlu0 %v6824_v38 }
 0x3b3   : > { %2139 = vmax.xlane.f32.xlu1 %v6828_v36 }
 0x3b4   : > { %v6916_v47 = vpop.f32.mrb[164].mxu0 }
 0x3b5   : > { %v6918_v20 = vpop.f32.mrb[165].mxu0  ;;  %2141 = vmax.xlane.f32.xlu0 %v6834_v30 }
 0x3b6   : > { %v6921_v23 = vpop.f32.mrb[166].mxu0 }
 0x3b7   : > { %v6923_v24 = vpop.f32.mrb[167].mxu0  ;;  %2143 = vmax.xlane.f32.xlu1 %v6838_v59 }
 0x3b9   : > { %2145 = vmax.xlane.f32.xlu0 %v6832_v57 }
 0x3bb   : > { %2147 = vmax.xlane.f32.xlu1 %v6836_v26 }
 0x3bc   : > { %v6928_v63 = vpop.f32.mrb[168].mxu0 }
 0x3bd   : > { %8125 = vst [vmem:[#allocation25_spill] sm:$0xff] %v6928_v63  ;;  %v6930_v33 = vpop.f32.mrb[169].mxu0  ;;  %2149 = vmax.xlane.f32.xlu0 %v6842_v3 }
 0x3be   : > { %v6933_v40 = vpop.f32.mrb[170].mxu0 }
 0x3bf   : > { %8126 = vst [vmem:[#allocation68_spill] sm:$0xff] %v6933_v40  ;;  %v6935_v11 = vpop.f32.mrb[171].mxu0  ;;  %2151 = vmax.xlane.f32.xlu1 %v6846_v34 }
 0x3c1   : > { %2153 = vmax.xlane.f32.xlu0 %v6840_v46 }
 0x3c3   : > { %2155 = vmax.xlane.f32.xlu1 %v6844_v4 }
 0x3c4   : > { %v6940_v49 = vpop.f32.mrb[172].mxu0 }
 0x3c5   : > { %8127 = vst [vmem:[#allocation39_spill] sm:$0xff] %v6940_v49  ;;  %v6942_v15 = vpop.f32.mrb[173].mxu0  ;;  %2157 = vmax.xlane.f32.xlu0 %v6850_v5 }
 0x3c6   : > { %8128 = vst [vmem:[#allocation38_spill] sm:$0xff] %v6942_v15  ;;  %v6945_v48 = vpop.f32.mrb[174].mxu0 }
 0x3c7   : > { %8129 = vst [vmem:[#allocation24_spill] sm:$0xff] %v6945_v48  ;;  %v6947_v44 = vpop.f32.mrb[175].mxu0  ;;  %2159 = vmax.xlane.f32.xlu1 %v6854_v37 }
 0x3c8   : > { %8130 = vst [vmem:[#allocation27_spill] sm:$0xff] %v6947_v44 }
 0x3c9   : > { %2161 = vmax.xlane.f32.xlu0 %v6848_v19 }
 0x3cb   : > { %2163 = vmax.xlane.f32.xlu1 %v6852_v22 }
 0x3cd   : > { %2793 = vmax.xlane.f32.xlu0 %v6906_v18 }
 0x3cf   : > { %2795 = vmax.xlane.f32.xlu1 %v6911_v14 }
 0x3d1   : > { %2797 = vmax.xlane.f32.xlu0 %v6904_v35 }
 0x3d3   : > { %2799 = vmax.xlane.f32.xlu1 %v6909_v32 }
 0x3d5   : > { %2801 = vmax.xlane.f32.xlu0 %v6918_v20 }
 0x3d7   : > { %2803 = vmax.xlane.f32.xlu1 %v6923_v24 }
 0x3d9   : > { %2805 = vmax.xlane.f32.xlu0 %v6916_v47 }
 0x3db   : > { %2807 = vmax.xlane.f32.xlu1 %v6921_v23 }
 0x3dd   : > { %2809 = vmax.xlane.f32.xlu0 %v6930_v33 }
 0x3df   : > { %2811 = vmax.xlane.f32.xlu1 %v6935_v11 }
 0x3e1   : > { %2813 = vmax.xlane.f32.xlu0 %v6928_v63 }
 0x3e3   : > { %2815 = vmax.xlane.f32.xlu1 %v6933_v40 }
 0x3e5   : > { %2817 = vmax.xlane.f32.xlu0 %v6942_v15 }
 0x3e7   : > { %2819 = vmax.xlane.f32.xlu1 %v6947_v44 }
 0x3e9   : > { %2821 = vmax.xlane.f32.xlu0 %v6940_v49 }
 0x3eb   : > { %2823 = vmax.xlane.f32.xlu1 %v6945_v48 }
 0x419   : > { %v2106_v10 = vpop.xlane.xlu1 %2105 }
 0x41a   : > { %v2102_v54 = vpop.xlane.xlu0 %2101  ;;  %v2167_v31 = vsub.f32 %v6856_v1, %v2106_v10 }
 0x41b   : > { %v2165_v53 = vsub.f32 %v6859_v42, %v2102_v54 }
 0x41c   : > { %v2201_v15 = vmul.f32 1.442695, %v2167_v31 }
 0x41d   : > { %v2197_v2 = vmul.f32 1.442695, %v2165_v53  ;;  %v2108_v9 = vpop.xlane.xlu1 %2107 }
 0x41e   : > { %v2168_v43 = vsub.f32 %v6862_v13, %v2108_v9  ;;  %v2104_v17 = vpop.xlane.xlu0 %2103 }
 0x41f   : > { %v2166_v40 = vsub.f32 %v6864_v8, %v2104_v17  ;;  %5225 = vpow2.f32 %v2197_v2 }
 0x420   : > { %v2203_v63 = vmul.f32 1.442695, %v2168_v43 }
 0x421   : > { %v2199_v44 = vmul.f32 1.442695, %v2166_v40 }
 0x422   : > { %5227 = vpow2.f32 %v2203_v63  ;;  %v2110_v49 = vpop.xlane.xlu0 %2109 }
 0x423   : > { %5229 = vpow2.f32 %v2199_v44  ;;  %v2169_v48 = vsub.f32 %v6870_v51, %v2110_v49 }
 0x424   : > { %5231 = vpow2.f32 %v2201_v15  ;;  %v2112_v42 = vpop.xlane.xlu1 %2111 }
 0x425   : > { %v2205_v54 = vmul.f32 1.442695, %v2169_v48  ;;  %v2170_v1 = vsub.f32 %v6875_v56, %v2112_v42 }
 0x426   : > { %v2114_v10 = vpop.xlane.xlu0 %2113 }
 0x427   : > { %v2207_v53 = vmul.f32 1.442695, %v2170_v1  ;;  %v2171_v13 = vsub.f32 %v6868_v0, %v2114_v10  ;;  %5233 = vpow2.f32 %v2205_v54 }
 0x428   : > { %v2116_v17 = vpop.xlane.xlu1 %2115 }
 0x429   : > { %5235 = vpow2.f32 %v2207_v53  ;;  %v2209_v43 = vmul.f32 1.442695, %v2171_v13  ;;  %v2172_v8 = vsub.f32 %v6873_v27, %v2116_v17  ;;  %v6976_v40 = vpop.eup %5225 }
 0x42a   : > { %v2118_v63 = vpop.xlane.xlu0 %2117 }
 0x42b   : > { %v2211_v44 = vmul.f32 1.442695, %v2172_v8  ;;  %v2173_v51 = vsub.f32 %v6882_v6, %v2118_v63  ;;  %5237 = vpow2.f32 %v2209_v43 }
 0x42c   : > { %v6979_v49 = vpop.eup %5227  ;;  %v2120_v56 = vpop.xlane.xlu1 %2119 }
 0x42d   : > { %v6981_v15 = vpop.eup %5229  ;;  %5239 = vpow2.f32 %v2211_v44  ;;  %v2213_v0 = vmul.f32 1.442695, %v2173_v51  ;;  %v2174_v48 = vsub.f32 %v6887_v41, %v2120_v56 }
 0x42e   : > { %v6984_v31 = vpop.eup %5231  ;;  %v2122_v2 = vpop.xlane.xlu0 %2121  ;;  %v2325_v27 = vpack.c.bf16 %v6981_v15, %v6976_v40 }
 0x42f   : > { %v2215_v9 = vmul.f32 1.442695, %v2174_v48  ;;  %v2175_v42 = vsub.f32 %v6880_v61, %v2122_v2  ;;  %v2326_v6 = vpack.c.bf16 %v6979_v49, %v6984_v31  ;;  %5241 = vpow2.f32 %v2213_v0 }
 0x430   : > { %4721 = vmatprep.mubr.bf16.mxu1 %v2325_v27  ;;  %v2124_v54 = vpop.xlane.xlu1 %2123 }
 0x431   : > { %5243 = vpow2.f32 %v2215_v9  ;;  %v2217_v1 = vmul.f32 1.442695, %v2175_v42  ;;  %v2176_v10 = vsub.f32 %v6885_v58, %v2124_v54  ;;  %4722 = vmatmul.mubr.bf16.vlgmr.msra.gmra.mrb[96].mxu1 %v2326_v6  ;;  %v6992_v41 = vpop.eup %5233 }
 0x432   : > { %4738 = vmatpush3.bf16.msra.mxu1 %v6771_v28  ;;  %v2126_v53 = vpop.xlane.xlu0 %2125 }
 0x433   : > { %v6995_v13 = vpop.eup %5235  ;;  %v2219_v17 = vmul.f32 1.442695, %v2176_v10  ;;  %v2177_v61 = vsub.f32 %v6894_v52, %v2126_v53  ;;  %4739 = vmatprep.subr.bf16.mxu1 %v6784_v45  ;;  %5245 = vpow2.f32 %v2217_v1 }
 0x434   : > { %v2128_v43 = vpop.xlane.xlu1 %2127  ;;  %v2327_v8 = vpack.c.bf16 %v6995_v13, %v6992_v41 }
 0x435   : > { %5247 = vpow2.f32 %v2219_v17  ;;  %v2221_v58 = vmul.f32 1.442695, %v2177_v61  ;;  %v2178_v63 = vsub.f32 %v6899_v12, %v2128_v43  ;;  %v7002_v44 = vpop.eup %5237 }
 0x436   : > { %4740 = vmatpush3.bf16.msra.mxu1 %v6784_v45  ;;  %v2130_v28 = vpop.xlane.xlu0 %2129  ;;  %4725 = vmatprep.mubr.bf16.mxu1 %v2327_v8 }
 0x437   : > { %v7005_v51 = vpop.eup %5239  ;;  %v2223_v52 = vmul.f32 1.442695, %v2178_v63  ;;  %v2179_v56 = vsub.f32 %v6892_v62, %v2130_v28  ;;  %4741 = vmatprep.subr.bf16.mxu1 %v6796_v21  ;;  %5249 = vpow2.f32 %v2221_v58 }
 0x438   : > { %v2132_v0 = vpop.xlane.xlu1 %2131  ;;  %v2328_v48 = vpack.c.bf16 %v7005_v51, %v7002_v44 }
 0x439   : > { %5251 = vpow2.f32 %v2223_v52  ;;  %v2225_v12 = vmul.f32 1.442695, %v2179_v56  ;;  %v2180_v2 = vsub.f32 %v6897_v50, %v2132_v0  ;;  %v7012_v27 = vpop.eup %5241 }
 0x43a   : > { %4742 = vmatpush3.bf16.msra.mxu1 %v6796_v21  ;;  %v2134_v45 = vpop.xlane.xlu0 %2133 }
 0x43b   : > { %v7015_v9 = vpop.eup %5243  ;;  %v2227_v42 = vmul.f32 1.442695, %v2180_v2  ;;  %v2181_v62 = vsub.f32 %v6826_v55, %v2134_v45  ;;  %4726 = vmatmul.mubr.bf16.gmra.mrb[100].mxu1 %v2328_v48  ;;  %4743 = vmatprep.subr.bf16.mxu1 %v6808_v16  ;;  %5253 = vpow2.f32 %v2225_v12 }
 0x43c   : > { %v2136_v6 = vpop.xlane.xlu1 %2135  ;;  %v2329_v54 = vpack.c.bf16 %v7015_v9, %v7012_v27 }
 0x43d   : > { %5255 = vpow2.f32 %v2227_v42  ;;  %v2229_v50 = vmul.f32 1.442695, %v2181_v62  ;;  %v2182_v1 = vsub.f32 %v6830_v39, %v2136_v6  ;;  %v7022_v10 = vpop.eup %5245 }
 0x43e   : > { %4744 = vmatpush3.bf16.msra.mxu1 %v6808_v16  ;;  %v2138_v21 = vpop.xlane.xlu0 %2137  ;;  %4729 = vmatprep.mubr.bf16.mxu1 %v2329_v54 }
 0x43f   : > { %v7025_v53 = vpop.eup %5247  ;;  %v2231_v55 = vmul.f32 1.442695, %v2182_v1  ;;  %v2183_v17 = vsub.f32 %v6824_v38, %v2138_v21  ;;  %4745 = vmatprep.subr.bf16.mxu1 %v6816_v29  ;;  %5257 = vpow2.f32 %v2229_v50 }
 0x440   : > { %v2140_v61 = vpop.xlane.xlu1 %2139  ;;  %v2330_v43 = vpack.c.bf16 %v7025_v53, %v7022_v10 }
 0x441   : > { %5259 = vpow2.f32 %v2231_v55  ;;  %v2233_v39 = vmul.f32 1.442695, %v2183_v17  ;;  %v2184_v8 = vsub.f32 %v6828_v36, %v2140_v61  ;;  %v7032_v58 = vpop.eup %5249 }
 0x442   : > { %4746 = vmatpush3.bf16.msra.mxu1 %v6816_v29  ;;  %v2142_v16 = vpop.xlane.xlu0 %2141 }
 0x443   : > { %v7035_v63 = vpop.eup %5251  ;;  %v2235_v28 = vmul.f32 1.442695, %v2184_v8  ;;  %v2185_v38 = vsub.f32 %v6834_v30, %v2142_v16  ;;  %4730 = vmatmul.mubr.bf16.gmra.mrb[104].mxu1 %v2330_v43  ;;  %4747 = vmatprep.subr.bf16.mxu1 %v6818_v25  ;;  %5261 = vpow2.f32 %v2233_v39  ;;  %v8131_v39 = vld [vmem:[#allocation40_spill] sm:$0xff] }
 0x444   : > { %v2144_v52 = vpop.xlane.xlu1 %2143  ;;  %v2331_v56 = vpack.c.bf16 %v7035_v63, %v7032_v58 }
 0x445   : > { %5263 = vpow2.f32 %v2235_v28  ;;  %v2237_v36 = vmul.f32 1.442695, %v2185_v38  ;;  %v2186_v0 = vsub.f32 %v6838_v59, %v2144_v52  ;;  %v7042_v48 = vpop.eup %5253 }
 0x446   : > { %4748 = vmatpush3.bf16.msra.mxu1 %v6818_v25  ;;  %v2146_v29 = vpop.xlane.xlu0 %2145  ;;  %4733 = vmatprep.mubr.bf16.mxu1 %v2331_v56 }
 0x447   : > { %v7045_v12 = vpop.eup %5255  ;;  %v2239_v30 = vmul.f32 1.442695, %v2186_v0  ;;  %v2187_v2 = vsub.f32 %v6832_v57, %v2146_v29  ;;  %4749 = vmatprep.subr.bf16.mxu1 %v6820_v60  ;;  %5265 = vpow2.f32 %v2237_v36 }
 0x448   : > { %v2148_v45 = vpop.xlane.xlu1 %2147  ;;  %v2332_v42 = vpack.c.bf16 %v7045_v12, %v7042_v48 }
 0x449   : > { %5267 = vpow2.f32 %v2239_v30  ;;  %v2241_v59 = vmul.f32 1.442695, %v2187_v2  ;;  %v2188_v62 = vsub.f32 %v6836_v26, %v2148_v45  ;;  %v7052_v6 = vpop.eup %5257 }
 0x44a   : > { %4750 = vmatpush3.bf16.msra.mxu1 %v6820_v60  ;;  %v2150_v25 = vpop.xlane.xlu0 %2149 }
 0x44b   : > { %v7055_v54 = vpop.eup %5259  ;;  %v2243_v50 = vmul.f32 1.442695, %v2188_v62  ;;  %v2189_v57 = vsub.f32 %v6842_v3, %v2150_v25  ;;  %4734 = vmatmul.mubr.bf16.gmra.mrb[108].mxu1 %v2332_v42  ;;  %4751 = vmatprep.subr.bf16.mxu1 %v6822_v7  ;;  %5269 = vpow2.f32 %v2241_v59 }
 0x44c   : > { %v2152_v1 = vpop.xlane.xlu1 %2151  ;;  %v2333_v21 = vpack.c.bf16 %v7055_v54, %v7052_v6 }
 0x44d   : > { %5271 = vpow2.f32 %v2243_v50  ;;  %v2245_v26 = vmul.f32 1.442695, %v2189_v57  ;;  %v2190_v55 = vsub.f32 %v6846_v34, %v2152_v1  ;;  %v7062_v17 = vpop.eup %5261 }
 0x44e   : > { %4752 = vmatpush3.bf16.msra.mxu1 %v6822_v7  ;;  %v2154_v60 = vpop.xlane.xlu0 %2153  ;;  %4753 = vmatprep.mubr.bf16.mxu1 %v2333_v21 }
 0x44f   : > { %v7065_v61 = vpop.eup %5263  ;;  %v2247_v3 = vmul.f32 1.442695, %v2190_v55  ;;  %v2191_v43 = vsub.f32 %v6840_v46, %v2154_v60  ;;  %4801 = vmatprep.subr.bf16.mxu1 %v8131_v39  ;;  %5273 = vpow2.f32 %v2245_v26 }
 0x450   : > { %v2156_v8 = vpop.xlane.xlu1 %2155  ;;  %v2334_v16 = vpack.c.bf16 %v7065_v61, %v7062_v17 }
 0x451   : > { %5275 = vpow2.f32 %v2247_v3  ;;  %v2249_v34 = vmul.f32 1.442695, %v2191_v43  ;;  %v2192_v28 = vsub.f32 %v6844_v4, %v2156_v8  ;;  %v7072_v38 = vpop.eup %5265 }
 0x452   : > { %v2158_v7 = vpop.xlane.xlu0 %2157 }
 0x453   : > { %v7074_v52 = vpop.eup %5267  ;;  %v2251_v56 = vmul.f32 1.442695, %v2192_v28  ;;  %v2193_v36 = vsub.f32 %v6850_v5, %v2158_v7  ;;  %4754 = vmatmul.mubr.bf16.vlgmr.msra.gmra.mrb[112].mxu1 %v2334_v16  ;;  %5277 = vpow2.f32 %v2249_v34  ;;  %v8132_v5 = vld [vmem:[#allocation43_spill] sm:$0xff] }
 0x454   : > { %v2160_v46 = vpop.xlane.xlu1 %2159  ;;  %v2335_v0 = vpack.c.bf16 %v7074_v52, %v7072_v38 }
 0x455   : > { %5279 = vpow2.f32 %v2251_v56  ;;  %v2253_v29 = vmul.f32 1.442695, %v2193_v36  ;;  %v2194_v30 = vsub.f32 %v6854_v37, %v2160_v46  ;;  %v7080_v2 = vpop.eup %5269 }
 0x456   : > { %v2162_v4 = vpop.xlane.xlu0 %2161  ;;  %4757 = vmatprep.mubr.bf16.mxu1 %v2335_v0 }
 0x457   : > { %v7082_v45 = vpop.eup %5271  ;;  %v2255_v42 = vmul.f32 1.442695, %v2194_v30  ;;  %v2195_v59 = vsub.f32 %v6848_v19, %v2162_v4  ;;  %4802 = vmatpush3.bf16.xpose.msra.mxu1 %v8131_v39  ;;  %5281 = vpow2.f32 %v2253_v29 }
 0x458   : > { %4803 = vmatprep.subr.bf16.mxu1 %v8132_v5  ;;  %v2164_v62 = vpop.xlane.xlu1 %2163  ;;  %v2336_v25 = vpack.c.bf16 %v7082_v45, %v7080_v2 }
 0x459   : > { %5283 = vpow2.f32 %v2255_v42  ;;  %v2257_v37 = vmul.f32 1.442695, %v2195_v59  ;;  %v2196_v50 = vsub.f32 %v6852_v22, %v2164_v62  ;;  %v7090_v57 = vpop.eup %5273 }
 0x45a   : > { %8133 = vst [vmem:[#allocation42_spill] sm:$0xff] %v7090_v57  ;;  %v2794_v1 = vpop.xlane.xlu0 %2793 }
 0x45b   : > { %v7092_v21 = vpop.eup %5275  ;;  %v2259_v26 = vmul.f32 1.442695, %v2196_v50  ;;  %v2857_v19 = vsub.f32 %v6906_v18, %v2794_v1  ;;  %4758 = vmatmul.mubr.bf16.gmra.mrb[116].mxu1 %v2336_v25  ;;  %5285 = vpow2.f32 %v2257_v37  ;;  %v8137_v18 = vld [vmem:[#allocation46_spill] sm:$0xff] }
 0x45c   : > { %8134 = vst [vmem:[#allocation41_spill] sm:$0xff] %v7092_v21  ;;  %v2796_v55 = vpop.xlane.xlu1 %2795  ;;  %v2337_v60 = vpack.c.bf16 %v7092_v21, %v7090_v57 }
 0x45d   : > { %5287 = vpow2.f32 %v2259_v26  ;;  %v2889_v3 = vmul.f32 1.442695, %v2857_v19  ;;  %v2858_v43 = vsub.f32 %v6911_v14, %v2796_v55  ;;  %v7098_v39 = vpop.eup %5277 }
 0x45e   : > { %8135 = vst [vmem:[#allocation45_spill] sm:$0xff] %v7098_v39  ;;  %v2798_v22 = vpop.xlane.xlu0 %2797  ;;  %4761 = vmatprep.mubr.bf16.mxu1 %v2337_v60 }
 0x45f   : > { %v7100_v8 = vpop.eup %5279  ;;  %v2891_v16 = vmul.f32 1.442695, %v2858_v43  ;;  %v2859_v34 = vsub.f32 %v6904_v35, %v2798_v22  ;;  %4804 = vmatpush3.bf16.xpose.msra.mxu1 %v8132_v5  ;;  %5289 = vpow2.f32 %v2889_v3  ;;  %v8143_v43 = vld [vmem:[#allocation51_spill] sm:$0xff]  ;;  %v8144_v22 = vld [vmem:[#allocation50_spill] sm:$0xff] }
 0x460   : > { %8136 = vst [vmem:[#allocation44_spill] sm:$0xff] %v7100_v8  ;;  %4805 = vmatprep.subr.bf16.mxu1 %v8137_v18  ;;  %v2800_v28 = vpop.xlane.xlu1 %2799  ;;  %v2338_v7 = vpack.c.bf16 %v7100_v8, %v7098_v39 }
 0x461   : > { %5291 = vpow2.f32 %v2891_v16  ;;  %v2893_v14 = vmul.f32 1.442695, %v2859_v34  ;;  %v2860_v56 = vsub.f32 %v6909_v32, %v2800_v28  ;;  %v7108_v36 = vpop.eup %5281  ;;  %v8145_v16 = vpack.c.bf16 %v8143_v43, %v8144_v22 }
 0x462   : > { %8138 = vst [vmem:[#allocation26_spill] sm:$0xff] %v7108_v36  ;;  %v2802_v46 = vpop.xlane.xlu0 %2801 }
 0x463   : > { %v7110_v0 = vpop.eup %5283  ;;  %v2895_v29 = vmul.f32 1.442695, %v2860_v56  ;;  %v2861_v35 = vsub.f32 %v6918_v20, %v2802_v46  ;;  %4762 = vmatmul.mubr.bf16.gmra.mrb[120].mxu1 %v2338_v7  ;;  %5293 = vpow2.f32 %v2893_v14  ;;  %v8142_v20 = vld [vmem:[#allocation49_spill] sm:$0xff] }
 0x464   : > { %8139 = vst [vmem:[#allocation29_spill] sm:$0xff] %v7110_v0  ;;  %v2804_v30 = vpop.xlane.xlu1 %2803  ;;  %v2339_v4 = vpack.c.bf16 %v7110_v0, %v7108_v36  ;;  %v8146_v46 = vld [vmem:[#allocation25_spill] sm:$0xff] }
 0x465   : > { %5295 = vpow2.f32 %v2895_v29  ;;  %v2897_v42 = vmul.f32 1.442695, %v2861_v35  ;;  %v2862_v59 = vsub.f32 %v6923_v24, %v2804_v30  ;;  %v7116_v5 = vpop.eup %5285  ;;  %v8147_v35 = vld [vmem:[#allocation52_spill] sm:$0xff] }
 0x466   : > { %8140 = vst [vmem:[#allocation48_spill] sm:$0xff] %v7116_v5  ;;  %v2806_v32 = vpop.xlane.xlu0 %2805  ;;  %4765 = vmatprep.mubr.bf16.mxu1 %v2339_v4 }
 0x467   : > { %v7118_v62 = vpop.eup %5287  ;;  %v2899_v25 = vmul.f32 1.442695, %v2862_v59  ;;  %v2863_v37 = vsub.f32 %v6916_v47, %v2806_v32  ;;  %4806 = vmatpush3.bf16.xpose.msra.mxu1 %v8137_v18  ;;  %5297 = vpow2.f32 %v2897_v42  ;;  %v8148_v42 = vld [vmem:[#allocation68_spill] sm:$0xff] }
 0x468   : > { %8141 = vst [vmem:[#allocation47_spill] sm:$0xff] %v7118_v62  ;;  %4807 = vmatprep.subr.bf16.mxu1 %v8142_v20  ;;  %v2808_v50 = vpop.xlane.xlu1 %2807  ;;  %v2340_v1 = vpack.c.bf16 %v7118_v62, %v7116_v5 }
 0x469   : > { %5299 = vpow2.f32 %v2899_v25  ;;  %v2901_v24 = vmul.f32 1.442695, %v2863_v37  ;;  %v2864_v26 = vsub.f32 %v6921_v23, %v2808_v50  ;;  %v7126_v19 = vpop.eup %5289 }
 0x46a   : > { %v2810_v55 = vpop.xlane.xlu0 %2809 }
 0x46b   : > { %v7128_v60 = vpop.eup %5291  ;;  %v2903_v3 = vmul.f32 1.442695, %v2864_v26  ;;  %v2865_v47 = vsub.f32 %v6930_v33, %v2810_v55  ;;  %4766 = vmatmul.mubr.bf16.gmra.mrb[124].mxu1 %v2340_v1  ;;  %5301 = vpow2.f32 %v2901_v24  ;;  %v8149_v1 = vld [vmem:[#allocation38_spill] sm:$0xff] }
 0x46c   : > { %4817 = vmatprep.mubr.bf16.mxu1 %v8145_v16  ;;  %v2812_v34 = vpop.xlane.xlu1 %2811  ;;  %v3017_v18 = vpack.c.bf16 %v7128_v60, %v7126_v19 }
 0x46d   : > { %5303 = vpow2.f32 %v2903_v3  ;;  %v2905_v23 = vmul.f32 1.442695, %v2865_v47  ;;  %v2866_v28 = vsub.f32 %v6935_v11, %v2812_v34  ;;  %v7137_v7 = vpop.eup %5293  ;;  %v8150_v3 = vld [vmem:[#allocation27_spill] sm:$0xff] }
 0x46e   : > { %4849 = vmatprep.mubr.bf16.mxu0 %v3017_v18  ;;  %v2814_v14 = vpop.xlane.xlu0 %2813  ;;  %v8151_v18 = vld [vmem:[#allocation39_spill] sm:$0xff] }
 0x46f   : > { %v7139_v56 = vpop.eup %5295  ;;  %v2907_v33 = vmul.f32 1.442695, %v2866_v28  ;;  %v2867_v29 = vsub.f32 %v8146_v46, %v2814_v14  ;;  %4808 = vmatpush3.bf16.xpose.msra.mxu1 %v8142_v20  ;;  %5305 = vpow2.f32 %v2905_v23  ;;  %v8152_v28 = vld [vmem:[#allocation55_spill] sm:$0xff] }
 0x470   : > { %4809 = vmatprep.subr.bf16.mxu1 %v8147_v35  ;;  %v2816_v30 = vpop.xlane.xlu1 %2815  ;;  %v3018_v4 = vpack.c.bf16 %v7139_v56, %v7137_v7 }
 0x471   : > { %5307 = vpow2.f32 %v2907_v33  ;;  %v2909_v11 = vmul.f32 1.442695, %v2867_v29  ;;  %v2868_v59 = vsub.f32 %v8148_v42, %v2816_v30  ;;  %v7147_v32 = vpop.eup %5297  ;;  %v8153_v29 = vld [vmem:[#allocation24_spill] sm:$0xff] }
 0x472   : > { %4850 = vmatmul.mubr.bf16.vlgmr.msra.gmra.mrb[176].mxu0 %v3018_v4  ;;  %v2818_v25 = vpop.xlane.xlu0 %2817 }
 0x473   : > { %v7149_v37 = vpop.eup %5299  ;;  %v2911_v50 = vmul.f32 1.442695, %v2868_v59  ;;  %v2869_v20 = vsub.f32 %v8149_v1, %v2818_v25  ;;  %5309 = vpow2.f32 %v2909_v11 }
 0x474   : > { %v2820_v24 = vpop.xlane.xlu1 %2819  ;;  %v3019_v26 = vpack.c.bf16 %v7149_v37, %v7147_v32 }
 0x475   : > { %5311 = vpow2.f32 %v2911_v50  ;;  %v2913_v55 = vmul.f32 1.442695, %v2869_v20  ;;  %v2870_v47 = vsub.f32 %v8150_v3, %v2820_v24  ;;  %v7155_v43 = vpop.eup %5301  ;;  %v8154_v50 = vld [vmem:[#allocation58_spill] sm:$0xff] }
 0x476   : > { %4853 = vmatprep.mubr.bf16.mxu0 %v3019_v26  ;;  %v2822_v22 = vpop.xlane.xlu0 %2821 }
 0x477   : > { %v7157_v16 = vpop.eup %5303  ;;  %v2915_v34 = vmul.f32 1.442695, %v2870_v47  ;;  %v2871_v23 = vsub.f32 %v8151_v18, %v2822_v22  ;;  %4810 = vmatpush3.bf16.xpose.msra.mxu1 %v8147_v35  ;;  %5313 = vpow2.f32 %v2913_v55  ;;  %v8155_v47 = vld [vmem:[#allocation61_spill] sm:$0xff]  ;;  %v8157_v18 = vld [vmem:[#allocation54_spill] sm:$0xff] }
 0x478   : > { %4811 = vmatprep.subr.bf16.mxu1 %v8152_v28  ;;  %v2824_v14 = vpop.xlane.xlu1 %2823  ;;  %v3020_v33 = vpack.c.bf16 %v7157_v16, %v7155_v43 }
 0x479   : > { %5315 = vpow2.f32 %v2915_v34  ;;  %v2917_v46 = vmul.f32 1.442695, %v2871_v23  ;;  %v2872_v30 = vsub.f32 %v8153_v29, %v2824_v14  ;;  %v7165_v4 = vpop.eup %5305  ;;  %v8156_v34 = vld [vmem:[#allocation31_spill] sm:$0xff]  ;;  %v8158_v23 = vld [vmem:[#allocation53_spill] sm:$0xff]  ;;  %v8163_v29 = vld [vmem:[#allocation30_spill] sm:$0xff] }
 0x47a   : > { %4854 = vmatmul.mubr.bf16.gmra.mrb[180].mxu0 %v3020_v33  ;;  %v8160_v14 = vld [vmem:[#allocation57_spill] sm:$0xff]  ;;  %v8161_v33 = vld [vmem:[#allocation56_spill] sm:$0xff] }
 0x47b   : > { %v7167_v11 = vpop.eup %5307  ;;  %v2919_v42 = vmul.f32 1.442695, %v2872_v30  ;;  %5317 = vpow2.f32 %v2917_v46  ;;  %v8162_v46 = vpack.c.bf16 %v8160_v14, %v8161_v33  ;;  %v8164_v30 = vld [vmem:[#allocation33_spill] sm:$0xff]  ;;  %v8176_v14 = vld [vmem:[#allocation67_spill] sm:$0xff]  ;;  %v8177_v33 = vld [vmem:[#allocation66_spill] sm:$0xff] }
 0x47c   : > { %v3021_v35 = vpack.c.bf16 %v7167_v11, %v7165_v4 }
 0x47d   : > { %5319 = vpow2.f32 %v2919_v42  ;;  %v7171_v59 = vpop.eup %5309  ;;  %v8165_v42 = vld [vmem:[#allocation60_spill] sm:$0xff] }
 0x47e   : > { %4857 = vmatprep.mubr.bf16.mxu0 %v3021_v35  ;;  %v8166_v35 = vld [vmem:[#allocation59_spill] sm:$0xff] }
 0x47f   : > { %v7173_v25 = vpop.eup %5311  ;;  %4812 = vmatpush3.bf16.xpose.msra.mxu1 %v8152_v28  ;;  %v8159_v28 = vpack.c.bf16 %v8157_v18, %v8158_v23  ;;  %v8173_v18 = vld [vmem:[#allocation65_spill] sm:$0xff]  ;;  %v8174_v23 = vld [vmem:[#allocation64_spill] sm:$0xff] }
 0x480   : > { %4813 = vmatprep.subr.bf16.mxu1 %v8154_v50  ;;  %v3022_v1 = vpack.c.bf16 %v7173_v25, %v7171_v59 }
 0x481   : > { %v7179_v20 = vpop.eup %5313 }
 0x482   : > { %4858 = vmatmul.mubr.bf16.gmra.mrb[184].mxu0 %v3022_v1  ;;  %v8168_v1 = vld [vmem:[#allocation63_spill] sm:$0xff] }
 0x483   : > { %v7181_v24 = vpop.eup %5315 }
 0x484   : > { %v3023_v26 = vpack.c.bf16 %v7181_v24, %v7179_v20 }
 0x485   : > { %v7185_v55 = vpop.eup %5317 }
 0x486   : > { %4861 = vmatprep.mubr.bf16.mxu0 %v3023_v26  ;;  %v8169_v26 = vld [vmem:[#allocation62_spill] sm:$0xff] }
 0x487   : > { %v7187_v3 = vpop.eup %5319  ;;  %4814 = vmatpush3.bf16.xpose.msra.mxu1 %v8154_v50  ;;  %v8167_v50 = vpack.c.bf16 %v8165_v42, %v8166_v35  ;;  %v8181_v42 = vld [vmem:[#allocation70_spill] sm:$0xff]  ;;  %v8182_v35 = vld [vmem:[#allocation69_spill] sm:$0xff] }
 0x488   : > { %4815 = vmatprep.subr.bf16.mxu1 %v8155_v47  ;;  %v3024_v22 = vpack.c.bf16 %v7187_v3, %v7185_v55 }
 0x48a   : > { %4862 = vmatmul.mubr.bf16.gmra.mrb[188].mxu0 %v3024_v22  ;;  %v8171_v22 = vld [vmem:[#allocation32_spill] sm:$0xff] }
 0x48f   : > { %4816 = vmatpush3.bf16.xpose.msra.mxu1 %v8155_v47  ;;  %v8170_v47 = vpack.c.bf16 %v8168_v1, %v8169_v26  ;;  %v8184_v1 = vld [vmem:[#allocation36_spill] sm:$0xff] }
 0x490   : > { %4865 = vmatprep.subr.bf16.mxu1 %v8156_v34 }
 0x496   : > { %4818 = vmatmul.mubr.bf16.vlgmr.msra.gmra.mrb[128].mxu1 %v8159_v28  ;;  %v8175_v28 = vpack.c.bf16 %v8173_v18, %v8174_v23 }
 0x497   : > { %4821 = vmatprep.mubr.bf16.mxu1 %v8162_v46  ;;  %4866 = vmatpush3.bf16.msra.mxu1 %v8156_v34  ;;  %v8172_v34 = vld [vmem:[#allocation35_spill] sm:$0xff]  ;;  %v8178_v46 = vpack.c.bf16 %v8176_v14, %v8177_v33 }
 0x498   : > { %4867 = vmatprep.subr.bf16.mxu1 %v8163_v29 }
 0x49b   : > { %4868 = vmatpush3.bf16.msra.mxu1 %v8163_v29  ;;  %v8179_v29 = vld [vmem:[#allocation34_spill] sm:$0xff] }
 0x49c   : > { %4869 = vmatprep.subr.bf16.mxu1 %v8164_v30 }
 0x49e   : > { %4822 = vmatmul.mubr.bf16.gmra.mrb[132].mxu1 %v8167_v50  ;;  %v8183_v50 = vpack.c.bf16 %v8181_v42, %v8182_v35 }
 0x49f   : > { %4825 = vmatprep.mubr.bf16.mxu1 %v8170_v47  ;;  %4870 = vmatpush3.bf16.msra.mxu1 %v8164_v30  ;;  %v8180_v30 = vld [vmem:[#allocation37_spill] sm:$0xff] }
 0x4a0   : > { %4871 = vmatprep.subr.bf16.mxu1 %v8171_v22 }
 0x4a3   : > { %4872 = vmatpush3.bf16.msra.mxu1 %v8171_v22 }
 0x4a4   : > { %4873 = vmatprep.subr.bf16.mxu1 %v8172_v34 }
 0x4a6   : > { %4826 = vmatmul.mubr.bf16.gmra.mrb[136].mxu1 %v8175_v28 }
 0x4a7   : > { %4829 = vmatprep.mubr.bf16.mxu1 %v8178_v46  ;;  %4874 = vmatpush3.bf16.msra.mxu1 %v8172_v34 }
 0x4a8   : > { %4875 = vmatprep.subr.bf16.mxu1 %v8179_v29 }
 0x4ab   : > { %4876 = vmatpush3.bf16.msra.mxu1 %v8179_v29 }
 0x4ac   : > { %4877 = vmatprep.subr.bf16.mxu1 %v8180_v30 }
 0x4ae   : > { %4830 = vmatmul.mubr.bf16.gmra.mrb[140].mxu1 %v8183_v50 }
 0x4af   : > { %4878 = vmatpush3.bf16.msra.mxu1 %v8180_v30 }
 0x4b0   : > { %4879 = vmatprep.subr.bf16.mxu1 %v8184_v1 }
 0x4b3   : > { %4880 = vmatpush3.bf16.msra.mxu1 %v8184_v1 }
 0x504   : > { %v7231_v26 = vpop.f32.mrb[96].mxu1 }
 0x505   : > { %8185 = vst [vmem:[#allocation28_spill] sm:$0xff] %v7231_v26  ;;  %v7233_v47 = vpop.f32.mrb[97].mxu1 }
 0x506   : > { %8186 = vst [vmem:[#allocation40_spill] sm:$0xff] %v7233_v47  ;;  %v7235_v22 = vpop.f32.mrb[98].mxu1 }
 0x507   : > { %8187 = vst [vmem:[#allocation43_spill] sm:$0xff] %v7235_v22  ;;  %v7237_v34 = vpop.f32.mrb[99].mxu1 }
 0x508   : > { %8188 = vst [vmem:[#allocation46_spill] sm:$0xff] %v7237_v34 }
 0x50e   : > { %v7239_v18 = vpop.f32.mrb[100].mxu1 }
 0x50f   : > { %8189 = vst [vmem:[#allocation49_spill] sm:$0xff] %v7239_v18  ;;  %v7241_v23 = vpop.f32.mrb[101].mxu1 }
 0x510   : > { %8190 = vst [vmem:[#allocation51_spill] sm:$0xff] %v7241_v23  ;;  %v7243_v28 = vpop.f32.mrb[102].mxu1 }
 0x511   : > { %8191 = vst [vmem:[#allocation50_spill] sm:$0xff] %v7243_v28  ;;  %v7245_v14 = vpop.f32.mrb[103].mxu1 }
 0x512   : > { %8192 = vst [vmem:[#allocation25_spill] sm:$0xff] %v7245_v14 }
 0x516   : > { %v7247_v33 = vpop.f32.mrb[104].mxu1 }
 0x517   : > { %8193 = vst [vmem:[#allocation52_spill] sm:$0xff] %v7247_v33  ;;  %v7249_v46 = vpop.f32.mrb[105].mxu1 }
 0x518   : > { %8194 = vst [vmem:[#allocation68_spill] sm:$0xff] %v7249_v46  ;;  %v7251_v29 = vpop.f32.mrb[106].mxu1 }
 0x519   : > { %8195 = vst [vmem:[#allocation38_spill] sm:$0xff] %v7251_v29  ;;  %v7253_v30 = vpop.f32.mrb[107].mxu1 }
 0x51a   : > { %8196 = vst [vmem:[#allocation27_spill] sm:$0xff] %v7253_v30 }
 0x51e   : > { %v7255_v42 = vpop.f32.mrb[108].mxu1 }
 0x51f   : > { %8197 = vst [vmem:[#allocation39_spill] sm:$0xff] %v7255_v42  ;;  %v7257_v35 = vpop.f32.mrb[109].mxu1 }
 0x520   : > { %8198 = vst [vmem:[#allocation55_spill] sm:$0xff] %v7257_v35  ;;  %v7259_v50 = vpop.f32.mrb[110].mxu1 }
 0x521   : > { %8199 = vst [vmem:[#allocation24_spill] sm:$0xff] %v7259_v50  ;;  %v7261_v1 = vpop.f32.mrb[111].mxu1 }
 0x522   : > { %8200 = vst [vmem:[#allocation58_spill] sm:$0xff] %v7261_v1 }
 0x526   : > { %v7263_v18 = vpop.f32.mrb[112].mxu1 }
 0x527   : > { %8201 = vst [vmem:[#allocation61_spill] sm:$0xff] %v7263_v18  ;;  %v7265_v28 = vpop.f32.mrb[113].mxu1 }
 0x528   : > { %8202 = vst [vmem:[#allocation31_spill] sm:$0xff] %v7265_v28  ;;  %v7267_v14 = vpop.f32.mrb[114].mxu1 }
 0x529   : > { %8203 = vst [vmem:[#allocation54_spill] sm:$0xff] %v7267_v14  ;;  %v7269_v33 = vpop.f32.mrb[115].mxu1 }
 0x52a   : > { %8204 = vst [vmem:[#allocation53_spill] sm:$0xff] %v7269_v33 }
 0x52e   : > { %v7271_v46 = vpop.f32.mrb[116].mxu1 }
 0x52f   : > { %8205 = vst [vmem:[#allocation57_spill] sm:$0xff] %v7271_v46  ;;  %v7273_v29 = vpop.f32.mrb[117].mxu1 }
 0x530   : > { %8206 = vst [vmem:[#allocation56_spill] sm:$0xff] %v7273_v29  ;;  %v7275_v30 = vpop.f32.mrb[118].mxu1 }
 0x531   : > { %8207 = vst [vmem:[#allocation30_spill] sm:$0xff] %v7275_v30  ;;  %v7277_v42 = vpop.f32.mrb[119].mxu1 }
 0x532   : > { %8208 = vst [vmem:[#allocation33_spill] sm:$0xff] %v7277_v42 }
 0x536   : > { %v7279_v35 = vpop.f32.mrb[120].mxu1 }
 0x537   : > { %8209 = vst [vmem:[#allocation60_spill] sm:$0xff] %v7279_v35  ;;  %v7281_v50 = vpop.f32.mrb[121].mxu1 }
 0x538   : > { %8210 = vst [vmem:[#allocation59_spill] sm:$0xff] %v7281_v50  ;;  %v7283_v1 = vpop.f32.mrb[122].mxu1 }
 0x539   : > { %8211 = vst [vmem:[#allocation63_spill] sm:$0xff] %v7283_v1  ;;  %v7285_v18 = vpop.f32.mrb[123].mxu1 }
 0x53a   : > { %8212 = vst [vmem:[#allocation62_spill] sm:$0xff] %v7285_v18 }
 0x53e   : > { %v7287_v28 = vpop.f32.mrb[124].mxu1 }
 0x53f   : > { %8213 = vst [vmem:[#allocation32_spill] sm:$0xff] %v7287_v28  ;;  %v7289_v14 = vpop.f32.mrb[125].mxu1 }
 0x540   : > { %8214 = vst [vmem:[#allocation35_spill] sm:$0xff] %v7289_v14  ;;  %v7291_v33 = vpop.f32.mrb[126].mxu1 }
 0x541   : > { %8215 = vst [vmem:[#allocation65_spill] sm:$0xff] %v7291_v33  ;;  %v7293_v46 = vpop.f32.mrb[127].mxu1 }
 0x542   : > { %8216 = vst [vmem:[#allocation64_spill] sm:$0xff] %v7293_v46 }
 0x545   : > { %v7295_v29 = vpop.f32.mrb[176].mxu0 }
 0x546   : > { %v7297_v30 = vpop.f32.mrb[177].mxu0 }
 0x547   : > { %v7299_v42 = vpop.f32.mrb[178].mxu0 }
 0x548   : > { %v7301_v35 = vpop.f32.mrb[179].mxu0 }
 0x54d   : > { %v7303_v50 = vpop.f32.mrb[180].mxu0 }
 0x54e   : > { %v7305_v1 = vpop.f32.mrb[181].mxu0 }
 0x54f   : > { %v7307_v18 = vpop.f32.mrb[182].mxu0 }
 0x550   : > { %8217 = vst [vmem:[#allocation67_spill] sm:$0xff] %v7307_v18  ;;  %v7309_v28 = vpop.f32.mrb[183].mxu0  ;;  %v5195_v18 = vld [vmem:[#allocation13 + $0x4] ss:$8 sps:$4 sm:$0xff]  }
 0x551   : > { %3663 = vmatprep.subr.bf16.mxu1 %v5195_v18 }
 0x555   : > { %v7311_v14 = vpop.f32.mrb[184].mxu0 }
 0x556   : > { %8218 = vst [vmem:[#allocation66_spill] sm:$0xff] %v7311_v14  ;;  %v7313_v33 = vpop.f32.mrb[185].mxu0 }
 0x557   : > { %8219 = vst [vmem:[#allocation34_spill] sm:$0xff] %v7313_v33  ;;  %v7315_v46 = vpop.f32.mrb[186].mxu0 }
 0x558   : > { %8220 = vst [vmem:[#allocation37_spill] sm:$0xff] %v7315_v46  ;;  %v7317_v23 = vpop.f32.mrb[187].mxu0 }
 0x559   : > { %8221 = vst [vmem:[#allocation70_spill] sm:$0xff] %v7317_v23 }
 0x55d   : > { %v7319_v22 = vpop.f32.mrb[188].mxu0 }
 0x55e   : > { %8222 = vst [vmem:[#allocation69_spill] sm:$0xff] %v7319_v22  ;;  %v7321_v26 = vpop.f32.mrb[189].mxu0 }
 0x55f   : > { %8223 = vst [vmem:[#allocation36_spill] sm:$0xff] %v7321_v26  ;;  %v7323_v34 = vpop.f32.mrb[190].mxu0 }
 0x560   : > { %8224 = vst [vmem:[#allocation71_spill] sm:$0xff] %v7323_v34  ;;  %v7325_v47 = vpop.f32.mrb[191].mxu0 }
 0x561   : > { %8225 = vst [vmem:[#allocation72_spill] sm:$0xff] %v7325_v47 }
 0x569   : > { %v7327_v62 = vpop.f32.mrb[128].mxu1 }
 0x56a   : > { %v7329_v5 = vpop.f32.mrb[129].mxu1 }
 0x56b   : > { %2825 = vmax.xlane.f32.xlu0 %v7329_v5  ;;  %v7332_v0 = vpop.f32.mrb[130].mxu1 }
 0x56c   : > { %v7334_v36 = vpop.f32.mrb[131].mxu1 }
 0x56d   : > { %2827 = vmax.xlane.f32.xlu1 %v7334_v36 }
 0x56f   : > { %2829 = vmax.xlane.f32.xlu0 %v7327_v62 }
 0x571   : > { %2831 = vmax.xlane.f32.xlu1 %v7332_v0  ;;  %v7339_v22 = vpop.f32.mrb[132].mxu1 }
 0x572   : > { %v7341_v34 = vpop.f32.mrb[133].mxu1 }
 0x573   : > { %2833 = vmax.xlane.f32.xlu0 %v7341_v34  ;;  %v7344_v47 = vpop.f32.mrb[134].mxu1 }
 0x574   : > { %v7346_v26 = vpop.f32.mrb[135].mxu1 }
 0x575   : > { %2835 = vmax.xlane.f32.xlu1 %v7346_v26 }
 0x577   : > { %2837 = vmax.xlane.f32.xlu0 %v7339_v22 }
 0x579   : > { %2839 = vmax.xlane.f32.xlu1 %v7344_v47  ;;  %v7351_v46 = vpop.f32.mrb[136].mxu1 }
 0x57a   : > { %v7353_v14 = vpop.f32.mrb[137].mxu1 }
 0x57b   : > { %2841 = vmax.xlane.f32.xlu0 %v7353_v14  ;;  %v7356_v8 = vpop.f32.mrb[138].mxu1 }
 0x57c   : > { %v7358_v39 = vpop.f32.mrb[139].mxu1 }
 0x57d   : > { %2843 = vmax.xlane.f32.xlu1 %v7358_v39 }
 0x57f   : > { %2845 = vmax.xlane.f32.xlu0 %v7351_v46 }
 0x581   : > { %2847 = vmax.xlane.f32.xlu1 %v7356_v8  ;;  %v7363_v23 = vpop.f32.mrb[140].mxu1 }
 0x582   : > { %v7365_v33 = vpop.f32.mrb[141].mxu1 }
 0x583   : > { %2849 = vmax.xlane.f32.xlu0 %v7365_v33  ;;  %v7368_v21 = vpop.f32.mrb[142].mxu1 }
 0x584   : > { %v7370_v57 = vpop.f32.mrb[143].mxu1 }
 0x585   : > { %2851 = vmax.xlane.f32.xlu1 %v7370_v57 }
 0x587   : > { %2853 = vmax.xlane.f32.xlu0 %v7363_v23 }
 0x589   : > { %2855 = vmax.xlane.f32.xlu1 %v7368_v21 }
 0x58b   : > { %2953 = vadd.xlane.f32.xlu0 %v7126_v19  ;;  %v5217_v19 = vld [vmem:[#allocation10] sm:$0xff]  }
 0x58c   : > { %4897 = vmatprep.subr.bf16.mxu0 %v5217_v19 }
 0x58d   : > { %2955 = vadd.xlane.f32.xlu1 %v7128_v60  ;;  %4898 = vmatpush3.bf16.msra.mxu0 %v5217_v19  ;;  %v5218_v60 = vld [vmem:[#allocation10 + $0x8] sm:$0xff]  }
 0x58e   : > { %4899 = vmatprep.subr.bf16.mxu0 %v5218_v60 }
 0x58f   : > { %2957 = vadd.xlane.f32.xlu0 %v7137_v7  ;;  %v5219_v7 = vld [vmem:[#allocation10 + $0x10] sm:$0xff]  }
 0x591   : > { %2959 = vadd.xlane.f32.xlu1 %v7139_v56  ;;  %4900 = vmatpush3.bf16.msra.mxu0 %v5218_v60 }
 0x592   : > { %4901 = vmatprep.subr.bf16.mxu0 %v5219_v7 }
 0x593   : > { %2961 = vadd.xlane.f32.xlu0 %v7147_v32 }
 0x595   : > { %2963 = vadd.xlane.f32.xlu1 %v7149_v37  ;;  %4902 = vmatpush3.bf16.msra.mxu0 %v5219_v7 }
 0x597   : > { %2965 = vadd.xlane.f32.xlu0 %v7155_v43 }
 0x599   : > { %2967 = vadd.xlane.f32.xlu1 %v7157_v16 }
 0x59b   : > { %2969 = vadd.xlane.f32.xlu0 %v7165_v4 }
 0x59d   : > { %2971 = vadd.xlane.f32.xlu1 %v7167_v11 }
 0x59f   : > { %2973 = vadd.xlane.f32.xlu0 %v7171_v59 }
 0x5a1   : > { %2975 = vadd.xlane.f32.xlu1 %v7173_v25 }
 0x5a3   : > { %2977 = vadd.xlane.f32.xlu0 %v7179_v20 }
 0x5a5   : > { %2979 = vadd.xlane.f32.xlu1 %v7181_v24 }
 0x5a7   : > { %2981 = vadd.xlane.f32.xlu0 %v7185_v55 }
 0x5a9   : > { %2983 = vadd.xlane.f32.xlu1 %v7187_v3 }
 0x5ab   : > { %2261 = vadd.xlane.f32.xlu0 %v6976_v40  ;;  %v5220_v40 = vld [vmem:[#allocation10 + $0x18] sm:$0xff]  }
 0x5ac   : > { %4903 = vmatprep.subr.bf16.mxu0 %v5220_v40 }
 0x5ad   : > { %2263 = vadd.xlane.f32.xlu1 %v6981_v15  ;;  %4904 = vmatpush3.bf16.msra.mxu0 %v5220_v40  ;;  %v5222_v15 = vld [vmem:[#allocation10 + $0x28] sm:$0xff]  }
 0x5af   : > { %2265 = vadd.xlane.f32.xlu0 %v6984_v31  ;;  %v5223_v31 = vld [vmem:[#allocation10 + $0x30] sm:$0xff]  }
 0x5b1   : > { %2267 = vadd.xlane.f32.xlu1 %v6979_v49  ;;  %v5221_v49 = vld [vmem:[#allocation10 + $0x20] sm:$0xff]  }
 0x5b2   : > { %4905 = vmatprep.subr.bf16.mxu0 %v5221_v49 }
 0x5b3   : > { %2269 = vadd.xlane.f32.xlu0 %v6992_v41  ;;  %4906 = vmatpush3.bf16.msra.mxu0 %v5221_v49  ;;  %v5224_v41 = vld [vmem:[#allocation10 + $0x38] sm:$0xff]   ;;  %v5193_v49 = vld [vmem:[#allocation13] ss:$8 sps:$4 sm:$0xff]  }
 0x5b4   : > { %4907 = vmatprep.subr.bf16.mxu0 %v5222_v15 }
 0x5b5   : > { %2271 = vadd.xlane.f32.xlu1 %v6995_v13 }
 0x5b7   : > { %2273 = vadd.xlane.f32.xlu0 %v7002_v44  ;;  %4908 = vmatpush3.bf16.msra.mxu0 %v5222_v15 }
 0x5b8   : > { %4909 = vmatprep.subr.bf16.mxu0 %v5223_v31 }
 0x5b9   : > { %2275 = vadd.xlane.f32.xlu1 %v7005_v51 }
 0x5bb   : > { %2277 = vadd.xlane.f32.xlu0 %v7012_v27  ;;  %4910 = vmatpush3.bf16.msra.mxu0 %v5223_v31  ;;  %v5198_v31 = vld [vmem:[#allocation13 + $0x14] ss:$8 sps:$4 sm:$0xff]  }
 0x5bc   : > { %4911 = vmatprep.subr.bf16.mxu0 %v5224_v41 }
 0x5bd   : > { %2279 = vadd.xlane.f32.xlu1 %v7015_v9 }
 0x5bf   : > { %2281 = vadd.xlane.f32.xlu0 %v7022_v10  ;;  %4912 = vmatpush3.bf16.msra.mxu0 %v5224_v41 }
 0x5c1   : > { %2283 = vadd.xlane.f32.xlu1 %v7025_v53 }
 0x5c3   : > { %2285 = vadd.xlane.f32.xlu0 %v7032_v58 }
 0x5c5   : > { %2287 = vadd.xlane.f32.xlu1 %v7035_v63 }
 0x5c7   : > { %2289 = vadd.xlane.f32.xlu0 %v7042_v48 }
 0x5c9   : > { %2291 = vadd.xlane.f32.xlu1 %v7045_v12 }
 0x5f8   : > { %v2826_v13 = vpop.xlane.xlu0 %2825 }
 0x5f9   : > { %v2873_v44 = vsub.f32 %v7329_v5, %v2826_v13 }
 0x5fa   : > { %v2828_v51 = vpop.xlane.xlu1 %2827 }
 0x5fb   : > { %v2921_v27 = vmul.f32 1.442695, %v2873_v44  ;;  %v2874_v9 = vsub.f32 %v7334_v36, %v2828_v51 }
 0x5fc   : > { %v2830_v10 = vpop.xlane.xlu0 %2829 }
 0x5fd   : > { %v2923_v53 = vmul.f32 1.442695, %v2874_v9  ;;  %v2875_v58 = vsub.f32 %v7327_v62, %v2830_v10  ;;  %5321 = vpow2.f32 %v2921_v27  ;;  %v5196_v9 = vld [vmem:[#allocation13 + $0x10] ss:$8 sps:$4 sm:$0xff]  }
 0x5fe   : > { %v2832_v63 = vpop.xlane.xlu1 %2831 }
 0x5ff   : > { %5323 = vpow2.f32 %v2923_v53  ;;  %v2925_v48 = vmul.f32 1.442695, %v2875_v58  ;;  %v2876_v12 = vsub.f32 %v7332_v0, %v2832_v63 }
 0x600   : > { %v2834_v56 = vpop.xlane.xlu0 %2833 }
 0x601   : > { %5325 = vpow2.f32 %v2925_v48  ;;  %v2927_v32 = vmul.f32 1.442695, %v2876_v12  ;;  %v2877_v37 = vsub.f32 %v7341_v34, %v2834_v56 }
 0x602   : > { %v2836_v5 = vpop.xlane.xlu1 %2835 }
 0x603   : > { %5327 = vpow2.f32 %v2927_v32  ;;  %v2929_v43 = vmul.f32 1.442695, %v2877_v37  ;;  %v2878_v36 = vsub.f32 %v7346_v26, %v2836_v5  ;;  %v5199_v37 = vld [vmem:[#allocation13 + $0x20] ss:$8 sps:$4 sm:$0xff]  }
 0x604   : > { %v2838_v16 = vpop.xlane.xlu0 %2837 }
 0x605   : > { %v2931_v4 = vmul.f32 1.442695, %v2878_v36  ;;  %v2879_v62 = vsub.f32 %v7339_v22, %v2838_v16  ;;  %5329 = vpow2.f32 %v2929_v43  ;;  %v5204_v36 = vld [vmem:[#allocation13 + $0x34] ss:$8 sps:$4 sm:$0xff]  }
 0x606   : > { %v2840_v11 = vpop.xlane.xlu1 %2839 }
 0x607   : > { %5331 = vpow2.f32 %v2931_v4  ;;  %v2933_v59 = vmul.f32 1.442695, %v2879_v62  ;;  %v2880_v0 = vsub.f32 %v7344_v47, %v2840_v11  ;;  %v5322_v25 = vpop.eup %5321 }
 0x608   : > { %v2842_v20 = vpop.xlane.xlu0 %2841 }
 0x609   : > { %v5324_v24 = vpop.eup %5323  ;;  %v2935_v55 = vmul.f32 1.442695, %v2880_v0  ;;  %v2881_v3 = vsub.f32 %v7353_v14, %v2842_v20  ;;  %5333 = vpow2.f32 %v2933_v59  ;;  %v5205_v20 = vld [vmem:[#allocation13 + $0x40] ss:$8 sps:$4 sm:$0xff]  }
 0x60a   : > { %v2844_v34 = vpop.xlane.xlu1 %2843  ;;  %v3025_v18 = vpack.c.bf16 %v5324_v24, %v5322_v25 }
 0x60b   : > { %v5326_v26 = vpop.eup %5325  ;;  %5335 = vpow2.f32 %v2935_v55  ;;  %v2937_v19 = vmul.f32 1.442695, %v2881_v3  ;;  %v2882_v22 = vsub.f32 %v7358_v39, %v2844_v34  ;;  %v5210_v55 = vld [vmem:[#allocation13 + $0x54] ss:$8 sps:$4 sm:$0xff]  }
 0x60c   : > { %4881 = vmatprep.mubr.bf16.mxu1 %v3025_v18  ;;  %v2846_v60 = vpop.xlane.xlu0 %2845  ;;  %2989 = vadd.xlane.f32.xlu0 %v5326_v26 }
 0x60d   : > { %v5328_v7 = vpop.eup %5327  ;;  %v2939_v40 = vmul.f32 1.442695, %v2882_v22  ;;  %v2883_v47 = vsub.f32 %v7351_v46, %v2846_v60  ;;  %5337 = vpow2.f32 %v2937_v19  ;;  %v5213_v60 = vld [vmem:[#allocation13 + $0x64] ss:$8 sps:$4 sm:$0xff]  }
 0x60e   : > { %v2848_v15 = vpop.xlane.xlu1 %2847  ;;  %2991 = vadd.xlane.f32.xlu1 %v5328_v7  ;;  %v3026_v14 = vpack.c.bf16 %v5328_v7, %v5326_v26  ;;  %v5208_v26 = vld [vmem:[#allocation13 + $0x50] ss:$8 sps:$4 sm:$0xff]  }
 0x60f   : > { %5339 = vpow2.f32 %v2939_v40  ;;  %v2941_v41 = vmul.f32 1.442695, %v2883_v47  ;;  %v2884_v13 = vsub.f32 %v7356_v8, %v2848_v15  ;;  %v7419_v44 = vpop.eup %5329  ;;  %v5201_v8 = vld [vmem:[#allocation13 + $0x24] ss:$8 sps:$4 sm:$0xff]   ;;  %v5211_v15 = vld [vmem:[#allocation13 + $0x60] ss:$8 sps:$4 sm:$0xff]  }
 0x610   : > { %4882 = vmatmul.mubr.bf16.vlgmr.msra.gmra.mrb[144].mxu1 %v3026_v14  ;;  %2985 = vadd.xlane.f32.xlu0 %v5322_v25  ;;  %v2850_v39 = vpop.xlane.xlu0 %2849 }
 0x611   : > { %v7421_v51 = vpop.eup %5331  ;;  %v2943_v27 = vmul.f32 1.442695, %v2884_v13  ;;  %v2885_v46 = vsub.f32 %v7365_v33, %v2850_v39  ;;  %3664 = vmatpush1.bf16.msra.mxu1 %v5193_v49  ;;  %5341 = vpow2.f32 %v2941_v41  ;;  %v5216_v13 = vld [vmem:[#allocation13 + $0x74] ss:$8 sps:$4 sm:$0xff]  }
 0x612   : > { %2987 = vadd.xlane.f32.xlu1 %v5324_v24  ;;  %v2852_v10 = vpop.xlane.xlu1 %2851  ;;  %v3027_v53 = vpack.c.bf16 %v7421_v51, %v7419_v44  ;;  %3665 = vmatprep.subr.bf16.mxu1 %v5198_v31 }
 0x613   : > { %5343 = vpow2.f32 %v2943_v27  ;;  %v2945_v58 = vmul.f32 1.442695, %v2885_v46  ;;  %v2886_v63 = vsub.f32 %v7370_v57, %v2852_v10  ;;  %v5334_v48 = vpop.eup %5333  ;;  %v8226_v46 = vmov 0  }
 0x614   : > { %4885 = vmatprep.mubr.bf16.mxu1 %v3027_v53  ;;  %2293 = vadd.xlane.f32.xlu0 %v7052_v6  ;;  %v2854_v12 = vpop.xlane.xlu0 %2853 }
 0x615   : > { %v5336_v33 = vpop.eup %5335  ;;  %v2947_v56 = vmul.f32 1.442695, %v2886_v63  ;;  %v2887_v32 = vsub.f32 %v7363_v23, %v2854_v12  ;;  %3666 = vmatpush1.bf16.msra.mxu1 %v5196_v9  ;;  %5345 = vpow2.f32 %v2945_v58 }
 0x616   : > { %2295 = vadd.xlane.f32.xlu1 %v7055_v54  ;;  %v2856_v5 = vpop.xlane.xlu1 %2855  ;;  %v3028_v43 = vpack.c.bf16 %v5336_v33, %v5334_v48  ;;  %3667 = vmatprep.subr.bf16.mxu1 %v5201_v8  ;;  %v5202_v54 = vld [vmem:[#allocation13 + $0x30] ss:$8 sps:$4 sm:$0xff]  }
 0x617   : > { %5347 = vpow2.f32 %v2947_v56  ;;  %v2949_v57 = vmul.f32 1.442695, %v2887_v32  ;;  %v2888_v16 = vsub.f32 %v7368_v21, %v2856_v5  ;;  %v7431_v4 = vpop.eup %5337  ;;  %v5207_v21 = vld [vmem:[#allocation13 + $0x44] ss:$8 sps:$4 sm:$0xff]   ;;  %v8228_v5 = vld [vmem:[#allocation42_spill] sm:$0xff] }
 0x618   : > { %4886 = vmatmul.mubr.bf16.gmra.mrb[148].mxu1 %v3028_v43  ;;  %2297 = vadd.xlane.f32.xlu0 %v7062_v17  ;;  %v2954_v6 = vpop.xlane.xlu0 %2953 }
 0x619   : > { %v7434_v23 = vpop.eup %5339  ;;  %5349 = vpow2.f32 %v2949_v57  ;;  %v2951_v62 = vmul.f32 1.442695, %v2888_v16  ;;  %3668 = vmatpush1.bf16.msra.mxu1 %v5199_v37  ;;  %v8229_v16 = vld [vmem:[#allocation41_spill] sm:$0xff] }
 0x61a   : > { %5351 = vrcp.f32 %v2954_v6  ;;  %2299 = vadd.xlane.f32.xlu1 %v7065_v61  ;;  %v2956_v11 = vpop.xlane.xlu1 %2955  ;;  %v3029_v59 = vpack.c.bf16 %v7434_v23, %v7431_v4  ;;  %3669 = vmatprep.subr.bf16.mxu1 %v5204_v36  ;;  %v8230_v6 = vld [vmem:[#allocation34_spill] sm:$0xff] }
 0x61b   : > { %5353 = vpow2.f32 %v2951_v62  ;;  %v7439_v0 = vpop.eup %5341 }
 0x61c   : > { %5355 = vrcp.f32 %v2956_v11  ;;  %4889 = vmatprep.mubr.bf16.mxu1 %v3029_v59  ;;  %2997 = vadd.xlane.f32.xlu0 %v5334_v48  ;;  %v2958_v17 = vpop.xlane.xlu0 %2957  ;;  %v8232_v11 = vld [vmem:[#allocation45_spill] sm:$0xff] }
 0x61d   : > { %v7441_v25 = vpop.eup %5343  ;;  %5357 = vrcp.f32 %v2958_v17  ;;  %3670 = vmatpush1.bf16.msra.mxu1 %v5202_v54  ;;  %v8233_v17 = vld [vmem:[#allocation44_spill] sm:$0xff] }
 0x61e   : > { %2999 = vadd.xlane.f32.xlu1 %v5336_v33  ;;  %v2960_v61 = vpop.xlane.xlu1 %2959  ;;  %v3030_v24 = vpack.c.bf16 %v7441_v25, %v7439_v0  ;;  %3671 = vmatprep.subr.bf16.mxu1 %v5207_v21 }
 0x61f   : > { %5359 = vrcp.f32 %v2960_v61  ;;  %v7445_v3 = vpop.eup %5345 }
 0x620   : > { %4890 = vmatmul.mubr.bf16.gmra.mrb[152].mxu1 %v3030_v24  ;;  %2993 = vadd.xlane.f32.xlu0 %v7419_v44  ;;  %v2962_v34 = vpop.xlane.xlu0 %2961  ;;  %v8235_v24 = vld [vmem:[#allocation37_spill] sm:$0xff] }
 0x621   : > { %v7448_v18 = vpop.eup %5347  ;;  %5361 = vrcp.f32 %v2962_v34  ;;  %3672 = vmatpush1.bf16.msra.mxu1 %v5205_v20  ;;  %v8234_v20 = vld [vmem:[#allocation66_spill] sm:$0xff] }
 0x622   : > { %2995 = vadd.xlane.f32.xlu1 %v7421_v51  ;;  %v2964_v19 = vpop.xlane.xlu1 %2963  ;;  %3673 = vmatprep.subr.bf16.mxu1 %v5210_v55  ;;  %v3031_v22 = vpack.c.bf16 %v7448_v18, %v7445_v3 }
 0x623   : > { %v7453_v7 = vpop.eup %5349  ;;  %5363 = vrcp.f32 %v2964_v19 }
 0x624   : > { %v5352_v40 = vpop.eup %5351  ;;  %2301 = vadd.xlane.f32.xlu0 %v7072_v38  ;;  %v2966_v47 = vpop.xlane.xlu0 %2965  ;;  %4893 = vmatprep.mubr.bf16.mxu1 %v3031_v22 }
 0x625   : > { %v7456_v49 = vpop.eup %5353  ;;  %5365 = vrcp.f32 %v2966_v47  ;;  %3674 = vmatpush1.bf16.msra.mxu1 %v5208_v26  ;;  %v3259_v39 = vmul.f32 %v5352_v40, %v7297_v30  ;;  %v8236_v26 = vld [vmem:[#allocation26_spill] sm:$0xff]  ;;  %v8237_v40 = vld [vmem:[#allocation29_spill] sm:$0xff] }
 0x626   : > { %v5356_v14 = vpop.eup %5355  ;;  %2303 = vadd.xlane.f32.xlu1 %v7074_v52  ;;  %v2968_v31 = vpop.xlane.xlu1 %2967  ;;  %3675 = vmatprep.subr.bf16.mxu1 %v5213_v60  ;;  %v3032_v41 = vpack.c.bf16 %v7456_v49, %v7453_v7  ;;  %v5214_v52 = vld [vmem:[#allocation13 + $0x70] ss:$8 sps:$4 sm:$0xff]  }
 0x627   : > { %v5358_v44 = vpop.eup %5357  ;;  %v3260_v38 = vmul.f32 %v5356_v14, %v7301_v35  ;;  %5367 = vrcp.f32 %v2968_v31  ;;  %v8239_v31 = vld [vmem:[#allocation72_spill] sm:$0xff] }
 0x628   : > { %2305 = vadd.xlane.f32.xlu0 %v7080_v2  ;;  %v2970_v51 = vpop.xlane.xlu0 %2969  ;;  %4894 = vmatmul.mubr.bf16.gmra.mrb[156].mxu1 %v3032_v41  ;;  %v3261_v30 = vmul.f32 %v5358_v44, %v7295_v29 }
 0x629   : > { %v5360_v27 = vpop.eup %5359  ;;  %5369 = vrcp.f32 %v2970_v51  ;;  %3676 = vmatpush1.bf16.msra.mxu1 %v5211_v15  ;;  %3695 = vmatprep.mubr.bf16.mxu1 %v8226_v46  ;;  %v3539_v9 = vpack.c.bf16 %v3260_v38, %v3259_v39  ;;  %v8238_v15 = vld [vmem:[#allocation36_spill] sm:$0xff] }
 0x62a   : > { %2307 = vadd.xlane.f32.xlu1 %v7082_v45  ;;  %v2972_v10 = vpop.xlane.xlu1 %2971  ;;  %3677 = vmatprep.subr.bf16.mxu1 %v5216_v13  ;;  %v3262_v35 = vmul.f32 %v5360_v27, %v7299_v42  ;;  %v8240_v27 = vld [vmem:[#allocation69_spill] sm:$0xff] }
 0x62b   : > { %v5362_v53 = vpop.eup %5361  ;;  %5371 = vrcp.f32 %v2972_v10 }
 0x62c   : > { %3005 = vadd.xlane.f32.xlu0 %v7439_v0  ;;  %v2974_v2 = vpop.xlane.xlu0 %2973  ;;  %v3540_v8 = vpack.c.bf16 %v3262_v35, %v3261_v30  ;;  %v3263_v45 = vmul.f32 %v5362_v53, %v7305_v1  ;;  %v8227_v1 = vld [vmem:[#allocation67_spill] sm:$0xff] }
 0x62d   : > { %v5364_v58 = vpop.eup %5363  ;;  %5373 = vrcp.f32 %v2974_v2  ;;  %3678 = vmatpush1.bf16.msra.mxu1 %v5214_v52 }
 0x62e   : > { %3007 = vadd.xlane.f32.xlu1 %v7441_v25  ;;  %v2976_v63 = vpop.xlane.xlu1 %2975  ;;  %v3264_v48 = vmul.f32 %v5364_v58, %v7309_v28  ;;  %v8244_v58 = vld [vmem:[#allocation40_spill] sm:$0xff] }
 0x62f   : > { %v5366_v12 = vpop.eup %5365  ;;  %5375 = vrcp.f32 %v2976_v63 }
 0x630   : > { %3001 = vadd.xlane.f32.xlu0 %v7431_v4  ;;  %v2978_v29 = vpop.xlane.xlu0 %2977  ;;  %3696 = vmatmul.mubr.bf16.vlgmr.msra.gmra.mrb[160].mxu1 %v3539_v9  ;;  %v3541_v42 = vpack.c.bf16 %v3264_v48, %v3263_v45  ;;  %v7476_v32 = vmul.f32 %v5366_v12, %v7303_v50  ;;  %v8231_v50 = vld [vmem:[#allocation70_spill] sm:$0xff]  ;;  %v8241_v9 = vld [vmem:[#allocation71_spill] sm:$0xff] }
 0x631   : > { %v5368_v33 = vpop.eup %5367  ;;  %5377 = vrcp.f32 %v2978_v29  ;;  %3705 = vmatprep.mubr.bf16.mxu1 %v8226_v46  ;;  %v8245_v45 = vld [vmem:[#allocation46_spill] sm:$0xff] }
 0x632   : > { %3003 = vadd.xlane.f32.xlu1 %v7434_v23  ;;  %v2980_v56 = vpop.xlane.xlu1 %2979  ;;  %v7479_v37 = vmul.f32 %v5368_v33, %v8227_v1  ;;  %v8247_v1 = vld [vmem:[#allocation43_spill] sm:$0xff] }
 0x633   : > { %v5370_v28 = vpop.eup %5369  ;;  %5379 = vrcp.f32 %v2980_v56  ;;  %v8246_v56 = vld [vmem:[#allocation28_spill] sm:$0xff] }
 0x634   : > { %2309 = vadd.xlane.f32.xlu0 %v8228_v5  ;;  %v2982_v43 = vpop.xlane.xlu0 %2981  ;;  %v3542_v36 = vpack.c.bf16 %v7479_v37, %v7476_v32  ;;  %v7486_v23 = vmul.f32 %v5370_v28, %v8230_v6  ;;  %v8249_v6 = vld [vmem:[#allocation25_spill] sm:$0xff] }
 0x635   : > { %v5372_v57 = vpop.eup %5371  ;;  %5381 = vrcp.f32 %v2982_v43 }
 0x636   : > { %2311 = vadd.xlane.f32.xlu1 %v8229_v16  ;;  %v2984_v4 = vpop.xlane.xlu1 %2983  ;;  %v7489_v62 = vmul.f32 %v5372_v57, %v8231_v50  ;;  %v8248_v16 = vld [vmem:[#allocation51_spill] sm:$0xff] }
 0x637   : > { %v5374_v54 = vpop.eup %5373  ;;  %5383 = vrcp.f32 %v2984_v4 }
 0x638   : > { %2313 = vadd.xlane.f32.xlu0 %v8232_v11  ;;  %v2262_v59 = vpop.xlane.xlu0 %2261  ;;  %3706 = vmatmul.mubr.bf16.gmra.mrb[164].mxu1 %v3540_v8  ;;  %v3543_v21 = vpack.c.bf16 %v7489_v62, %v7486_v23  ;;  %v7497_v61 = vmul.f32 %v5374_v54, %v8234_v20  ;;  %v8243_v8 = vld [vmem:[#allocation47_spill] sm:$0xff]  ;;  %v8251_v20 = vld [vmem:[#allocation50_spill] sm:$0xff]  ;;  %v8252_v62 = vld [vmem:[#allocation68_spill] sm:$0xff] }
 0x639   : > { %v5376_v0 = vpop.eup %5375  ;;  %5385 = vrcp.f32 %v2262_v59  ;;  %3715 = vmatprep.mubr.bf16.mxu1 %v8226_v46 }
 0x63a   : > { %2315 = vadd.xlane.f32.xlu1 %v8233_v17  ;;  %v2264_v25 = vpop.xlane.xlu1 %2263  ;;  %v7500_v55 = vmul.f32 %v5376_v0, %v8235_v24  ;;  %v8250_v17 = vld [vmem:[#allocation49_spill] sm:$0xff] }
 0x63b   : > { %v5378_v34 = vpop.eup %5377  ;;  %5387 = vrcp.f32 %v2264_v25 }
 0x63c   : > { %2317 = vadd.xlane.f32.xlu0 %v8236_v26  ;;  %v2266_v19 = vpop.xlane.xlu0 %2265  ;;  %v3544_v22 = vpack.c.bf16 %v7500_v55, %v7497_v61  ;;  %v7507_v14 = vmul.f32 %v5378_v34, %v8238_v15 }
 0x63d   : > { %v5380_v60 = vpop.eup %5379  ;;  %5389 = vrcp.f32 %v2266_v19 }
 0x63e   : > { %2319 = vadd.xlane.f32.xlu1 %v8237_v40  ;;  %v2268_v47 = vpop.xlane.xlu1 %2267  ;;  %v7510_v41 = vmul.f32 %v5380_v60, %v8239_v31  ;;  %v8253_v40 = vld [vmem:[#allocation27_spill] sm:$0xff] }
 0x63f   : > { %v5382_v13 = vpop.eup %5381  ;;  %5391 = vrcp.f32 %v2268_v47 }
 0x640   : > { %3009 = vadd.xlane.f32.xlu0 %v7445_v3  ;;  %v2270_v44 = vpop.xlane.xlu0 %2269  ;;  %3716 = vmatmul.mubr.bf16.gmra.mrb[168].mxu1 %v3541_v42  ;;  %v3545_v39 = vpack.c.bf16 %v7510_v41, %v7507_v14  ;;  %v7518_v52 = vmul.f32 %v5382_v13, %v8240_v27  ;;  %v8242_v3 = vld [vmem:[#allocation48_spill] sm:$0xff] }
 0x641   : > { %v5384_v38 = vpop.eup %5383  ;;  %5393 = vrcp.f32 %v2270_v44  ;;  %3725 = vmatprep.mubr.bf16.mxu1 %v8226_v46  ;;  %v8254_v44 = vld [vmem:[#allocation52_spill] sm:$0xff] }
 0x642   : > { %3011 = vadd.xlane.f32.xlu1 %v7448_v18  ;;  %v2272_v51 = vpop.xlane.xlu1 %2271  ;;  %v7521_v10 = vmul.f32 %v5384_v38, %v8241_v9 }
 0x643   : > { %v5386_v30 = vpop.eup %5385  ;;  %5395 = vrcp.f32 %v2272_v51  ;;  %v8255_v51 = vld [vmem:[#allocation38_spill] sm:$0xff] }
 0x644   : > { %2321 = vadd.xlane.f32.xlu0 %v8242_v3  ;;  %v2274_v35 = vpop.xlane.xlu0 %2273  ;;  %v3546_v53 = vpack.c.bf16 %v7521_v10, %v7518_v52  ;;  %v2567_v63 = vmul.f32 %v5386_v30, %v8244_v58 }
 0x645   : > { %v5388_v2 = vpop.eup %5387  ;;  %5397 = vrcp.f32 %v2274_v35  ;;  %v8256_v35 = vld [vmem:[#allocation55_spill] sm:$0xff] }
 0x646   : > { %2323 = vadd.xlane.f32.xlu1 %v8243_v8  ;;  %v2276_v18 = vpop.xlane.xlu1 %2275  ;;  %v2568_v48 = vmul.f32 %v5388_v2, %v8245_v45  ;;  %v8257_v8 = vld [vmem:[#allocation58_spill] sm:$0xff]  ;;  %v8259_v45 = vld [vmem:[#allocation24_spill] sm:$0xff] }
 0x647   : > { %v5390_v12 = vpop.eup %5389  ;;  %5399 = vrcp.f32 %v2276_v18 }
 0x648   : > { %3013 = vadd.xlane.f32.xlu0 %v7453_v7  ;;  %v2278_v29 = vpop.xlane.xlu0 %2277  ;;  %3726 = vmatmul.mubr.bf16.gmra.mrb[172].mxu1 %v3542_v36  ;;  %v3291_v42 = vpack.c.bf16 %v2568_v48, %v2567_v63  ;;  %v2569_v32 = vmul.f32 %v5390_v12, %v8246_v56 }
 0x649   : > { %v5392_v33 = vpop.eup %5391  ;;  %5401 = vrcp.f32 %v2278_v29  ;;  %3735 = vmatprep.mubr.bf16.mxu1 %v8226_v46 }
 0x64a   : > { %v2570_v37 = vmul.f32 %v5392_v33, %v8247_v1  ;;  %3015 = vadd.xlane.f32.xlu1 %v7456_v49  ;;  %4913 = vmatprep.mubr.bf16.mxu0 %v3291_v42  ;;  %v2280_v28 = vpop.xlane.xlu1 %2279 }
 0x64b   : > { %v5394_v5 = vpop.eup %5393  ;;  %5403 = vrcp.f32 %v2280_v28 }
 0x64c   : > { %v2282_v43 = vpop.xlane.xlu0 %2281  ;;  %v3292_v57 = vpack.c.bf16 %v2570_v37, %v2569_v32  ;;  %v2571_v4 = vmul.f32 %v5394_v5, %v8248_v16  ;;  %v8260_v5 = vld [vmem:[#allocation31_spill] sm:$0xff] }
 0x64d   : > { %v5396_v7 = vpop.eup %5395  ;;  %5405 = vrcp.f32 %v2282_v43 }
 0x64e   : > { %4914 = vmatmul.mubr.bf16.vlgmr.msra.gmra.mrb[192].mxu0 %v3292_v57  ;;  %v2284_v36 = vpop.xlane.xlu1 %2283  ;;  %v2572_v50 = vmul.f32 %v5396_v7, %v8249_v6  ;;  %v8261_v57 = vld [vmem:[#allocation53_spill] sm:$0xff] }
 0x64f   : > { %v5398_v54 = vpop.eup %5397  ;;  %5407 = vrcp.f32 %v2284_v36 }
 0x650   : > { %v2286_v11 = vpop.xlane.xlu0 %2285  ;;  %3736 = vmatmul.mubr.bf16.gmra.mrb[176].mxu1 %v3543_v21  ;;  %v3293_v49 = vpack.c.bf16 %v2572_v50, %v2571_v4  ;;  %v2573_v25 = vmul.f32 %v5398_v54, %v8250_v17  ;;  %v8262_v54 = vld [vmem:[#allocation61_spill] sm:$0xff] }
 0x651   : > { %v5400_v59 = vpop.eup %5399  ;;  %5409 = vrcp.f32 %v2286_v11  ;;  %3745 = vmatprep.mubr.bf16.mxu1 %v8226_v46 }
 0x652   : > { %4917 = vmatprep.mubr.bf16.mxu0 %v3293_v49  ;;  %v2288_v0 = vpop.xlane.xlu1 %2287  ;;  %v2574_v24 = vmul.f32 %v5400_v59, %v8251_v20  ;;  %v8263_v49 = vld [vmem:[#allocation54_spill] sm:$0xff] }
 0x653   : > { %v5402_v34 = vpop.eup %5401  ;;  %5411 = vrcp.f32 %v2288_v0 }
 0x654   : > { %v2290_v26 = vpop.xlane.xlu0 %2289  ;;  %v3294_v19 = vpack.c.bf16 %v2574_v24, %v2573_v25  ;;  %v2575_v21 = vmul.f32 %v5402_v34, %v8252_v62 }
 0x655   : > { %v5404_v60 = vpop.eup %5403  ;;  %5413 = vrcp.f32 %v2290_v26 }
 0x656   : > { %4918 = vmatmul.mubr.bf16.gmra.mrb[196].mxu0 %v3294_v19  ;;  %v2292_v23 = vpop.xlane.xlu1 %2291  ;;  %v2576_v47 = vmul.f32 %v5404_v60, %v8253_v40 }
 0x657   : > { %v5406_v15 = vpop.eup %5405  ;;  %5415 = vrcp.f32 %v2292_v23  ;;  %v8264_v23 = vld [vmem:[#allocation56_spill] sm:$0xff] }
 0x658   : > { %3746 = vmatmul.mubr.bf16.gmra.mrb[180].mxu1 %v3544_v22  ;;  %v3295_v31 = vpack.c.bf16 %v2576_v47, %v2575_v21  ;;  %v2577_v38 = vmul.f32 %v5406_v15, %v8254_v44  ;;  %v8258_v22 = vld [vmem:[#allocation39_spill] sm:$0xff]  ;;  %v8265_v21 = vld [vmem:[#allocation33_spill] sm:$0xff] }
 0x659   : > { %v5408_v13 = vpop.eup %5407  ;;  %3755 = vmatprep.mubr.bf16.mxu1 %v8226_v46 }
 0x65a   : > { %4921 = vmatprep.mubr.bf16.mxu0 %v3295_v31  ;;  %v2578_v27 = vmul.f32 %v5408_v13, %v8255_v51 }
 0x65b   : > { %v5410_v9 = vpop.eup %5409 }
 0x65c   : > { %v3296_v30 = vpack.c.bf16 %v2578_v27, %v2577_v38  ;;  %v2579_v2 = vmul.f32 %v5410_v9, %v8256_v35  ;;  %v8266_v38 = vld [vmem:[#allocation57_spill] sm:$0xff]  ;;  %v8267_v27 = vld [vmem:[#allocation30_spill] sm:$0xff] }
 0x65d   : > { %v5412_v3 = vpop.eup %5411 }
 0x65e   : > { %4922 = vmatmul.mubr.bf16.gmra.mrb[200].mxu0 %v3296_v30  ;;  %v2580_v18 = vmul.f32 %v5412_v3, %v8257_v8 }
 0x65f   : > { %v5414_v58 = vpop.eup %5413 }
 0x660   : > { %3756 = vmatmul.mubr.bf16.gmra.mrb[184].mxu1 %v3545_v39  ;;  %v3297_v61 = vpack.c.bf16 %v2580_v18, %v2579_v2  ;;  %v2581_v63 = vmul.f32 %v5414_v58, %v8258_v22  ;;  %v8268_v22 = vld [vmem:[#allocation59_spill] sm:$0xff] }
 0x661   : > { %v5416_v55 = vpop.eup %5415  ;;  %3765 = vmatprep.mubr.bf16.mxu1 %v8226_v46 }
 0x662   : > { %4925 = vmatprep.mubr.bf16.mxu0 %v3297_v61  ;;  %v2582_v48 = vmul.f32 %v5416_v55, %v8259_v45  ;;  %v8269_v45 = vld [vmem:[#allocation62_spill] sm:$0xff] }
 0x664   : > { %v3298_v12 = vpack.c.bf16 %v2582_v48, %v2581_v63 }
 0x666   : > { %4926 = vmatmul.mubr.bf16.gmra.mrb[204].mxu0 %v3298_v12 }
 0x668   : > { %3766 = vmatmul.mubr.bf16.gmra.mrb[188].mxu1 %v3546_v53 }
 0x669   : > { %3775 = vmatprep.mubr.bf16.mxu1 %v8226_v46 }
 0x699   : > { %v7562_v29 = vpop.xlane.xlu0 %2989 }
 0x69b   : > { %v7564_v14 = vpop.xlane.xlu1 %2991 }
 0x69d   : > { %v7566_v41 = vpop.xlane.xlu0 %2985 }
 0x69f   : > { %v7568_v39 = vpop.xlane.xlu1 %2987 }
 0x6a1   : > { %v2294_v42 = vpop.xlane.xlu0 %2293 }
 0x6a2   : > { %5417 = vrcp.f32 %v2294_v42 }
 0x6a3   : > { %v2296_v33 = vpop.xlane.xlu1 %2295 }
 0x6a4   : > { %5419 = vrcp.f32 %v2296_v33 }
 0x6a5   : > { %v2298_v56 = vpop.xlane.xlu0 %2297 }
 0x6a6   : > { %5421 = vrcp.f32 %v2298_v56 }
 0x6a7   : > { %v2300_v32 = vpop.xlane.xlu1 %2299 }
 0x6a8   : > { %5423 = vrcp.f32 %v2300_v32 }
 0x6a9   : > { %v7570_v52 = vpop.xlane.xlu0 %2997 }
 0x6ab   : > { %v7572_v10 = vpop.xlane.xlu1 %2999 }
 0x6ac   : > { %v5418_v53 = vpop.eup %5417 }
 0x6ad   : > { %v7574_v1 = vpop.xlane.xlu0 %2993  ;;  %v2583_v43 = vmul.f32 %v5418_v53, %v8260_v5  ;;  %v8270_v53 = vld [vmem:[#allocation60_spill] sm:$0xff]  ;;  %v8271_v5 = vld [vmem:[#allocation63_spill] sm:$0xff] }
 0x6ae   : > { %v5420_v37 = vpop.eup %5419 }
 0x6af   : > { %v7576_v28 = vpop.xlane.xlu1 %2995  ;;  %v2584_v7 = vmul.f32 %v5420_v37, %v8261_v57 }
 0x6b0   : > { %v5422_v36 = vpop.eup %5421 }
 0x6b1   : > { %v2302_v16 = vpop.xlane.xlu0 %2301  ;;  %v3299_v4 = vpack.c.bf16 %v2584_v7, %v2583_v43  ;;  %v2585_v11 = vmul.f32 %v5422_v36, %v8262_v54 }
 0x6b2   : > { %v5424_v6 = vpop.eup %5423  ;;  %5425 = vrcp.f32 %v2302_v16  ;;  %v8272_v16 = vld [vmem:[#allocation35_spill] sm:$0xff] }
 0x6b3   : > { %4929 = vmatprep.mubr.bf16.mxu0 %v3299_v4  ;;  %v2304_v50 = vpop.xlane.xlu1 %2303  ;;  %v2586_v59 = vmul.f32 %v5424_v6, %v8263_v49  ;;  %v8273_v6 = vld [vmem:[#allocation64_spill] sm:$0xff] }
 0x6b4   : > { %5427 = vrcp.f32 %v2304_v50 }
 0x6b5   : > { %v2306_v0 = vpop.xlane.xlu0 %2305  ;;  %v3300_v17 = vpack.c.bf16 %v2586_v59, %v2585_v11  ;;  %v8274_v59 = vld [vmem:[#allocation32_spill] sm:$0xff] }
 0x6b6   : > { %5429 = vrcp.f32 %v2306_v0 }
 0x6b7   : > { %4930 = vmatmul.mubr.bf16.gmra.mrb[208].mxu0 %v3300_v17  ;;  %v2308_v25 = vpop.xlane.xlu1 %2307  ;;  %v8275_v17 = vld [vmem:[#allocation65_spill] sm:$0xff] }
 0x6b8   : > { %5431 = vrcp.f32 %v2308_v25 }
 0x6b9   : > { %v7582_v20 = vpop.xlane.xlu0 %3005 }
 0x6bb   : > { %v7584_v24 = vpop.xlane.xlu1 %3007 }
 0x6bc   : > { %v5426_v34 = vpop.eup %5425 }
 0x6bd   : > { %v7586_v26 = vpop.xlane.xlu0 %3001  ;;  %v2587_v62 = vmul.f32 %v5426_v34, %v8264_v23 }
 0x6be   : > { %v5428_v19 = vpop.eup %5427 }
 0x6bf   : > { %v7588_v60 = vpop.xlane.xlu1 %3003  ;;  %v2588_v40 = vmul.f32 %v5428_v19, %v8265_v21 }
 0x6c0   : > { %v5430_v47 = vpop.eup %5429 }
 0x6c1   : > { %v2310_v15 = vpop.xlane.xlu0 %2309  ;;  %v3301_v31 = vpack.c.bf16 %v2588_v40, %v2587_v62  ;;  %v2589_v51 = vmul.f32 %v5430_v47, %v8266_v38 }
 0x6c2   : > { %v5432_v13 = vpop.eup %5431  ;;  %5433 = vrcp.f32 %v2310_v15 }
 0x6c3   : > { %4933 = vmatprep.mubr.bf16.mxu0 %v3301_v31  ;;  %v2312_v44 = vpop.xlane.xlu1 %2311  ;;  %v2590_v9 = vmul.f32 %v5432_v13, %v8267_v27 }
 0x6c4   : > { %5435 = vrcp.f32 %v2312_v44 }
 0x6c5   : > { %v2314_v30 = vpop.xlane.xlu0 %2313  ;;  %v3302_v3 = vpack.c.bf16 %v2590_v9, %v2589_v51 }
 0x6c6   : > { %5437 = vrcp.f32 %v2314_v30 }
 0x6c7   : > { %4934 = vmatmul.mubr.bf16.gmra.mrb[212].mxu0 %v3302_v3  ;;  %v2316_v35 = vpop.xlane.xlu1 %2315 }
 0x6c8   : > { %5439 = vrcp.f32 %v2316_v35 }
 0x6c9   : > { %v2318_v2 = vpop.xlane.xlu0 %2317 }
 0x6ca   : > { %5441 = vrcp.f32 %v2318_v2 }
 0x6cb   : > { %v2320_v8 = vpop.xlane.xlu1 %2319 }
 0x6cc   : > { %v5434_v18 = vpop.eup %5433  ;;  %5443 = vrcp.f32 %v2320_v8 }
 0x6cd   : > { %v7594_v58 = vpop.xlane.xlu0 %3009  ;;  %v2591_v63 = vmul.f32 %v5434_v18, %v8268_v22 }
 0x6ce   : > { %v5436_v61 = vpop.eup %5435 }
 0x6cf   : > { %v7596_v55 = vpop.xlane.xlu1 %3011  ;;  %v2592_v48 = vmul.f32 %v5436_v61, %v8269_v45  ;;  %v3573_v45 = vlaneseq }
 0x6d0   : > { %v5438_v12 = vpop.eup %5437 }
 0x6d1   : > { %v2322_v42 = vpop.xlane.xlu0 %2321  ;;  %v3303_v33 = vpack.c.bf16 %v2592_v48, %v2591_v63  ;;  %v2593_v37 = vmul.f32 %v5438_v12, %v8270_v53 }
 0x6d2   : > { %v5440_v56 = vpop.eup %5439  ;;  %5445 = vrcp.f32 %v2322_v42 }
 0x6d3   : > { %4937 = vmatprep.mubr.bf16.mxu0 %v3303_v33  ;;  %v2324_v32 = vpop.xlane.xlu1 %2323  ;;  %v2594_v43 = vmul.f32 %v5440_v56, %v8271_v5 }
 0x6d4   : > { %v5442_v57 = vpop.eup %5441  ;;  %5447 = vrcp.f32 %v2324_v32 }
 0x6d5   : > { %v3304_v7 = vpack.c.bf16 %v2594_v43, %v2593_v37  ;;  %v2595_v4 = vmul.f32 %v5442_v57, %v8272_v16  ;;  %5449 = vrcp.f32 %v7562_v29  ;;  %v3014_v3 = vpop.xlane.xlu0 %3013  ;;  %v3574_v37 = vshrl.u32 %v3573_v45, 7 }
 0x6d6   : > { %v5444_v36 = vpop.eup %5443  ;;  %5451 = vrcp.f32 %v7564_v14 }
 0x6d7   : > { %4938 = vmatmul.mubr.bf16.gmra.mrb[216].mxu0 %v3304_v7  ;;  %v2596_v50 = vmul.f32 %v5444_v36, %v8273_v6  ;;  %5453 = vrcp.f32 %v7566_v41  ;;  %v3016_v2 = vpop.xlane.xlu1 %3015  ;;  %v3575_v36 = vsub.s32 0, %v3574_v37  ;;  %v3571_v6 = vld [vmem:[%s7938_s7] sm:$0x3] }
 0x6d8   : > { %5455 = vrcp.f32 %v7568_v39 }
 0x6d9   : > { %v3305_v54 = vpack.c.bf16 %v2596_v50, %v2595_v4  ;;  %5457 = vrcp.f32 %v7570_v52  ;;  %v3579_v50 = vsub.s32 1, %v3574_v37 }
 0x6da   : > { %5459 = vrcp.f32 %v7572_v10 }
 0x6db   : > { %4941 = vmatprep.mubr.bf16.mxu0 %v3305_v54  ;;  %5461 = vrcp.f32 %v7574_v1 }
 0x6dc   : > { %v5446_v11 = vpop.eup %5445  ;;  %5463 = vrcp.f32 %v7576_v28 }
 0x6dd   : > { %v2597_v0 = vmul.f32 %v5446_v11, %v8274_v59  ;;  %5465 = vrcp.f32 %v7582_v20 }
 0x6de   : > { %v5448_v49 = vpop.eup %5447  ;;  %5467 = vrcp.f32 %v7584_v24 }
 0x6df   : > { %v2598_v25 = vmul.f32 %v5448_v49, %v8275_v17  ;;  %v5450_v29 = vpop.eup %5449  ;;  %5469 = vrcp.f32 %v7586_v26 }
 0x6e0   : > { %v5452_v41 = vpop.eup %5451  ;;  %5471 = vrcp.f32 %v7588_v60 }
 0x6e1   : > { %v3306_v34 = vpack.c.bf16 %v2598_v25, %v2597_v0  ;;  %v5454_v23 = vpop.eup %5453  ;;  %5473 = vrcp.f32 %v7594_v58 }
 0x6e2   : > { %v5456_v21 = vpop.eup %5455  ;;  %5475 = vrcp.f32 %v3014_v3 }
 0x6e3   : > { %v4883_v14 = vpop.f32.mrb[144].mxu1  ;;  %4942 = vmatmul.mubr.bf16.gmra.mrb[220].mxu0 %v3306_v34  ;;  %v5458_v1 = vpop.eup %5457  ;;  %5477 = vrcp.f32 %v3016_v2  ;;  %v7635_v34 = vrot.slane %v3571_v6, %v3575_v36 }
 0x6e4   : > { %v3277_v19 = vmul.f32 %v5450_v29, %v4883_v14  ;;  %v3164_v39 = vpop.f32.mrb[145].mxu1  ;;  %v5460_v28 = vpop.eup %5459  ;;  %5479 = vrcp.f32 %v7596_v55  ;;  %v7637_v14 = vrot.slane %v3571_v6, %v3579_v50 }
 0x6e5   : > { %v4884_v62 = vpop.f32.mrb[146].mxu1  ;;  %v3275_v15 = vmul.f32 %v5454_v23, %v3164_v39  ;;  %v5462_v51 = vpop.eup %5461 }
 0x6e6   : > { %v3278_v40 = vmul.f32 %v5452_v41, %v4884_v62  ;;  %v3167_v47 = vpop.f32.mrb[147].mxu1  ;;  %v5464_v9 = vpop.eup %5463 }
 0x6e7   : > { %v3276_v52 = vmul.f32 %v5456_v21, %v3167_v47  ;;  %v5466_v18 = vpop.eup %5465 }
 0x6e8   : > { %v3548_v31 = vpack.c.bf16 %v3278_v40, %v3277_v19  ;;  %v5468_v61 = vpop.eup %5467 }
 0x6e9   : > { %v3547_v10 = vpack.c.bf16 %v3276_v52, %v3275_v15  ;;  %v5470_v48 = vpop.eup %5469 }
 0x6ea   : > { %v5472_v42 = vpop.eup %5471 }
 0x6eb   : > { %v4887_v13 = vpop.f32.mrb[148].mxu1  ;;  %3776 = vmatmul.mubr.bf16.gmra.mrb[192].mxu1 %v3547_v10  ;;  %v5474_v43 = vpop.eup %5473 }
 0x6ec   : > { %v3281_v44 = vmul.f32 %v5458_v1, %v4887_v13  ;;  %v3180_v38 = vpop.f32.mrb[149].mxu1  ;;  %3785 = vmatprep.mubr.bf16.mxu1 %v8226_v46  ;;  %v5476_v55 = vpop.eup %5475 }
 0x6ed   : > { %v4888_v27 = vpop.f32.mrb[150].mxu1  ;;  %v3279_v35 = vmul.f32 %v5462_v51, %v3180_v38  ;;  %v5478_v16 = vpop.eup %5477 }
 0x6ee   : > { %v3282_v30 = vmul.f32 %v5460_v28, %v4888_v27  ;;  %v3183_v20 = vpop.f32.mrb[151].mxu1  ;;  %v5480_v54 = vpop.eup %5479 }
 0x6ef   : > { %v3280_v24 = vmul.f32 %v5464_v9, %v3183_v20 }
 0x6f0   : > { %v3550_v8 = vpack.c.bf16 %v3282_v30, %v3281_v44 }
 0x6f1   : > { %v3549_v26 = vpack.c.bf16 %v3280_v24, %v3279_v35 }
 0x6f3   : > { %v4891_v60 = vpop.f32.mrb[152].mxu1  ;;  %3786 = vmatmul.mubr.bf16.gmra.mrb[196].mxu1 %v3548_v31 }
 0x6f4   : > { %v7621_v22 = vmul.f32 %v5466_v18, %v4891_v60  ;;  %v3196_v63 = vpop.f32.mrb[153].mxu1  ;;  %3795 = vmatprep.mubr.bf16.mxu1 %v8226_v46 }
 0x6f5   : > { %v4892_v12 = vpop.f32.mrb[154].mxu1  ;;  %v3283_v56 = vmul.f32 %v5470_v48, %v3196_v63  ;;  %v7677_v63 = vld [vmem:[#allocation11] ss:$0 sm:$0xff] }
 0x6f6   : > { %v3286_v33 = vmul.f32 %v5468_v61, %v4892_v12  ;;  %v3199_v58 = vpop.f32.mrb[155].mxu1 }
 0x6f7   : > { %v3284_v32 = vmul.f32 %v5472_v42, %v3199_v58 }
 0x6f8   : > { %v3552_v53 = vpack.c.bf16 %v3286_v33, %v7621_v22 }
 0x6f9   : > { %v3551_v5 = vpack.c.bf16 %v3284_v32, %v3283_v56 }
 0x6fb   : > { %v4895_v57 = vpop.f32.mrb[156].mxu1  ;;  %3796 = vmatmul.mubr.bf16.gmra.mrb[200].mxu1 %v3549_v26 }
 0x6fc   : > { %v3212_v7 = vpop.f32.mrb[157].mxu1  ;;  %3805 = vmatprep.mubr.bf16.mxu1 %v8226_v46  ;;  %v7629_v11 = vmul.f32 %v5476_v55, %v4895_v57 }
 0x6fd   : > { %v4896_v4 = vpop.f32.mrb[158].mxu1  ;;  %v3287_v0 = vmul.f32 %v5474_v43, %v3212_v7 }
 0x6fe   : > { %v7631_v49 = vmul.f32 %v5478_v16, %v4896_v4  ;;  %v3215_v59 = vpop.f32.mrb[159].mxu1 }
 0x6ff   : > { %v3288_v17 = vmul.f32 %v5480_v54, %v3215_v59 }
 0x700   : > { %v3554_v25 = vpack.c.bf16 %v7631_v49, %v7629_v11 }
 0x701   : > { %v3553_v29 = vpack.c.bf16 %v3288_v17, %v3287_v0 }
 0x703   : > { %v3697_v41 = vpop.f32.mrb[160].mxu1  ;;  %3806 = vmatmul.mubr.bf16.gmra.mrb[204].mxu1 %v3550_v8 }
 0x704   : > { %v3698_v19 = vadd.f32 %v3697_v41, %v7635_v34  ;;  %v3699_v39 = vpop.f32.mrb[161].mxu1  ;;  %3815 = vmatprep.mubr.bf16.mxu1 %v8226_v46 }
 0x705   : > { %v3700_v23 = vadd.f32 %v3699_v39, %v7637_v14  ;;  %v3701_v62 = vpop.f32.mrb[162].mxu1 }
 0x706   : > { %3888 = vst [vmem:[%s7644_s20] sm:$0xff] %v3698_v19  ;;  %v3702_v21 = vadd.f32 %v3701_v62, %v7635_v34  ;;  %v3703_v40 = vpop.f32.mrb[163].mxu1 }
 0x707   : > { %3889 = vst [vmem:[%s7644_s20 + $0x8] sm:$0xff] %v3700_v23  ;;  %v3704_v47 = vadd.f32 %v3703_v40, %v7637_v14 }
 0x708   : > { %3890 = vst [vmem:[%s7644_s20 + $0x10] sm:$0xff] %v3702_v21 }
 0x709   : > { %3891 = vst [vmem:[%s7644_s20 + $0x18] sm:$0xff] %v3704_v47 }
 0x70b   : > { %v3707_v15 = vpop.f32.mrb[164].mxu1  ;;  %3816 = vmatmul.mubr.bf16.gmra.mrb[208].mxu1 %v3551_v5 }
 0x70c   : > { %v3708_v52 = vadd.f32 %v3707_v15, %v7635_v34  ;;  %v3709_v31 = vpop.f32.mrb[165].mxu1  ;;  %3825 = vmatprep.mubr.bf16.mxu1 %v8226_v46 }
 0x70d   : > { %v3710_v10 = vadd.f32 %v3709_v31, %v7637_v14  ;;  %v3711_v1 = vpop.f32.mrb[166].mxu1 }
 0x70e   : > { %3892 = vst [vmem:[%s7644_s20 + $0x20] sm:$0xff] %v3708_v52  ;;  %v3712_v13 = vadd.f32 %v3711_v1, %v7635_v34  ;;  %v3713_v28 = vpop.f32.mrb[167].mxu1 }
 0x70f   : > { %3893 = vst [vmem:[%s7644_s20 + $0x28] sm:$0xff] %v3710_v10  ;;  %v3714_v44 = vadd.f32 %v3713_v28, %v7637_v14 }
 0x710   : > { %3894 = vst [vmem:[%s7644_s20 + $0x30] sm:$0xff] %v3712_v13 }
 0x711   : > { %3895 = vst [vmem:[%s7644_s20 + $0x38] sm:$0xff] %v3714_v44 }
 0x713   : > { %v3717_v38 = vpop.f32.mrb[168].mxu1  ;;  %3826 = vmatmul.mubr.bf16.gmra.mrb[212].mxu1 %v3552_v53 }
 0x714   : > { %v3718_v51 = vadd.f32 %v3717_v38, %v7635_v34  ;;  %v3719_v27 = vpop.f32.mrb[169].mxu1  ;;  %3835 = vmatprep.mubr.bf16.mxu1 %v8226_v46 }
 0x715   : > { %v3720_v9 = vadd.f32 %v3719_v27, %v7637_v14  ;;  %v3721_v30 = vpop.f32.mrb[170].mxu1 }
 0x716   : > { %3896 = vst [vmem:[%s7644_s20 + $0x40] sm:$0xff] %v3718_v51  ;;  %v3722_v20 = vadd.f32 %v3721_v30, %v7635_v34  ;;  %v3723_v3 = vpop.f32.mrb[171].mxu1 }
 0x717   : > { %3897 = vst [vmem:[%s7644_s20 + $0x48] sm:$0xff] %v3720_v9  ;;  %v3724_v35 = vadd.f32 %v3723_v3, %v7637_v14 }
 0x718   : > { %3898 = vst [vmem:[%s7644_s20 + $0x50] sm:$0xff] %v3722_v20 }
 0x719   : > { %3899 = vst [vmem:[%s7644_s20 + $0x58] sm:$0xff] %v3724_v35 }
 0x71b   : > { %v3727_v24 = vpop.f32.mrb[172].mxu1  ;;  %3836 = vmatmul.mubr.bf16.gmra.mrb[216].mxu1 %v3553_v29 }
 0x71c   : > { %v3728_v2 = vadd.f32 %v3727_v24, %v7635_v34  ;;  %v3729_v8 = vpop.f32.mrb[173].mxu1  ;;  %3845 = vmatprep.mubr.bf16.mxu1 %v8226_v46 }
 0x71d   : > { %v3730_v26 = vadd.f32 %v3729_v8, %v7637_v14  ;;  %v3731_v18 = vpop.f32.mrb[174].mxu1 }
 0x71e   : > { %3900 = vst [vmem:[%s7644_s20 + $0x60] sm:$0xff] %v3728_v2  ;;  %v3732_v60 = vadd.f32 %v3731_v18, %v7635_v34  ;;  %v3733_v61 = vpop.f32.mrb[175].mxu1 }
 0x71f   : > { %3901 = vst [vmem:[%s7644_s20 + $0x68] sm:$0xff] %v3730_v26  ;;  %v3734_v22 = vadd.f32 %v3733_v61, %v7637_v14 }
 0x720   : > { %3902 = vst [vmem:[%s7644_s20 + $0x70] sm:$0xff] %v3732_v60 }
 0x721   : > { %3903 = vst [vmem:[%s7644_s20 + $0x78] sm:$0xff] %v3734_v22  ;;  %v4915_v45 = vpop.f32.mrb[192].mxu0 }
 0x722   : > { %v3421_v48 = vadd.f32 %v4915_v45, %v7677_v63  ;;  %v3412_v12 = vpop.f32.mrb[193].mxu0 }
 0x723   : > { %v3413_v46 = vadd.f32 %v7677_v63, %v3412_v12  ;;  %v4916_v42 = vpop.f32.mrb[194].mxu0  ;;  %v3737_v33 = vpop.f32.mrb[176].mxu1  ;;  %3846 = vmatmul.mubr.bf16.gmra.mrb[220].mxu1 %v3554_v25 }
 0x724   : > { %3858 = vst [vmem:[%s7688_s24 + $0x10] sm:$0xff] %v3421_v48  ;;  %v3424_v58 = vadd.f32 %v4916_v42, %v7677_v63  ;;  %v3738_v56 = vadd.f32 %v3737_v33, %v7635_v34  ;;  %v3415_v32 = vpop.f32.mrb[195].mxu0  ;;  %v3739_v53 = vpop.f32.mrb[177].mxu1 }
 0x725   : > { %3856 = vst [vmem:[%s7688_s24] sm:$0xff] %v3413_v46  ;;  %v3416_v37 = vadd.f32 %v7677_v63, %v3415_v32  ;;  %v3740_v5 = vadd.f32 %v3739_v53, %v7637_v14  ;;  %v3741_v43 = vpop.f32.mrb[178].mxu1 }
 0x726   : > { %3859 = vst [vmem:[%s7688_s24 + $0x18] sm:$0xff] %v3424_v58  ;;  %3904 = vst [vmem:[%s7644_s20 + $0x80] sm:$0xff] %v3738_v56  ;;  %v3742_v57 = vadd.f32 %v3741_v43, %v7635_v34  ;;  %v3743_v55 = vpop.f32.mrb[179].mxu1 }
 0x727   : > { %3857 = vst [vmem:[%s7688_s24 + $0x8] sm:$0xff] %v3416_v37  ;;  %3905 = vst [vmem:[%s7644_s20 + $0x88] sm:$0xff] %v3740_v5  ;;  %v3744_v7 = vadd.f32 %v3743_v55, %v7637_v14 }
 0x728   : > { %3906 = vst [vmem:[%s7644_s20 + $0x90] sm:$0xff] %v3742_v57 }
 0x729   : > { %3907 = vst [vmem:[%s7644_s20 + $0x98] sm:$0xff] %v3744_v7  ;;  %v4919_v36 = vpop.f32.mrb[196].mxu0 }
 0x72a   : > { %v3437_v16 = vadd.f32 %v4919_v36, %v7677_v63  ;;  %v3428_v4 = vpop.f32.mrb[197].mxu0 }
 0x72b   : > { %v3429_v6 = vadd.f32 %v7677_v63, %v3428_v4  ;;  %v4920_v50 = vpop.f32.mrb[198].mxu0  ;;  %v3747_v54 = vpop.f32.mrb[180].mxu1 }
 0x72c   : > { %3862 = vst [vmem:[%s7688_s24 + $0x30] sm:$0xff] %v3437_v16  ;;  %v3440_v11 = vadd.f32 %v4920_v50, %v7677_v63  ;;  %v3748_v49 = vadd.f32 %v3747_v54, %v7635_v34  ;;  %v3431_v59 = vpop.f32.mrb[199].mxu0  ;;  %v3749_v0 = vpop.f32.mrb[181].mxu1 }
 0x72d   : > { %3860 = vst [vmem:[%s7688_s24 + $0x20] sm:$0xff] %v3429_v6  ;;  %v3432_v17 = vadd.f32 %v7677_v63, %v3431_v59  ;;  %v3750_v25 = vadd.f32 %v3749_v0, %v7637_v14  ;;  %v3751_v29 = vpop.f32.mrb[182].mxu1 }
 0x72e   : > { %3863 = vst [vmem:[%s7688_s24 + $0x38] sm:$0xff] %v3440_v11  ;;  %3908 = vst [vmem:[%s7644_s20 + $0xa0] sm:$0xff] %v3748_v49  ;;  %v3752_v41 = vadd.f32 %v3751_v29, %v7635_v34  ;;  %v3753_v19 = vpop.f32.mrb[183].mxu1 }
 0x72f   : > { %3861 = vst [vmem:[%s7688_s24 + $0x28] sm:$0xff] %v3432_v17  ;;  %3909 = vst [vmem:[%s7644_s20 + $0xa8] sm:$0xff] %v3750_v25  ;;  %v3754_v39 = vadd.f32 %v3753_v19, %v7637_v14 }
 0x730   : > { %3910 = vst [vmem:[%s7644_s20 + $0xb0] sm:$0xff] %v3752_v41 }
 0x731   : > { %3911 = vst [vmem:[%s7644_s20 + $0xb8] sm:$0xff] %v3754_v39  ;;  %v4923_v23 = vpop.f32.mrb[200].mxu0 }
 0x732   : > { %v3453_v62 = vadd.f32 %v4923_v23, %v7677_v63  ;;  %v3444_v21 = vpop.f32.mrb[201].mxu0 }
 0x733   : > { %v3445_v40 = vadd.f32 %v7677_v63, %v3444_v21  ;;  %v4924_v47 = vpop.f32.mrb[202].mxu0  ;;  %v3757_v15 = vpop.f32.mrb[184].mxu1 }
 0x734   : > { %3866 = vst [vmem:[%s7688_s24 + $0x50] sm:$0xff] %v3453_v62  ;;  %v3456_v52 = vadd.f32 %v4924_v47, %v7677_v63  ;;  %v3758_v31 = vadd.f32 %v3757_v15, %v7635_v34  ;;  %v3447_v10 = vpop.f32.mrb[203].mxu0  ;;  %v3759_v1 = vpop.f32.mrb[185].mxu1 }
 0x735   : > { %3864 = vst [vmem:[%s7688_s24 + $0x40] sm:$0xff] %v3445_v40  ;;  %v3448_v13 = vadd.f32 %v7677_v63, %v3447_v10  ;;  %v3760_v28 = vadd.f32 %v3759_v1, %v7637_v14  ;;  %v3761_v44 = vpop.f32.mrb[186].mxu1 }
 0x736   : > { %3867 = vst [vmem:[%s7688_s24 + $0x58] sm:$0xff] %v3456_v52  ;;  %3912 = vst [vmem:[%s7644_s20 + $0xc0] sm:$0xff] %v3758_v31  ;;  %v3762_v38 = vadd.f32 %v3761_v44, %v7635_v34  ;;  %v3763_v51 = vpop.f32.mrb[187].mxu1 }
 0x737   : > { %3865 = vst [vmem:[%s7688_s24 + $0x48] sm:$0xff] %v3448_v13  ;;  %3913 = vst [vmem:[%s7644_s20 + $0xc8] sm:$0xff] %v3760_v28  ;;  %v3764_v27 = vadd.f32 %v3763_v51, %v7637_v14 }
 0x738   : > { %3914 = vst [vmem:[%s7644_s20 + $0xd0] sm:$0xff] %v3762_v38 }
 0x739   : > { %3915 = vst [vmem:[%s7644_s20 + $0xd8] sm:$0xff] %v3764_v27  ;;  %v4927_v9 = vpop.f32.mrb[204].mxu0 }
 0x73a   : > { %v3469_v30 = vadd.f32 %v4927_v9, %v7677_v63  ;;  %v3460_v20 = vpop.f32.mrb[205].mxu0 }
 0x73b   : > { %v3461_v3 = vadd.f32 %v7677_v63, %v3460_v20  ;;  %v4928_v35 = vpop.f32.mrb[206].mxu0  ;;  %v3767_v24 = vpop.f32.mrb[188].mxu1 }
 0x73c   : > { %3870 = vst [vmem:[%s7688_s24 + $0x70] sm:$0xff] %v3469_v30  ;;  %v3472_v2 = vadd.f32 %v4928_v35, %v7677_v63  ;;  %v3768_v8 = vadd.f32 %v3767_v24, %v7635_v34  ;;  %v3463_v26 = vpop.f32.mrb[207].mxu0  ;;  %v3769_v18 = vpop.f32.mrb[189].mxu1 }
 0x73d   : > { %3868 = vst [vmem:[%s7688_s24 + $0x60] sm:$0xff] %v3461_v3  ;;  %v3464_v60 = vadd.f32 %v7677_v63, %v3463_v26  ;;  %v3770_v61 = vadd.f32 %v3769_v18, %v7637_v14  ;;  %v3771_v22 = vpop.f32.mrb[190].mxu1 }
 0x73e   : > { %3871 = vst [vmem:[%s7688_s24 + $0x78] sm:$0xff] %v3472_v2  ;;  %3916 = vst [vmem:[%s7644_s20 + $0xe0] sm:$0xff] %v3768_v8  ;;  %v3772_v45 = vadd.f32 %v3771_v22, %v7635_v34  ;;  %v3773_v48 = vpop.f32.mrb[191].mxu1 }
 0x73f   : > { %3869 = vst [vmem:[%s7688_s24 + $0x68] sm:$0xff] %v3464_v60  ;;  %3917 = vst [vmem:[%s7644_s20 + $0xe8] sm:$0xff] %v3770_v61  ;;  %v3774_v12 = vadd.f32 %v3773_v48, %v7637_v14 }
 0x740   : > { %3918 = vst [vmem:[%s7644_s20 + $0xf0] sm:$0xff] %v3772_v45 }
 0x741   : > { %3919 = vst [vmem:[%s7644_s20 + $0xf8] sm:$0xff] %v3774_v12 }
 0x78a   : > { %v4931_v46 = vpop.f32.mrb[208].mxu0 }
 0x78b   : > { %v3485_v42 = vadd.f32 %v4931_v46, %v7677_v63  ;;  %v3476_v33 = vpop.f32.mrb[209].mxu0 }
 0x78c   : > { %v3477_v58 = vadd.f32 %v7677_v63, %v3476_v33  ;;  %v4932_v56 = vpop.f32.mrb[210].mxu0 }
 0x78d   : > { %3874 = vst [vmem:[%s7688_s24 + $0x90] sm:$0xff] %v3485_v42  ;;  %v3488_v32 = vadd.f32 %v4932_v56, %v7677_v63  ;;  %v3479_v53 = vpop.f32.mrb[211].mxu0 }
 0x78e   : > { %3872 = vst [vmem:[%s7688_s24 + $0x80] sm:$0xff] %v3477_v58  ;;  %v3480_v37 = vadd.f32 %v7677_v63, %v3479_v53 }
 0x78f   : > { %3875 = vst [vmem:[%s7688_s24 + $0x98] sm:$0xff] %v3488_v32 }
 0x790   : > { %3873 = vst [vmem:[%s7688_s24 + $0x88] sm:$0xff] %v3480_v37 }
 0x79a   : > { %v4935_v5 = vpop.f32.mrb[212].mxu0 }
 0x79b   : > { %v3501_v43 = vadd.f32 %v4935_v5, %v7677_v63  ;;  %v3492_v57 = vpop.f32.mrb[213].mxu0 }
 0x79c   : > { %v3493_v55 = vadd.f32 %v7677_v63, %v3492_v57  ;;  %v4936_v7 = vpop.f32.mrb[214].mxu0 }
 0x79d   : > { %3878 = vst [vmem:[%s7688_s24 + $0xb0] sm:$0xff] %v3501_v43  ;;  %v3504_v36 = vadd.f32 %v4936_v7, %v7677_v63  ;;  %v3495_v16 = vpop.f32.mrb[215].mxu0 }
 0x79e   : > { %3876 = vst [vmem:[%s7688_s24 + $0xa0] sm:$0xff] %v3493_v55  ;;  %v3496_v4 = vadd.f32 %v7677_v63, %v3495_v16 }
 0x79f   : > { %3879 = vst [vmem:[%s7688_s24 + $0xb8] sm:$0xff] %v3504_v36 }
 0x7a0   : > { %3877 = vst [vmem:[%s7688_s24 + $0xa8] sm:$0xff] %v3496_v4 }
 0x7aa   : > { %v4939_v6 = vpop.f32.mrb[216].mxu0 }
 0x7ab   : > { %v3517_v50 = vadd.f32 %v4939_v6, %v7677_v63  ;;  %v3508_v54 = vpop.f32.mrb[217].mxu0 }
 0x7ac   : > { %v3509_v11 = vadd.f32 %v7677_v63, %v3508_v54  ;;  %v4940_v49 = vpop.f32.mrb[218].mxu0 }
 0x7ad   : > { %3882 = vst [vmem:[%s7688_s24 + $0xd0] sm:$0xff] %v3517_v50  ;;  %v3520_v59 = vadd.f32 %v4940_v49, %v7677_v63  ;;  %v3511_v0 = vpop.f32.mrb[219].mxu0 }
 0x7ae   : > { %3880 = vst [vmem:[%s7688_s24 + $0xc0] sm:$0xff] %v3509_v11  ;;  %v3512_v17 = vadd.f32 %v7677_v63, %v3511_v0 }
 0x7af   : > { %3883 = vst [vmem:[%s7688_s24 + $0xd8] sm:$0xff] %v3520_v59 }
 0x7b0   : > { %3881 = vst [vmem:[%s7688_s24 + $0xc8] sm:$0xff] %v3512_v17 }
 0x7b6   : > { %v4943_v25 = vpop.f32.mrb[220].mxu0 }
 0x7b7   : > { %v3533_v29 = vadd.f32 %v4943_v25, %v7677_v63  ;;  %v3524_v41 = vpop.f32.mrb[221].mxu0 }
 0x7b8   : > { %v3525_v19 = vadd.f32 %v7677_v63, %v3524_v41  ;;  %v4944_v39 = vpop.f32.mrb[222].mxu0 }
 0x7b9   : > { %3886 = vst [vmem:[%s7688_s24 + $0xf0] sm:$0xff] %v3533_v29  ;;  %v3536_v23 = vadd.f32 %v4944_v39, %v7677_v63  ;;  %v3527_v62 = vpop.f32.mrb[223].mxu0 }
 0x7ba   : > { %3884 = vst [vmem:[%s7688_s24 + $0xe0] sm:$0xff] %v3525_v19  ;;  %v3528_v21 = vadd.f32 %v7677_v63, %v3527_v62 }
 0x7bb   : > { %3887 = vst [vmem:[%s7688_s24 + $0xf8] sm:$0xff] %v3536_v23 }
 0x7bc   : > { %3885 = vst [vmem:[%s7688_s24 + $0xe8] sm:$0xff] %v3528_v21 }
 0x7bd   : > { %5694 = shalt.err (!%p5691_p7)
}
 0x7be   : > { %s5695_s3 = scalar_lea.hbm %s7785_s14, 4096  ;;  %s5699_s25 = scalar_lea.hbm %s7939_s8, 16384 }
 0x7bf   : > { %p5696_p11 = scmp.ne.s32.totalorder %s7785_s14, %s5695_s3  ;;  %p5700_p1 = scmp.lt.u32.totalorder %s7785_s14, %s7939_s8 }
 0x7c0   : > { %p5701_p13 = scmp.lt.u32.totalorder %s5699_s25, %s5695_s3  ;;  %p5703_p6 = scmp.lt.u32.totalorder %s5695_s3, %s7785_s14 }
 0x7c1   : > { %p5697_p3 = pnand %p5696_p11, %p8276_p2 }
 0x7c2   : > { %p5702_p0 = por %p5701_p13, %p5700_p1 }
 0x7c3   : > { %p5698_p12 = pneg %p5697_p3 }
 0x7c4   : > { %p5704_p5 = por %p5703_p6, %p5702_p0 }
 0x7c6   : > { %p5705_p10 = pnand %p5704_p5, %p5698_p12 }
 0x7c8   : > { %5708 = shalt.err (!%p5705_p10)
}
 0x7c9   : > { %s5814_s24 = smov 128   ;;  %s5815_s2 = smov 8   ;;  %v3777_v63 = vpop.f32.mrb[192].mxu1 }
 0x7ca   : > { %5001 = dma.vmem_to_hbm [thread:$0]  (%p8276_p2), %s7787_s0, 4096, %s7785_s14, %s3953_s6, %s5814_s24, %s5814_s24, %s5815_s2   ;;  %v3778_v40 = vadd.f32 %v3777_v63, %v7635_v34  ;;  %v3779_v47 = vpop.f32.mrb[193].mxu1 }
 0x7cb   : > { %v3780_v15 = vadd.f32 %v3779_v47, %v7637_v14  ;;  %v3781_v52 = vpop.f32.mrb[194].mxu1  ;;  %s4304_s0 = sshll.u32 %s5890_s15, 13  ;;  %s3989_s4 = sshll.u32 %s7644_s20, 4  ;;  %s7884_s4 = int_to_ptr.vmem [resolvable:$true] %s3989_s4 }
 0x7cc   : > { %3920 = vst [vmem:[%s7644_s20 + $0x100] sm:$0xff] %v3778_v40  ;;  %v3782_v31 = vadd.f32 %v3781_v52, %v7635_v34  ;;  %v3783_v10 = vpop.f32.mrb[195].mxu1  ;;  %s8277_s6 = sld [smem:[#allocation79_spill]]  ;;  %s3958_s15 = scalar_lea.sflag [#allocation16], %s6147_s18 }
 0x7cd   : > { %3921 = vst [vmem:[%s7644_s20 + $0x108] sm:$0xff] %v3780_v15  ;;  %v3784_v1 = vadd.f32 %v3783_v10, %v7637_v14  ;;  %v3787_v13 = vpop.f32.mrb[196].mxu1  ;;  %s5709_s21 = scalar_lea.vmem %s7884_s4, 8192  ;;  %s5816_s27 = smov [#allocation15]  }
 0x7ce   : > { %3922 = vst [vmem:[%s7644_s20 + $0x110] sm:$0xff] %v3782_v31  ;;  %v3788_v28 = vadd.f32 %v3787_v13, %v7635_v34  ;;  %v3789_v44 = vpop.f32.mrb[197].mxu1  ;;  %p5710_p4 = scmp.ne.s32.totalorder %s7884_s4, %s5709_s21  ;;  %s5713_s28 = sshll.u32 %s5816_s27, 4  ;;  %s5714_s28 = int_to_ptr.vmem [resolvable:$false] %s5713_s28 }
 0x7cf   : > { %3923 = vst [vmem:[%s7644_s20 + $0x118] sm:$0xff] %v3784_v1  ;;  %v3790_v38 = vadd.f32 %v3789_v44, %v7637_v14  ;;  %v3791_v51 = vpop.f32.mrb[198].mxu1  ;;  %s5715_s3 = scalar_lea.vmem %s5714_s28, 16384  ;;  %p5716_p7 = scmp.lt.s32.totalorder %s7884_s4, %s5714_s28 }
 0x7d0   : > { %3924 = vst [vmem:[%s7644_s20 + $0x120] sm:$0xff] %v3788_v28  ;;  %v3792_v27 = vadd.f32 %v3791_v51, %v7635_v34  ;;  %v3793_v9 = vpop.f32.mrb[199].mxu1  ;;  %p5711_p8 = pnand %p5710_p4, %p8276_p2  ;;  %p5717_p11 = scmp.lt.s32.totalorder %s5715_s3, %s5709_s21 }
 0x7d1   : > { %3925 = vst [vmem:[%s7644_s20 + $0x128] sm:$0xff] %v3790_v38  ;;  %v3794_v30 = vadd.f32 %v3793_v9, %v7637_v14  ;;  %v3797_v20 = vpop.f32.mrb[200].mxu1 }
 0x7d2   : > { %3926 = vst [vmem:[%s7644_s20 + $0x130] sm:$0xff] %v3792_v27  ;;  %v3798_v3 = vadd.f32 %v3797_v20, %v7635_v34  ;;  %v3799_v35 = vpop.f32.mrb[201].mxu1  ;;  %s7882_s13 = scalar_lea.hbm %s8277_s6, %s4304_s0  ;;  %p5712_p9 = pneg %p5711_p8 }
 0x7d3   : > { %3927 = vst [vmem:[%s7644_s20 + $0x138] sm:$0xff] %v3794_v30  ;;  %v3800_v24 = vadd.f32 %v3799_v35, %v7637_v14  ;;  %v3801_v2 = vpop.f32.mrb[202].mxu1  ;;  %p5718_p3 = por %p5717_p11, %p5716_p7 }
 0x7d4   : > { %3928 = vst [vmem:[%s7644_s20 + $0x140] sm:$0xff] %v3798_v3  ;;  %v3802_v8 = vadd.f32 %v3801_v2, %v7635_v34  ;;  %v3803_v26 = vpop.f32.mrb[203].mxu1 }
 0x7d5   : > { %3929 = vst [vmem:[%s7644_s20 + $0x148] sm:$0xff] %v3800_v24  ;;  %v3804_v18 = vadd.f32 %v3803_v26, %v7637_v14  ;;  %p5719_p12 = pnand %p5718_p3, %p5712_p9 }
 0x7d6   : > { %3930 = vst [vmem:[%s7644_s20 + $0x150] sm:$0xff] %v3802_v8  ;;  %v3807_v60 = vpop.f32.mrb[204].mxu1 }
 0x7d7   : > { %3931 = vst [vmem:[%s7644_s20 + $0x158] sm:$0xff] %v3804_v18  ;;  %v3808_v61 = vadd.f32 %v3807_v60, %v7635_v34  ;;  %v3809_v22 = vpop.f32.mrb[205].mxu1 }
 0x7d8   : > { %v3810_v45 = vadd.f32 %v3809_v22, %v7637_v14  ;;  %v3811_v48 = vpop.f32.mrb[206].mxu1 }
 0x7d9   : > { %3932 = vst [vmem:[%s7644_s20 + $0x160] sm:$0xff] %v3808_v61  ;;  %v3812_v12 = vadd.f32 %v3811_v48, %v7635_v34  ;;  %v3813_v46 = vpop.f32.mrb[207].mxu1 }
 0x7da   : > { %3933 = vst [vmem:[%s7644_s20 + $0x168] sm:$0xff] %v3810_v45  ;;  %v3814_v42 = vadd.f32 %v3813_v46, %v7637_v14 }
 0x7db   : > { %3934 = vst [vmem:[%s7644_s20 + $0x170] sm:$0xff] %v3812_v12 }
 0x7dc   : > { %3935 = vst [vmem:[%s7644_s20 + $0x178] sm:$0xff] %v3814_v42 }
 0x7de   : > { %v3817_v33 = vpop.f32.mrb[208].mxu1 }
 0x7df   : > { %v3818_v58 = vadd.f32 %v3817_v33, %v7635_v34  ;;  %v3819_v56 = vpop.f32.mrb[209].mxu1 }
 0x7e0   : > { %v3820_v32 = vadd.f32 %v3819_v56, %v7637_v14  ;;  %v3821_v53 = vpop.f32.mrb[210].mxu1 }
 0x7e1   : > { %3936 = vst [vmem:[%s7644_s20 + $0x180] sm:$0xff] %v3818_v58  ;;  %v3822_v37 = vadd.f32 %v3821_v53, %v7635_v34  ;;  %v3823_v5 = vpop.f32.mrb[211].mxu1 }
 0x7e2   : > { %3937 = vst [vmem:[%s7644_s20 + $0x188] sm:$0xff] %v3820_v32  ;;  %v3824_v43 = vadd.f32 %v3823_v5, %v7637_v14 }
 0x7e3   : > { %3938 = vst [vmem:[%s7644_s20 + $0x190] sm:$0xff] %v3822_v37 }
 0x7e4   : > { %3939 = vst [vmem:[%s7644_s20 + $0x198] sm:$0xff] %v3824_v43 }
 0x7e6   : > { %v3827_v57 = vpop.f32.mrb[212].mxu1 }
 0x7e7   : > { %v3828_v55 = vadd.f32 %v3827_v57, %v7635_v34  ;;  %v3829_v7 = vpop.f32.mrb[213].mxu1 }
 0x7e8   : > { %v3830_v36 = vadd.f32 %v3829_v7, %v7637_v14  ;;  %v3831_v16 = vpop.f32.mrb[214].mxu1 }
 0x7e9   : > { %3940 = vst [vmem:[%s7644_s20 + $0x1a0] sm:$0xff] %v3828_v55  ;;  %v3832_v4 = vadd.f32 %v3831_v16, %v7635_v34  ;;  %v3833_v6 = vpop.f32.mrb[215].mxu1 }
 0x7ea   : > { %3941 = vst [vmem:[%s7644_s20 + $0x1a8] sm:$0xff] %v3830_v36  ;;  %v3834_v50 = vadd.f32 %v3833_v6, %v7637_v14 }
 0x7eb   : > { %3942 = vst [vmem:[%s7644_s20 + $0x1b0] sm:$0xff] %v3832_v4 }
 0x7ec   : > { %3943 = vst [vmem:[%s7644_s20 + $0x1b8] sm:$0xff] %v3834_v50 }
 0x7ee   : > { %v3837_v54 = vpop.f32.mrb[216].mxu1 }
 0x7ef   : > { %v3838_v11 = vadd.f32 %v3837_v54, %v7635_v34  ;;  %v3839_v49 = vpop.f32.mrb[217].mxu1 }
 0x7f0   : > { %v3840_v59 = vadd.f32 %v3839_v49, %v7637_v14  ;;  %v3841_v0 = vpop.f32.mrb[218].mxu1 }
 0x7f1   : > { %3944 = vst [vmem:[%s7644_s20 + $0x1c0] sm:$0xff] %v3838_v11  ;;  %v3842_v17 = vadd.f32 %v3841_v0, %v7635_v34  ;;  %v3843_v25 = vpop.f32.mrb[219].mxu1 }
 0x7f2   : > { %3945 = vst [vmem:[%s7644_s20 + $0x1c8] sm:$0xff] %v3840_v59  ;;  %v3844_v29 = vadd.f32 %v3843_v25, %v7637_v14 }
 0x7f3   : > { %3946 = vst [vmem:[%s7644_s20 + $0x1d0] sm:$0xff] %v3842_v17 }
 0x7f4   : > { %3947 = vst [vmem:[%s7644_s20 + $0x1d8] sm:$0xff] %v3844_v29 }
 0x7f6   : > { %v3847_v41 = vpop.f32.mrb[220].mxu1 }
 0x7f7   : > { %v3848_v19 = vadd.f32 %v3847_v41, %v7635_v34  ;;  %v3849_v39 = vpop.f32.mrb[221].mxu1 }
 0x7f8   : > { %v3850_v23 = vadd.f32 %v3849_v39, %v7637_v14  ;;  %v3851_v62 = vpop.f32.mrb[222].mxu1 }
 0x7f9   : > { %3948 = vst [vmem:[%s7644_s20 + $0x1e0] sm:$0xff] %v3848_v19  ;;  %v3852_v21 = vadd.f32 %v3851_v62, %v7635_v34  ;;  %v3853_v63 = vpop.f32.mrb[223].mxu1 }
 0x7fa   : > { %3949 = vst [vmem:[%s7644_s20 + $0x1e8] sm:$0xff] %v3850_v23  ;;  %v3854_v40 = vadd.f32 %v3853_v63, %v7637_v14 }
 0x7fb   : > { %3950 = vst [vmem:[%s7644_s20 + $0x1f0] sm:$0xff] %v3852_v21 }
 0x7fc   : > { %3951 = vst [vmem:[%s7644_s20 + $0x1f8] sm:$0xff] %v3854_v40 }
 0x7fd   : > { %5722 = shalt.err (!%p5719_p12)
}
 0x7fe   : > { %s5723_s20 = scalar_lea.hbm %s7882_s13, 8192  ;;  %s5727_s25 = scalar_lea.hbm %s8277_s6, 32768 }
 0x7ff   : > { %p5724_p1 = scmp.ne.s32.totalorder %s7882_s13, %s5723_s20  ;;  %p5728_p6 = scmp.lt.u32.totalorder %s7882_s13, %s8277_s6 }
 0x800   : > { %p5729_p5 = scmp.lt.u32.totalorder %s5727_s25, %s5723_s20  ;;  %p5731_p4 = scmp.lt.u32.totalorder %s5723_s20, %s7882_s13 }
 0x801   : > { %p5725_p13 = pnand %p5724_p1, %p8276_p2 }
 0x802   : > { %p5730_p10 = por %p5729_p5, %p5728_p6 }
 0x803   : > { %p5726_p0 = pneg %p5725_p13 }
 0x804   : > { %p5732_p8 = por %p5731_p4, %p5730_p10 }
 0x806   : > { %p5733_p9 = pnand %p5732_p8, %p5726_p0 }
 0x808   : > { %5736 = shalt.err (!%p5733_p9)
}
 0x809   : > { %s5817_s24 = smov 256   ;;  %s5818_s2 = smov 16  }
 0x80a   : > { %5002 = dma.vmem_to_hbm [thread:$0]  (%p8276_p2), %s7884_s4, 8192, %s7882_s13, %s3958_s15, %s5817_s24, %s5817_s24, %s5818_s2  }
 0x80b PF: > { %p5046_p7 = scmp.ge.s32.totalorder %s5795_s12, 2  ;;  %s4004_s0 = sand.u32 1, %s5783_s30  }
 0x80c   : > { %p8278_p11 = scmp.ne.s32.totalorder %s8028_s29, 0  ;;  %s4005_s22 = scalar_lea.sflag [#allocation4], %s4004_s0 }
 0x80e   : > { %p5029_p3 = pnand %p5046_p7, %p8278_p11 }
 0x810   : > { %5774 = dma.done.wait (!%p5029_p3), %s4005_s22, 4096  }
 0x811   : > { %5776 = vsyncadd (!%p5029_p3), %s4005_s22, 4294963200  ;;  %s4014_s14 = scalar_lea.sflag [#allocation16], %s4004_s0 }
 0x812   : > { %5778 = dma.done.wait (!%p5029_p3), %s4014_s14, 8192  }
 0x813   : > { %5780 = vsyncadd (!%p5029_p3), %s4014_s14, 4294959104  ;;  %p31_p2 = scmp.ge.s32.totalorder %s6030_s9, 6   ;;  %s8279_s30 = smov %s5787_s10 }
 0x814   : > { %s8280_s10 = smov %s5791_s11  ;;  %s8281_s11 = smov %s6042_s19 }
 0x815   : > { %s8282_s12 = smov %s6030_s9  ;;  %33 = sbr.rel (!%p31_p2) target bundleno = 19 (0x13), region = 147 }
 0x81c   :  { %4019 = vsyncpa [#allocation3], 1 }
 0x81d   :  { %4021 = vsyncpa [#allocation3 + $0x1], 1 }
 0x81e   :  { %4022 = vsyncpa [#allocation6], 1 }
 0x81f   :  { %4024 = vsyncpa [#allocation6 + $0x1], 1 }
 0x820   :  { %4025 = vsyncpa [#allocation9], 1 }
 0x821   :  { %4026 = vsyncpa [#allocation12], 1 }
 0x822   :  { %4027 = vsyncpa [#allocation4], 1 }
 0x823   :  { %4029 = vsyncpa [#allocation4 + $0x1], 1 }
 0x824   :  { %4030 = vsyncpa [#allocation16], 1 }
 0x825   :  { %4032 = vsyncpa [#allocation16 + $0x1], 1 }

</bundles_post_ra>
